<compile_context>
chip_gen: v6e
topology: v6e:2x2x1
jax: 0.10.0
libtpu: 0.0.40
codegen_flags: <defaults>
</compile_context>

<pallas_src>
import functools

import jax
import jax.numpy as jnp
from jax.experimental import pallas as pl
from jax.experimental.pallas import tpu as pltpu

BN_EPS = 1e-5
LANE = 128            # TPU lane width
SUBLANE = 16          # bf16 sublane packing granularity
M_TILE_CAP = 512
N_TILE_CAP = 256
K_TILE_CAP = 512


# ---------------------------------------------------------------------------
# Small helpers
# ---------------------------------------------------------------------------
def _round_up(x, m):
    return (x + m - 1) // m * m


def _pick_tile(dim, cap, align):
    """Largest tile <= cap that divides `dim` and is a multiple of `align`."""
    for t in range(min(cap, dim), align - 1, -align):
        if dim % t == 0:
            return t
    return align


def _pad2d(a, rows, cols):
    r, c = a.shape
    if (r, c) == (rows, cols):
        return a
    return jnp.pad(a, ((0, rows - r), (0, cols - c)))


# ---------------------------------------------------------------------------
# Pallas kernels: tiled matmul + fused BN / residual / ReLU epilogue
# ---------------------------------------------------------------------------
def _mm_bn_kernel(x_ref, w_ref, s_ref, b_ref, o_ref, acc_ref, *, relu):
    # grid = (M tiles, N tiles, K tiles); K is innermost ("arbitrary").
    @pl.when(pl.program_id(2) == 0)
    def _():
        acc_ref[...] = jnp.zeros_like(acc_ref)

    acc_ref[...] += jnp.dot(x_ref[...], w_ref[...],
                            preferred_element_type=jnp.float32)

    @pl.when(pl.program_id(2) == pl.num_programs(2) - 1)
    def _():
        y = acc_ref[...] * s_ref[...] + b_ref[...]
        if relu:
            y = jnp.maximum(y, 0.0)
        o_ref[...] = y.astype(o_ref.dtype)


def _mm_bn_res_relu_kernel(x_ref, w_ref, s_ref, b_ref, r_ref, o_ref, acc_ref):
    # Bottleneck conv3 path: matmul + BN + residual add + ReLU, epilogue-fused.
    @pl.when(pl.program_id(2) == 0)
    def _():
        acc_ref[...] = jnp.zeros_like(acc_ref)

    acc_ref[...] += jnp.dot(x_ref[...], w_ref[...],
                            preferred_element_type=jnp.float32)

    @pl.when(pl.program_id(2) == pl.num_programs(2) - 1)
    def _():
        y = acc_ref[...] * s_ref[...] + b_ref[...] + r_ref[...]
        o_ref[...] = jnp.maximum(y, 0.0).astype(o_ref.dtype)


def matmul_bn(x2d, w2d, scale, bias, oc, *, relu, residual=None):
    """(M, K) bf16 @ (Kp, Np) bf16 with fused BN/residual/ReLU -> (M, oc) f32."""
    M = x2d.shape[0]
    Kp, Np = w2d.shape                       # weights pre-padded at init

    Mp = _round_up(M, SUBLANE)
    TM = _pick_tile(Mp, M_TILE_CAP, SUBLANE)
    TN = _pick_tile(Np, N_TILE_CAP, LANE)
    TK = _pick_tile(Kp, K_TILE_CAP, LANE)

    x2d = _pad2d(x2d, Mp, Kp)
    grid = (Mp // TM, Np // TN, Kp // TK)

    in_specs = [
        pl.BlockSpec((TM, TK), lambda i, j, k: (i, k)),
        pl.BlockSpec((TK, TN), lambda i, j, k: (k, j)),
        pl.BlockSpec((1, TN), lambda i, j, k: (0, j)),
        pl.BlockSpec((1, TN), lambda i, j, k: (0, j)),
    ]
    args = [x2d, w2d, scale, bias]
    if residual is None:
        kernel = functools.partial(_mm_bn_kernel, relu=relu)
    else:
        kernel = _mm_bn_res_relu_kernel
        in_specs.append(pl.BlockSpec((TM, TN), lambda i, j, k: (i, j)))
        args.append(_pad2d(residual.astype(jnp.float32), Mp, Np))

    out = pl.pallas_call(
        kernel,
        grid=grid,
        in_specs=in_specs,
        out_specs=pl.BlockSpec((TM, TN), lambda i, j, k: (i, j)),
        out_shape=jax.ShapeDtypeStruct((Mp, Np), jnp.float32),
        scratch_shapes=[pltpu.VMEM((TM, TN), jnp.float32)],
        compiler_params=pltpu.CompilerParams(
            dimension_semantics=("parallel", "parallel", "arbitrary"),
            vmem_limit_bytes=32 * 1024 * 1024),
    )(*args)
    return out[:M, :oc]


# ---------------------------------------------------------------------------
# Conv = im2col (glue) + fused Pallas matmul
# ---------------------------------------------------------------------------
def _im2col(x, kh, kw, stride, padding):
    """NHWC im2col. Returns (patches (N, OH, OW, kh*kw*C), OH, OW)."""
    if kh == 1 and kw == 1 and stride == 1 and padding == 0:
        n, h, w, _ = x.shape
        return x, h, w
    if padding:
        x = jnp.pad(x, ((0, 0), (padding, padding), (padding, padding), (0, 0)))
    n, h, w, c = x.shape
    oh = (h - kh) // stride + 1
    ow = (w - kw) // stride + 1
    # TODO(synk): fold the kh*kw taps into the kernel's K reduction (shifted-window
    # DMA) instead of materialising the 3x3-expanded patch tensor in HBM.
    cols = [x[:, i:i + stride * oh:stride, j:j + stride * ow:stride, :]
            for i in range(kh) for j in range(kw)]
    return jnp.concatenate(cols, axis=-1), oh, ow


def conv_bn(x, layer, *, relu=True, residual=None):
    n = x.shape[0]
    patches, oh, ow = _im2col(x.astype(jnp.bfloat16), layer["kh"], layer["kw"],
                              layer["stride"], layer["padding"])
    m = n * oh * ow
    x2d = patches.reshape(m, layer["kh"] * layer["kw"] * x.shape[-1])
    res2d = residual.reshape(m, layer["oc"]) if residual is not None else None
    out2d = matmul_bn(x2d, layer["w"], layer["scale"], layer["bias"], layer["oc"],
                      relu=relu, residual=res2d)
    return out2d.reshape(n, oh, ow, layer["oc"])


# ---------------------------------------------------------------------------
# Deterministic parameter initialization (synthetic weights, pre-packed)
# ---------------------------------------------------------------------------
def _init_conv(key, oc, ic, kh, kw):
    return 0.05 * jax.random.normal(key, (oc, ic, kh, kw), jnp.float32)


def _init_bn(key, c):
    k1, k2, k3, k4 = jax.random.split(key, 4)
    gamma = 1.0 + 0.1 * jax.random.normal(k1, (c,), jnp.float32)
    beta = 0.1 * jax.random.normal(k2, (c,), jnp.float32)
    mean = 0.1 * jax.random.normal(k3, (c,), jnp.float32)
    var = 0.5 + jnp.abs(jax.random.normal(k4, (c,), jnp.float32))
    scale = gamma / jnp.sqrt(var + BN_EPS)        # folded eval-mode BatchNorm
    bias = beta - mean * scale
    return scale, bias


def _pack_conv_bn(conv_w, scale, bias, *, stride=1, padding=0, fold_pool=False):
    """Pre-transpose / pad / bf16-cast conv + folded-BN params for the Pallas matmul.

    fold_pool=True exactly folds a preceding AvgPool2d(2) into a 1x1 conv by
    turning it into a 2x2/stride-2 conv whose four taps carry w/4.
    """
    oc, ic, kh, kw = conv_w.shape
    w2d = jnp.transpose(conv_w, (2, 3, 1, 0)).reshape(kh * kw * ic, oc)
    if fold_pool:
        assert (kh, kw) == (1, 1)
        w2d = jnp.tile(w2d, (4, 1)) * 0.25
        kh = kw = 2
        stride, padding = 2, 0
    kp = _round_up(w2d.shape[0], LANE)
    np_ = _round_up(oc, LANE)                      # lane-dense (>=128) output tiles
    return {
        "w": _pad2d(w2d, kp, np_).astype(jnp.bfloat16),
        "scale": _pad2d(scale.reshape(1, oc), 1, np_),
        "bias": _pad2d(bias.reshape(1, oc), 1, np_),
        "kh": kh, "kw": kw, "stride": stride, "padding": padding, "oc": oc,
    }


def init_bottleneck(key, inplanes, planes, stride):
    ks = jax.random.split(key, 8)
    exp = 4
    fold = stride > 1                              # anti-aliasing AvgPool2d(stride)
    block = {
        "conv1": _pack_conv_bn(_init_conv(ks[0], planes, inplanes, 1, 1),
                               *_init_bn(ks[1], planes)),
        "conv2": _pack_conv_bn(_init_conv(ks[2], planes, planes, 3, 3),
                               *_init_bn(ks[3], planes), padding=1),
        # conv3 with the preceding avgpool folded in when stride > 1
        "conv3": _pack_conv_bn(_init_conv(ks[4], planes * exp, planes, 1, 1),
                               *_init_bn(ks[5], planes * exp), fold_pool=fold),
        "downsample": None,
    }
    if stride > 1 or inplanes != planes * exp:
        block["downsample"] = _pack_conv_bn(
            _init_conv(ks[6], planes * exp, inplanes, 1, 1),
            *_init_bn(ks[7], planes * exp), fold_pool=fold)
    return block


def init_modified_resnet(key, width=8):
    ks = jax.random.split(key, 7)
    params = {
        "conv1": _pack_conv_bn(_init_conv(ks[0], width // 2, 3, 3, 3),
                               *_init_bn(ks[1], width // 2), stride=2, padding=1),
        "conv2": _pack_conv_bn(_init_conv(ks[2], width // 2, width // 2, 3, 3),
                               *_init_bn(ks[3], width // 2), padding=1),
        "conv3": _pack_conv_bn(_init_conv(ks[4], width, width // 2, 3, 3),
                               *_init_bn(ks[5], width), padding=1),
        # stem AvgPool2d(2) expressed as an identity-weight 2x2/s2 conv so it runs
        # through the same fused, pipelined Pallas matmul (no separate pool kernel).
        "pool": _pack_conv_bn(
            jnp.eye(width, dtype=jnp.float32).reshape(width, width, 1, 1),
            jnp.ones((width,), jnp.float32), jnp.zeros((width,), jnp.float32),
            fold_pool=True),
    }
    layers_cfg = (1, 2, 3, 4)
    inplanes = width
    bkeys = jax.random.split(ks[6], sum(layers_cfg))
    ki = 0
    for li, blocks in enumerate(layers_cfg, start=1):
        planes = width * (1 << (li - 1))
        stride = 1 if li == 1 else 2
        layer = [init_bottleneck(bkeys[ki], inplanes, planes, stride)]
        ki += 1
        inplanes = planes * 4
        for _ in range(1, blocks):
            layer.append(init_bottleneck(bkeys[ki], inplanes, planes, 1))
            ki += 1
        params[f"layer{li}"] = layer
    return params


# ---------------------------------------------------------------------------
# Forward pass
# ---------------------------------------------------------------------------
def bottleneck_forward(p, x):
    out = conv_bn(x, p["conv1"], relu=True)
    out = conv_bn(out, p["conv2"], relu=True)
    if p["downsample"] is not None:
        # downsample = [AvgPool2d(stride) folded] 1x1 conv + BN (no ReLU)
        identity = conv_bn(x, p["downsample"], relu=False)
    else:
        identity = x
    # conv3 (avgpool folded when stride>1) + bn3 + residual add + ReLU, one kernel.
    return conv_bn(out, p["conv3"], relu=True, residual=identity)


def modified_resnet_forward(params, x_nchw):
    x = jnp.transpose(x_nchw, (0, 2, 3, 1)).astype(jnp.float32)   # NCHW -> NHWC
    # stem: 3 convs + avgpool(2) (pool implemented as identity 2x2/s2 conv)
    x = conv_bn(x, params["conv1"], relu=True)
    x = conv_bn(x, params["conv2"], relu=True)
    x = conv_bn(x, params["conv3"], relu=True)
    x = conv_bn(x, params["pool"], relu=False)
    # residual stages
    for li in range(1, 5):
        for block in params[f"layer{li}"]:
            x = bottleneck_forward(block, x)
    return jnp.transpose(x, (0, 3, 1, 2))                         # NHWC -> NCHW


if __name__ == "__main__":
    key = jax.random.PRNGKey(0)
    pkey, xkey = jax.random.split(key)
    width = 8                                    # small synthetic width (CLIP default 64)
    params = init_modified_resnet(pkey, width=width)
    x = jax.random.normal(xkey, (2, 3, 32, 32), jnp.float32)      # NCHW like PyTorch

    forward = jax.jit(functools.partial(modified_resnet_forward, params))
    out = jax.block_until_ready(forward(x))

    assert out.shape == (2, width * 8 * 4, 1, 1), out.shape
    assert bool(jnp.all(jnp.isfinite(out)))
    print("KERNEL_OK")
</pallas_src>

<mosaic_0001>
module attributes {stable_mosaic.version = 11 : i64} {
  func.func @_mm_bn_kernel(%arg0: i32, %arg1: i32, %arg2: i32, %arg3: memref<512x128xbf16, #tpu.memory_space<vmem>>, %arg4: memref<128x128xbf16, #tpu.memory_space<vmem>>, %arg5: memref<1x128xf32, #tpu.memory_space<vmem>>, %arg6: memref<1x128xf32, #tpu.memory_space<vmem>>, %arg7: memref<512x128xf32, #tpu.memory_space<vmem>>, %arg8: memref<512x128xf32, #tpu.memory_space<vmem>>) attributes {dimension_semantics = [#tpu.dimension_semantics<parallel>, #tpu.dimension_semantics<parallel>, #tpu.dimension_semantics<arbitrary>], iteration_bounds = array<i64: 1, 1, 1>, scalar_prefetch = 0 : i64, scratch_operands = 1 : i64, tpu.core_type = #tpu.core_type<tc>, window_params = [{transform_indices = @transform_0, window_bounds = array<i64: 512, 128>}, {transform_indices = @transform_1, window_bounds = array<i64: 128, 128>}, {transform_indices = @transform_2, window_bounds = array<i64: 1, 128>}, {transform_indices = @transform_3, window_bounds = array<i64: 1, 128>}, {transform_indices = @transform_4, window_bounds = array<i64: 512, 128>}]} {
    %c0_i32 = arith.constant 0 : i32
    %0 = arith.cmpi eq, %arg2, %c0_i32 : i32
    %1 = arith.extui %0 : i1 to i32
    %c0_i32_0 = arith.constant 0 : i32
    %2 = arith.cmpi ne, %1, %c0_i32_0 : i32
    scf.if %2 {
      %cst_10 = arith.constant 0.000000e+00 : f32
      %12 = vector.broadcast %cst_10 : f32 to vector<512x128xf32>
      %c0_11 = arith.constant 0 : index
      %c0_12 = arith.constant 0 : index
      %13 = vector.load %arg8[%c0_11, %c0_12] : memref<512x128xf32, #tpu.memory_space<vmem>>, vector<512x128xf32>
      tpu.vector_store %arg8[%c0_11, %c0_12], %12 {strides = array<i32>} : memref<512x128xf32, #tpu.memory_space<vmem>>, vector<512x128xf32>,
    } else {
    }
    %c0 = arith.constant 0 : index
    %c0_1 = arith.constant 0 : index
    %3 = vector.load %arg8[%c0, %c0_1] : memref<512x128xf32, #tpu.memory_space<vmem>>, vector<512x128xf32>
    %c0_2 = arith.constant 0 : index
    %c0_3 = arith.constant 0 : index
    %4 = vector.load %arg3[%c0_2, %c0_3] : memref<512x128xbf16, #tpu.memory_space<vmem>>, vector<512x128xbf16>
    %c0_4 = arith.constant 0 : index
    %c0_5 = arith.constant 0 : index
    %5 = vector.load %arg4[%c0_4, %c0_5] : memref<128x128xbf16, #tpu.memory_space<vmem>>, vector<128x128xbf16>
    %cst = arith.constant dense<0.000000e+00> : vector<512x128xf32>
    %6 = tpu.matmul %4, %5, %cst {dimension_numbers = #tpu.dot_dimension_numbers<[1], [0], [0], [1], [0, 0, 1, 1], [], []>} : vector<512x128xbf16>, vector<128x128xbf16>, vector<512x128xf32> -> vector<512x128xf32>
    %7 = arith.addf %3, %6 : vector<512x128xf32>
    %c0_6 = arith.constant 0 : index
    %c0_7 = arith.constant 0 : index
    %8 = vector.load %arg8[%c0_6, %c0_7] : memref<512x128xf32, #tpu.memory_space<vmem>>, vector<512x128xf32>
    tpu.vector_store %arg8[%c0_6, %c0_7], %7 {strides = array<i32>} : memref<512x128xf32, #tpu.memory_space<vmem>>, vector<512x128xf32>,
    %c0_i32_8 = arith.constant 0 : i32
    %9 = arith.cmpi eq, %arg2, %c0_i32_8 : i32
    %10 = arith.extui %9 : i1 to i32
    %c0_i32_9 = arith.constant 0 : i32
    %11 = arith.cmpi ne, %10, %c0_i32_9 : i32
    scf.if %11 {
      %c0_10 = arith.constant 0 : index
      %c0_11 = arith.constant 0 : index
      %12 = vector.load %arg8[%c0_10, %c0_11] : memref<512x128xf32, #tpu.memory_space<vmem>>, vector<512x128xf32>
      %c0_12 = arith.constant 0 : index
      %c0_13 = arith.constant 0 : index
      %13 = vector.load %arg5[%c0_12, %c0_13] : memref<1x128xf32, #tpu.memory_space<vmem>>, vector<1x128xf32>
      %14 = vector.broadcast %13 : vector<1x128xf32> to vector<512x128xf32>
      %15 = arith.mulf %12, %14 : vector<512x128xf32>
      %c0_14 = arith.constant 0 : index
      %c0_15 = arith.constant 0 : index
      %16 = vector.load %arg6[%c0_14, %c0_15] : memref<1x128xf32, #tpu.memory_space<vmem>>, vector<1x128xf32>
      %17 = vector.broadcast %16 : vector<1x128xf32> to vector<512x128xf32>
      %18 = arith.addf %15, %17 : vector<512x128xf32>
      %cst_16 = arith.constant 0.000000e+00 : f32
      %19 = vector.broadcast %cst_16 : f32 to vector<512x128xf32>
      %20 = arith.maximumf %18, %19 : vector<512x128xf32>
      %c0_17 = arith.constant 0 : index
      %c0_18 = arith.constant 0 : index
      %21 = vector.load %arg7[%c0_17, %c0_18] : memref<512x128xf32, #tpu.memory_space<vmem>>, vector<512x128xf32>
      tpu.vector_store %arg7[%c0_17, %c0_18], %20 {strides = array<i32>} : memref<512x128xf32, #tpu.memory_space<vmem>>, vector<512x128xf32>,
    } else {
    }
    return
  }
  func.func @transform_0(%arg0: i32, %arg1: i32, %arg2: i32) -> (i32, i32) {
    %c0_i32 = arith.constant 0 : i32
    return %arg0, %arg2 : i32, i32
  }
  func.func @transform_1(%arg0: i32, %arg1: i32, %arg2: i32) -> (i32, i32) {
    %c0_i32 = arith.constant 0 : i32
    return %arg2, %arg1 : i32, i32
  }
  func.func @transform_2(%arg0: i32, %arg1: i32, %arg2: i32) -> (i32, i32) {
    %c0_i32 = arith.constant 0 : i32
    %c0_i32_0 = arith.constant 0 : i32
    return %c0_i32, %arg1 : i32, i32
  }
  func.func @transform_3(%arg0: i32, %arg1: i32, %arg2: i32) -> (i32, i32) {
    %c0_i32 = arith.constant 0 : i32
    %c0_i32_0 = arith.constant 0 : i32
    return %c0_i32, %arg1 : i32, i32
  }
  func.func @transform_4(%arg0: i32, %arg1: i32, %arg2: i32) -> (i32, i32) {
    %c0_i32 = arith.constant 0 : i32
    return %arg0, %arg1 : i32, i32
  }
}

module attributes {stable_mosaic.version = 11 : i64} {
  func.func @_mm_bn_kernel(%arg0: i32, %arg1: i32, %arg2: i32, %arg3: memref<128x128xbf16, #tpu.memory_space<vmem>>, %arg4: memref<128x128xbf16, #tpu.memory_space<vmem>>, %arg5: memref<1x128xf32, #tpu.memory_space<vmem>>, %arg6: memref<1x128xf32, #tpu.memory_space<vmem>>, %arg7: memref<128x128xf32, #tpu.memory_space<vmem>>, %arg8: memref<128x128xf32, #tpu.memory_space<vmem>>) attributes {dimension_semantics = [#tpu.dimension_semantics<parallel>, #tpu.dimension_semantics<parallel>, #tpu.dimension_semantics<arbitrary>], iteration_bounds = array<i64: 1, 1, 1>, scalar_prefetch = 0 : i64, scratch_operands = 1 : i64, tpu.core_type = #tpu.core_type<tc>, window_params = [{transform_indices = @transform_0, window_bounds = array<i64: 128, 128>}, {transform_indices = @transform_1, window_bounds = array<i64: 128, 128>}, {transform_indices = @transform_2, window_bounds = array<i64: 1, 128>}, {transform_indices = @transform_3, window_bounds = array<i64: 1, 128>}, {transform_indices = @transform_4, window_bounds = array<i64: 128, 128>}]} {
    %c0_i32 = arith.constant 0 : i32
    %0 = arith.cmpi eq, %arg2, %c0_i32 : i32
    %1 = arith.extui %0 : i1 to i32
    %c0_i32_0 = arith.constant 0 : i32
    %2 = arith.cmpi ne, %1, %c0_i32_0 : i32
    scf.if %2 {
      %cst_10 = arith.constant 0.000000e+00 : f32
      %12 = vector.broadcast %cst_10 : f32 to vector<128x128xf32>
      %c0_11 = arith.constant 0 : index
      %c0_12 = arith.constant 0 : index
      %13 = vector.load %arg8[%c0_11, %c0_12] : memref<128x128xf32, #tpu.memory_space<vmem>>, vector<128x128xf32>
      tpu.vector_store %arg8[%c0_11, %c0_12], %12 {strides = array<i32>} : memref<128x128xf32, #tpu.memory_space<vmem>>, vector<128x128xf32>,
    } else {
    }
    %c0 = arith.constant 0 : index
    %c0_1 = arith.constant 0 : index
    %3 = vector.load %arg8[%c0, %c0_1] : memref<128x128xf32, #tpu.memory_space<vmem>>, vector<128x128xf32>
    %c0_2 = arith.constant 0 : index
    %c0_3 = arith.constant 0 : index
    %4 = vector.load %arg3[%c0_2, %c0_3] : memref<128x128xbf16, #tpu.memory_space<vmem>>, vector<128x128xbf16>
    %c0_4 = arith.constant 0 : index
    %c0_5 = arith.constant 0 : index
    %5 = vector.load %arg4[%c0_4, %c0_5] : memref<128x128xbf16, #tpu.memory_space<vmem>>, vector<128x128xbf16>
    %cst = arith.constant dense<0.000000e+00> : vector<128x128xf32>
    %6 = tpu.matmul %4, %5, %cst {dimension_numbers = #tpu.dot_dimension_numbers<[1], [0], [0], [1], [0, 0, 1, 1], [], []>} : vector<128x128xbf16>, vector<128x128xbf16>, vector<128x128xf32> -> vector<128x128xf32>
    %7 = arith.addf %3, %6 : vector<128x128xf32>
    %c0_6 = arith.constant 0 : index
    %c0_7 = arith.constant 0 : index
    %8 = vector.load %arg8[%c0_6, %c0_7] : memref<128x128xf32, #tpu.memory_space<vmem>>, vector<128x128xf32>
    tpu.vector_store %arg8[%c0_6, %c0_7], %7 {strides = array<i32>} : memref<128x128xf32, #tpu.memory_space<vmem>>, vector<128x128xf32>,
    %c0_i32_8 = arith.constant 0 : i32
    %9 = arith.cmpi eq, %arg2, %c0_i32_8 : i32
    %10 = arith.extui %9 : i1 to i32
    %c0_i32_9 = arith.constant 0 : i32
    %11 = arith.cmpi ne, %10, %c0_i32_9 : i32
    scf.if %11 {
      %c0_10 = arith.constant 0 : index
      %c0_11 = arith.constant 0 : index
      %12 = vector.load %arg8[%c0_10, %c0_11] : memref<128x128xf32, #tpu.memory_space<vmem>>, vector<128x128xf32>
      %c0_12 = arith.constant 0 : index
      %c0_13 = arith.constant 0 : index
      %13 = vector.load %arg5[%c0_12, %c0_13] : memref<1x128xf32, #tpu.memory_space<vmem>>, vector<1x128xf32>
      %14 = vector.broadcast %13 : vector<1x128xf32> to vector<128x128xf32>
      %15 = arith.mulf %12, %14 : vector<128x128xf32>
      %c0_14 = arith.constant 0 : index
      %c0_15 = arith.constant 0 : index
      %16 = vector.load %arg6[%c0_14, %c0_15] : memref<1x128xf32, #tpu.memory_space<vmem>>, vector<1x128xf32>
      %17 = vector.broadcast %16 : vector<1x128xf32> to vector<128x128xf32>
      %18 = arith.addf %15, %17 : vector<128x128xf32>
      %c0_16 = arith.constant 0 : index
      %c0_17 = arith.constant 0 : index
      %19 = vector.load %arg7[%c0_16, %c0_17] : memref<128x128xf32, #tpu.memory_space<vmem>>, vector<128x128xf32>
      tpu.vector_store %arg7[%c0_16, %c0_17], %18 {strides = array<i32>} : memref<128x128xf32, #tpu.memory_space<vmem>>, vector<128x128xf32>,
    } else {
    }
    return
  }
  func.func @transform_0(%arg0: i32, %arg1: i32, %arg2: i32) -> (i32, i32) {
    %c0_i32 = arith.constant 0 : i32
    return %arg0, %arg2 : i32, i32
  }
  func.func @transform_1(%arg0: i32, %arg1: i32, %arg2: i32) -> (i32, i32) {
    %c0_i32 = arith.constant 0 : i32
    return %arg2, %arg1 : i32, i32
  }
  func.func @transform_2(%arg0: i32, %arg1: i32, %arg2: i32) -> (i32, i32) {
    %c0_i32 = arith.constant 0 : i32
    %c0_i32_0 = arith.constant 0 : i32
    return %c0_i32, %arg1 : i32, i32
  }
  func.func @transform_3(%arg0: i32, %arg1: i32, %arg2: i32) -> (i32, i32) {
    %c0_i32 = arith.constant 0 : i32
    %c0_i32_0 = arith.constant 0 : i32
    return %c0_i32, %arg1 : i32, i32
  }
  func.func @transform_4(%arg0: i32, %arg1: i32, %arg2: i32) -> (i32, i32) {
    %c0_i32 = arith.constant 0 : i32
    return %arg0, %arg1 : i32, i32
  }
}

module attributes {stable_mosaic.version = 11 : i64} {
  func.func @_mm_bn_kernel(%arg0: i32, %arg1: i32, %arg2: i32, %arg3: memref<128x128xbf16, #tpu.memory_space<vmem>>, %arg4: memref<128x128xbf16, #tpu.memory_space<vmem>>, %arg5: memref<1x128xf32, #tpu.memory_space<vmem>>, %arg6: memref<1x128xf32, #tpu.memory_space<vmem>>, %arg7: memref<128x128xf32, #tpu.memory_space<vmem>>, %arg8: memref<128x128xf32, #tpu.memory_space<vmem>>) attributes {dimension_semantics = [#tpu.dimension_semantics<parallel>, #tpu.dimension_semantics<parallel>, #tpu.dimension_semantics<arbitrary>], iteration_bounds = array<i64: 1, 1, 1>, scalar_prefetch = 0 : i64, scratch_operands = 1 : i64, tpu.core_type = #tpu.core_type<tc>, window_params = [{transform_indices = @transform_0, window_bounds = array<i64: 128, 128>}, {transform_indices = @transform_1, window_bounds = array<i64: 128, 128>}, {transform_indices = @transform_2, window_bounds = array<i64: 1, 128>}, {transform_indices = @transform_3, window_bounds = array<i64: 1, 128>}, {transform_indices = @transform_4, window_bounds = array<i64: 128, 128>}]} {
    %c0_i32 = arith.constant 0 : i32
    %0 = arith.cmpi eq, %arg2, %c0_i32 : i32
    %1 = arith.extui %0 : i1 to i32
    %c0_i32_0 = arith.constant 0 : i32
    %2 = arith.cmpi ne, %1, %c0_i32_0 : i32
    scf.if %2 {
      %cst_10 = arith.constant 0.000000e+00 : f32
      %12 = vector.broadcast %cst_10 : f32 to vector<128x128xf32>
      %c0_11 = arith.constant 0 : index
      %c0_12 = arith.constant 0 : index
      %13 = vector.load %arg8[%c0_11, %c0_12] : memref<128x128xf32, #tpu.memory_space<vmem>>, vector<128x128xf32>
      tpu.vector_store %arg8[%c0_11, %c0_12], %12 {strides = array<i32>} : memref<128x128xf32, #tpu.memory_space<vmem>>, vector<128x128xf32>,
    } else {
    }
    %c0 = arith.constant 0 : index
    %c0_1 = arith.constant 0 : index
    %3 = vector.load %arg8[%c0, %c0_1] : memref<128x128xf32, #tpu.memory_space<vmem>>, vector<128x128xf32>
    %c0_2 = arith.constant 0 : index
    %c0_3 = arith.constant 0 : index
    %4 = vector.load %arg3[%c0_2, %c0_3] : memref<128x128xbf16, #tpu.memory_space<vmem>>, vector<128x128xbf16>
    %c0_4 = arith.constant 0 : index
    %c0_5 = arith.constant 0 : index
    %5 = vector.load %arg4[%c0_4, %c0_5] : memref<128x128xbf16, #tpu.memory_space<vmem>>, vector<128x128xbf16>
    %cst = arith.constant dense<0.000000e+00> : vector<128x128xf32>
    %6 = tpu.matmul %4, %5, %cst {dimension_numbers = #tpu.dot_dimension_numbers<[1], [0], [0], [1], [0, 0, 1, 1], [], []>} : vector<128x128xbf16>, vector<128x128xbf16>, vector<128x128xf32> -> vector<128x128xf32>
    %7 = arith.addf %3, %6 : vector<128x128xf32>
    %c0_6 = arith.constant 0 : index
    %c0_7 = arith.constant 0 : index
    %8 = vector.load %arg8[%c0_6, %c0_7] : memref<128x128xf32, #tpu.memory_space<vmem>>, vector<128x128xf32>
    tpu.vector_store %arg8[%c0_6, %c0_7], %7 {strides = array<i32>} : memref<128x128xf32, #tpu.memory_space<vmem>>, vector<128x128xf32>,
    %c0_i32_8 = arith.constant 0 : i32
    %9 = arith.cmpi eq, %arg2, %c0_i32_8 : i32
    %10 = arith.extui %9 : i1 to i32
    %c0_i32_9 = arith.constant 0 : i32
    %11 = arith.cmpi ne, %10, %c0_i32_9 : i32
    scf.if %11 {
      %c0_10 = arith.constant 0 : index
      %c0_11 = arith.constant 0 : index
      %12 = vector.load %arg8[%c0_10, %c0_11] : memref<128x128xf32, #tpu.memory_space<vmem>>, vector<128x128xf32>
      %c0_12 = arith.constant 0 : index
      %c0_13 = arith.constant 0 : index
      %13 = vector.load %arg5[%c0_12, %c0_13] : memref<1x128xf32, #tpu.memory_space<vmem>>, vector<1x128xf32>
      %14 = vector.broadcast %13 : vector<1x128xf32> to vector<128x128xf32>
      %15 = arith.mulf %12, %14 : vector<128x128xf32>
      %c0_14 = arith.constant 0 : index
      %c0_15 = arith.constant 0 : index
      %16 = vector.load %arg6[%c0_14, %c0_15] : memref<1x128xf32, #tpu.memory_space<vmem>>, vector<1x128xf32>
      %17 = vector.broadcast %16 : vector<1x128xf32> to vector<128x128xf32>
      %18 = arith.addf %15, %17 : vector<128x128xf32>
      %cst_16 = arith.constant 0.000000e+00 : f32
      %19 = vector.broadcast %cst_16 : f32 to vector<128x128xf32>
      %20 = arith.maximumf %18, %19 : vector<128x128xf32>
      %c0_17 = arith.constant 0 : index
      %c0_18 = arith.constant 0 : index
      %21 = vector.load %arg7[%c0_17, %c0_18] : memref<128x128xf32, #tpu.memory_space<vmem>>, vector<128x128xf32>
      tpu.vector_store %arg7[%c0_17, %c0_18], %20 {strides = array<i32>} : memref<128x128xf32, #tpu.memory_space<vmem>>, vector<128x128xf32>,
    } else {
    }
    return
  }
  func.func @transform_0(%arg0: i32, %arg1: i32, %arg2: i32) -> (i32, i32) {
    %c0_i32 = arith.constant 0 : i32
    return %arg0, %arg2 : i32, i32
  }
  func.func @transform_1(%arg0: i32, %arg1: i32, %arg2: i32) -> (i32, i32) {
    %c0_i32 = arith.constant 0 : i32
    return %arg2, %arg1 : i32, i32
  }
  func.func @transform_2(%arg0: i32, %arg1: i32, %arg2: i32) -> (i32, i32) {
    %c0_i32 = arith.constant 0 : i32
    %c0_i32_0 = arith.constant 0 : i32
    return %c0_i32, %arg1 : i32, i32
  }
  func.func @transform_3(%arg0: i32, %arg1: i32, %arg2: i32) -> (i32, i32) {
    %c0_i32 = arith.constant 0 : i32
    %c0_i32_0 = arith.constant 0 : i32
    return %c0_i32, %arg1 : i32, i32
  }
  func.func @transform_4(%arg0: i32, %arg1: i32, %arg2: i32) -> (i32, i32) {
    %c0_i32 = arith.constant 0 : i32
    return %arg0, %arg1 : i32, i32
  }
}

module attributes {stable_mosaic.version = 11 : i64} {
  func.func @_mm_bn_res_relu_kernel(%arg0: i32, %arg1: i32, %arg2: i32, %arg3: memref<128x128xbf16, #tpu.memory_space<vmem>>, %arg4: memref<128x128xbf16, #tpu.memory_space<vmem>>, %arg5: memref<1x128xf32, #tpu.memory_space<vmem>>, %arg6: memref<1x128xf32, #tpu.memory_space<vmem>>, %arg7: memref<128x128xf32, #tpu.memory_space<vmem>>, %arg8: memref<128x128xf32, #tpu.memory_space<vmem>>, %arg9: memref<128x128xf32, #tpu.memory_space<vmem>>) attributes {dimension_semantics = [#tpu.dimension_semantics<parallel>, #tpu.dimension_semantics<parallel>, #tpu.dimension_semantics<arbitrary>], iteration_bounds = array<i64: 1, 1, 1>, scalar_prefetch = 0 : i64, scratch_operands = 1 : i64, tpu.core_type = #tpu.core_type<tc>, window_params = [{transform_indices = @transform_0, window_bounds = array<i64: 128, 128>}, {transform_indices = @transform_1, window_bounds = array<i64: 128, 128>}, {transform_indices = @transform_2, window_bounds = array<i64: 1, 128>}, {transform_indices = @transform_3, window_bounds = array<i64: 1, 128>}, {transform_indices = @transform_4, window_bounds = array<i64: 128, 128>}, {transform_indices = @transform_5, window_bounds = array<i64: 128, 128>}]} {
    %c0_i32 = arith.constant 0 : i32
    %0 = arith.cmpi eq, %arg2, %c0_i32 : i32
    %1 = arith.extui %0 : i1 to i32
    %c0_i32_0 = arith.constant 0 : i32
    %2 = arith.cmpi ne, %1, %c0_i32_0 : i32
    scf.if %2 {
      %cst_10 = arith.constant 0.000000e+00 : f32
      %12 = vector.broadcast %cst_10 : f32 to vector<128x128xf32>
      %c0_11 = arith.constant 0 : index
      %c0_12 = arith.constant 0 : index
      %13 = vector.load %arg9[%c0_11, %c0_12] : memref<128x128xf32, #tpu.memory_space<vmem>>, vector<128x128xf32>
      tpu.vector_store %arg9[%c0_11, %c0_12], %12 {strides = array<i32>} : memref<128x128xf32, #tpu.memory_space<vmem>>, vector<128x128xf32>,
    } else {
    }
    %c0 = arith.constant 0 : index
    %c0_1 = arith.constant 0 : index
    %3 = vector.load %arg9[%c0, %c0_1] : memref<128x128xf32, #tpu.memory_space<vmem>>, vector<128x128xf32>
    %c0_2 = arith.constant 0 : index
    %c0_3 = arith.constant 0 : index
    %4 = vector.load %arg3[%c0_2, %c0_3] : memref<128x128xbf16, #tpu.memory_space<vmem>>, vector<128x128xbf16>
    %c0_4 = arith.constant 0 : index
    %c0_5 = arith.constant 0 : index
    %5 = vector.load %arg4[%c0_4, %c0_5] : memref<128x128xbf16, #tpu.memory_space<vmem>>, vector<128x128xbf16>
    %cst = arith.constant dense<0.000000e+00> : vector<128x128xf32>
    %6 = tpu.matmul %4, %5, %cst {dimension_numbers = #tpu.dot_dimension_numbers<[1], [0], [0], [1], [0, 0, 1, 1], [], []>} : vector<128x128xbf16>, vector<128x128xbf16>, vector<128x128xf32> -> vector<128x128xf32>
    %7 = arith.addf %3, %6 : vector<128x128xf32>
    %c0_6 = arith.constant 0 : index
    %c0_7 = arith.constant 0 : index
    %8 = vector.load %arg9[%c0_6, %c0_7] : memref<128x128xf32, #tpu.memory_space<vmem>>, vector<128x128xf32>
    tpu.vector_store %arg9[%c0_6, %c0_7], %7 {strides = array<i32>} : memref<128x128xf32, #tpu.memory_space<vmem>>, vector<128x128xf32>,
    %c0_i32_8 = arith.constant 0 : i32
    %9 = arith.cmpi eq, %arg2, %c0_i32_8 : i32
    %10 = arith.extui %9 : i1 to i32
    %c0_i32_9 = arith.constant 0 : i32
    %11 = arith.cmpi ne, %10, %c0_i32_9 : i32
    scf.if %11 {
      %c0_10 = arith.constant 0 : index
      %c0_11 = arith.constant 0 : index
      %12 = vector.load %arg9[%c0_10, %c0_11] : memref<128x128xf32, #tpu.memory_space<vmem>>, vector<128x128xf32>
      %c0_12 = arith.constant 0 : index
      %c0_13 = arith.constant 0 : index
      %13 = vector.load %arg5[%c0_12, %c0_13] : memref<1x128xf32, #tpu.memory_space<vmem>>, vector<1x128xf32>
      %14 = vector.broadcast %13 : vector<1x128xf32> to vector<128x128xf32>
      %15 = arith.mulf %12, %14 : vector<128x128xf32>
      %c0_14 = arith.constant 0 : index
      %c0_15 = arith.constant 0 : index
      %16 = vector.load %arg6[%c0_14, %c0_15] : memref<1x128xf32, #tpu.memory_space<vmem>>, vector<1x128xf32>
      %17 = vector.broadcast %16 : vector<1x128xf32> to vector<128x128xf32>
      %18 = arith.addf %15, %17 : vector<128x128xf32>
      %c0_16 = arith.constant 0 : index
      %c0_17 = arith.constant 0 : index
      %19 = vector.load %arg7[%c0_16, %c0_17] : memref<128x128xf32, #tpu.memory_space<vmem>>, vector<128x128xf32>
      %20 = arith.addf %18, %19 : vector<128x128xf32>
      %cst_18 = arith.constant 0.000000e+00 : f32
      %21 = vector.broadcast %cst_18 : f32 to vector<128x128xf32>
      %22 = arith.maximumf %20, %21 : vector<128x128xf32>
      %c0_19 = arith.constant 0 : index
      %c0_20 = arith.constant 0 : index
      %23 = vector.load %arg8[%c0_19, %c0_20] : memref<128x128xf32, #tpu.memory_space<vmem>>, vector<128x128xf32>
      tpu.vector_store %arg8[%c0_19, %c0_20], %22 {strides = array<i32>} : memref<128x128xf32, #tpu.memory_space<vmem>>, vector<128x128xf32>,
    } else {
    }
    return
  }
  func.func @transform_0(%arg0: i32, %arg1: i32, %arg2: i32) -> (i32, i32) {
    %c0_i32 = arith.constant 0 : i32
    return %arg0, %arg2 : i32, i32
  }
  func.func @transform_1(%arg0: i32, %arg1: i32, %arg2: i32) -> (i32, i32) {
    %c0_i32 = arith.constant 0 : i32
    return %arg2, %arg1 : i32, i32
  }
  func.func @transform_2(%arg0: i32, %arg1: i32, %arg2: i32) -> (i32, i32) {
    %c0_i32 = arith.constant 0 : i32
    %c0_i32_0 = arith.constant 0 : i32
    return %c0_i32, %arg1 : i32, i32
  }
  func.func @transform_3(%arg0: i32, %arg1: i32, %arg2: i32) -> (i32, i32) {
    %c0_i32 = arith.constant 0 : i32
    %c0_i32_0 = arith.constant 0 : i32
    return %c0_i32, %arg1 : i32, i32
  }
  func.func @transform_4(%arg0: i32, %arg1: i32, %arg2: i32) -> (i32, i32) {
    %c0_i32 = arith.constant 0 : i32
    return %arg0, %arg1 : i32, i32
  }
  func.func @transform_5(%arg0: i32, %arg1: i32, %arg2: i32) -> (i32, i32) {
    %c0_i32 = arith.constant 0 : i32
    return %arg0, %arg1 : i32, i32
  }
}

module attributes {stable_mosaic.version = 11 : i64} {
  func.func @_mm_bn_kernel(%arg0: i32, %arg1: i32, %arg2: i32, %arg3: memref<32x128xbf16, #tpu.memory_space<vmem>>, %arg4: memref<128x128xbf16, #tpu.memory_space<vmem>>, %arg5: memref<1x128xf32, #tpu.memory_space<vmem>>, %arg6: memref<1x128xf32, #tpu.memory_space<vmem>>, %arg7: memref<32x128xf32, #tpu.memory_space<vmem>>, %arg8: memref<32x128xf32, #tpu.memory_space<vmem>>) attributes {dimension_semantics = [#tpu.dimension_semantics<parallel>, #tpu.dimension_semantics<parallel>, #tpu.dimension_semantics<arbitrary>], iteration_bounds = array<i64: 1, 1, 1>, scalar_prefetch = 0 : i64, scratch_operands = 1 : i64, tpu.core_type = #tpu.core_type<tc>, window_params = [{transform_indices = @transform_0, window_bounds = array<i64: 32, 128>}, {transform_indices = @transform_1, window_bounds = array<i64: 128, 128>}, {transform_indices = @transform_2, window_bounds = array<i64: 1, 128>}, {transform_indices = @transform_3, window_bounds = array<i64: 1, 128>}, {transform_indices = @transform_4, window_bounds = array<i64: 32, 128>}]} {
    %c0_i32 = arith.constant 0 : i32
    %0 = arith.cmpi eq, %arg2, %c0_i32 : i32
    %1 = arith.extui %0 : i1 to i32
    %c0_i32_0 = arith.constant 0 : i32
    %2 = arith.cmpi ne, %1, %c0_i32_0 : i32
    scf.if %2 {
      %cst_10 = arith.constant 0.000000e+00 : f32
      %12 = vector.broadcast %cst_10 : f32 to vector<32x128xf32>
      %c0_11 = arith.constant 0 : index
      %c0_12 = arith.constant 0 : index
      %13 = vector.load %arg8[%c0_11, %c0_12] : memref<32x128xf32, #tpu.memory_space<vmem>>, vector<32x128xf32>
      tpu.vector_store %arg8[%c0_11, %c0_12], %12 {strides = array<i32>} : memref<32x128xf32, #tpu.memory_space<vmem>>, vector<32x128xf32>,
    } else {
    }
    %c0 = arith.constant 0 : index
    %c0_1 = arith.constant 0 : index
    %3 = vector.load %arg8[%c0, %c0_1] : memref<32x128xf32, #tpu.memory_space<vmem>>, vector<32x128xf32>
    %c0_2 = arith.constant 0 : index
    %c0_3 = arith.constant 0 : index
    %4 = vector.load %arg3[%c0_2, %c0_3] : memref<32x128xbf16, #tpu.memory_space<vmem>>, vector<32x128xbf16>
    %c0_4 = arith.constant 0 : index
    %c0_5 = arith.constant 0 : index
    %5 = vector.load %arg4[%c0_4, %c0_5] : memref<128x128xbf16, #tpu.memory_space<vmem>>, vector<128x128xbf16>
    %cst = arith.constant dense<0.000000e+00> : vector<32x128xf32>
    %6 = tpu.matmul %4, %5, %cst {dimension_numbers = #tpu.dot_dimension_numbers<[1], [0], [0], [1], [0, 0, 1, 1], [], []>} : vector<32x128xbf16>, vector<128x128xbf16>, vector<32x128xf32> -> vector<32x128xf32>
    %7 = arith.addf %3, %6 : vector<32x128xf32>
    %c0_6 = arith.constant 0 : index
    %c0_7 = arith.constant 0 : index
    %8 = vector.load %arg8[%c0_6, %c0_7] : memref<32x128xf32, #tpu.memory_space<vmem>>, vector<32x128xf32>
    tpu.vector_store %arg8[%c0_6, %c0_7], %7 {strides = array<i32>} : memref<32x128xf32, #tpu.memory_space<vmem>>, vector<32x128xf32>,
    %c0_i32_8 = arith.constant 0 : i32
    %9 = arith.cmpi eq, %arg2, %c0_i32_8 : i32
    %10 = arith.extui %9 : i1 to i32
    %c0_i32_9 = arith.constant 0 : i32
    %11 = arith.cmpi ne, %10, %c0_i32_9 : i32
    scf.if %11 {
      %c0_10 = arith.constant 0 : index
      %c0_11 = arith.constant 0 : index
      %12 = vector.load %arg8[%c0_10, %c0_11] : memref<32x128xf32, #tpu.memory_space<vmem>>, vector<32x128xf32>
      %c0_12 = arith.constant 0 : index
      %c0_13 = arith.constant 0 : index
      %13 = vector.load %arg5[%c0_12, %c0_13] : memref<1x128xf32, #tpu.memory_space<vmem>>, vector<1x128xf32>
      %14 = vector.broadcast %13 : vector<1x128xf32> to vector<32x128xf32>
      %15 = arith.mulf %12, %14 : vector<32x128xf32>
      %c0_14 = arith.constant 0 : index
      %c0_15 = arith.constant 0 : index
      %16 = vector.load %arg6[%c0_14, %c0_15] : memref<1x128xf32, #tpu.memory_space<vmem>>, vector<1x128xf32>
      %17 = vector.broadcast %16 : vector<1x128xf32> to vector<32x128xf32>
      %18 = arith.addf %15, %17 : vector<32x128xf32>
      %c0_16 = arith.constant 0 : index
      %c0_17 = arith.constant 0 : index
      %19 = vector.load %arg7[%c0_16, %c0_17] : memref<32x128xf32, #tpu.memory_space<vmem>>, vector<32x128xf32>
      tpu.vector_store %arg7[%c0_16, %c0_17], %18 {strides = array<i32>} : memref<32x128xf32, #tpu.memory_space<vmem>>, vector<32x128xf32>,
    } else {
    }
    return
  }
  func.func @transform_0(%arg0: i32, %arg1: i32, %arg2: i32) -> (i32, i32) {
    %c0_i32 = arith.constant 0 : i32
    return %arg0, %arg2 : i32, i32
  }
  func.func @transform_1(%arg0: i32, %arg1: i32, %arg2: i32) -> (i32, i32) {
    %c0_i32 = arith.constant 0 : i32
    return %arg2, %arg1 : i32, i32
  }
  func.func @transform_2(%arg0: i32, %arg1: i32, %arg2: i32) -> (i32, i32) {
    %c0_i32 = arith.constant 0 : i32
    %c0_i32_0 = arith.constant 0 : i32
    return %c0_i32, %arg1 : i32, i32
  }
  func.func @transform_3(%arg0: i32, %arg1: i32, %arg2: i32) -> (i32, i32) {
    %c0_i32 = arith.constant 0 : i32
    %c0_i32_0 = arith.constant 0 : i32
    return %c0_i32, %arg1 : i32, i32
  }
  func.func @transform_4(%arg0: i32, %arg1: i32, %arg2: i32) -> (i32, i32) {
    %c0_i32 = arith.constant 0 : i32
    return %arg0, %arg1 : i32, i32
  }
}

module attributes {stable_mosaic.version = 11 : i64} {
  func.func @_mm_bn_kernel(%arg0: i32, %arg1: i32, %arg2: i32, %arg3: memref<128x256xbf16, #tpu.memory_space<vmem>>, %arg4: memref<256x128xbf16, #tpu.memory_space<vmem>>, %arg5: memref<1x128xf32, #tpu.memory_space<vmem>>, %arg6: memref<1x128xf32, #tpu.memory_space<vmem>>, %arg7: memref<128x128xf32, #tpu.memory_space<vmem>>, %arg8: memref<128x128xf32, #tpu.memory_space<vmem>>) attributes {dimension_semantics = [#tpu.dimension_semantics<parallel>, #tpu.dimension_semantics<parallel>, #tpu.dimension_semantics<arbitrary>], iteration_bounds = array<i64: 1, 1, 1>, scalar_prefetch = 0 : i64, scratch_operands = 1 : i64, tpu.core_type = #tpu.core_type<tc>, window_params = [{transform_indices = @transform_0, window_bounds = array<i64: 128, 256>}, {transform_indices = @transform_1, window_bounds = array<i64: 256, 128>}, {transform_indices = @transform_2, window_bounds = array<i64: 1, 128>}, {transform_indices = @transform_3, window_bounds = array<i64: 1, 128>}, {transform_indices = @transform_4, window_bounds = array<i64: 128, 128>}]} {
    %c0_i32 = arith.constant 0 : i32
    %0 = arith.cmpi eq, %arg2, %c0_i32 : i32
    %1 = arith.extui %0 : i1 to i32
    %c0_i32_0 = arith.constant 0 : i32
    %2 = arith.cmpi ne, %1, %c0_i32_0 : i32
    scf.if %2 {
      %cst_10 = arith.constant 0.000000e+00 : f32
      %12 = vector.broadcast %cst_10 : f32 to vector<128x128xf32>
      %c0_11 = arith.constant 0 : index
      %c0_12 = arith.constant 0 : index
      %13 = vector.load %arg8[%c0_11, %c0_12] : memref<128x128xf32, #tpu.memory_space<vmem>>, vector<128x128xf32>
      tpu.vector_store %arg8[%c0_11, %c0_12], %12 {strides = array<i32>} : memref<128x128xf32, #tpu.memory_space<vmem>>, vector<128x128xf32>,
    } else {
    }
    %c0 = arith.constant 0 : index
    %c0_1 = arith.constant 0 : index
    %3 = vector.load %arg8[%c0, %c0_1] : memref<128x128xf32, #tpu.memory_space<vmem>>, vector<128x128xf32>
    %c0_2 = arith.constant 0 : index
    %c0_3 = arith.constant 0 : index
    %4 = vector.load %arg3[%c0_2, %c0_3] : memref<128x256xbf16, #tpu.memory_space<vmem>>, vector<128x256xbf16>
    %c0_4 = arith.constant 0 : index
    %c0_5 = arith.constant 0 : index
    %5 = vector.load %arg4[%c0_4, %c0_5] : memref<256x128xbf16, #tpu.memory_space<vmem>>, vector<256x128xbf16>
    %cst = arith.constant dense<0.000000e+00> : vector<128x128xf32>
    %6 = tpu.matmul %4, %5, %cst {dimension_numbers = #tpu.dot_dimension_numbers<[1], [0], [0], [1], [0, 0, 1, 1], [], []>} : vector<128x256xbf16>, vector<256x128xbf16>, vector<128x128xf32> -> vector<128x128xf32>
    %7 = arith.addf %3, %6 : vector<128x128xf32>
    %c0_6 = arith.constant 0 : index
    %c0_7 = arith.constant 0 : index
    %8 = vector.load %arg8[%c0_6, %c0_7] : memref<128x128xf32, #tpu.memory_space<vmem>>, vector<128x128xf32>
    tpu.vector_store %arg8[%c0_6, %c0_7], %7 {strides = array<i32>} : memref<128x128xf32, #tpu.memory_space<vmem>>, vector<128x128xf32>,
    %c0_i32_8 = arith.constant 0 : i32
    %9 = arith.cmpi eq, %arg2, %c0_i32_8 : i32
    %10 = arith.extui %9 : i1 to i32
    %c0_i32_9 = arith.constant 0 : i32
    %11 = arith.cmpi ne, %10, %c0_i32_9 : i32
    scf.if %11 {
      %c0_10 = arith.constant 0 : index
      %c0_11 = arith.constant 0 : index
      %12 = vector.load %arg8[%c0_10, %c0_11] : memref<128x128xf32, #tpu.memory_space<vmem>>, vector<128x128xf32>
      %c0_12 = arith.constant 0 : index
      %c0_13 = arith.constant 0 : index
      %13 = vector.load %arg5[%c0_12, %c0_13] : memref<1x128xf32, #tpu.memory_space<vmem>>, vector<1x128xf32>
      %14 = vector.broadcast %13 : vector<1x128xf32> to vector<128x128xf32>
      %15 = arith.mulf %12, %14 : vector<128x128xf32>
      %c0_14 = arith.constant 0 : index
      %c0_15 = arith.constant 0 : index
      %16 = vector.load %arg6[%c0_14, %c0_15] : memref<1x128xf32, #tpu.memory_space<vmem>>, vector<1x128xf32>
      %17 = vector.broadcast %16 : vector<1x128xf32> to vector<128x128xf32>
      %18 = arith.addf %15, %17 : vector<128x128xf32>
      %cst_16 = arith.constant 0.000000e+00 : f32
      %19 = vector.broadcast %cst_16 : f32 to vector<128x128xf32>
      %20 = arith.maximumf %18, %19 : vector<128x128xf32>
      %c0_17 = arith.constant 0 : index
      %c0_18 = arith.constant 0 : index
      %21 = vector.load %arg7[%c0_17, %c0_18] : memref<128x128xf32, #tpu.memory_space<vmem>>, vector<128x128xf32>
      tpu.vector_store %arg7[%c0_17, %c0_18], %20 {strides = array<i32>} : memref<128x128xf32, #tpu.memory_space<vmem>>, vector<128x128xf32>,
    } else {
    }
    return
  }
  func.func @transform_0(%arg0: i32, %arg1: i32, %arg2: i32) -> (i32, i32) {
    %c0_i32 = arith.constant 0 : i32
    return %arg0, %arg2 : i32, i32
  }
  func.func @transform_1(%arg0: i32, %arg1: i32, %arg2: i32) -> (i32, i32) {
    %c0_i32 = arith.constant 0 : i32
    return %arg2, %arg1 : i32, i32
  }
  func.func @transform_2(%arg0: i32, %arg1: i32, %arg2: i32) -> (i32, i32) {
    %c0_i32 = arith.constant 0 : i32
    %c0_i32_0 = arith.constant 0 : i32
    return %c0_i32, %arg1 : i32, i32
  }
  func.func @transform_3(%arg0: i32, %arg1: i32, %arg2: i32) -> (i32, i32) {
    %c0_i32 = arith.constant 0 : i32
    %c0_i32_0 = arith.constant 0 : i32
    return %c0_i32, %arg1 : i32, i32
  }
  func.func @transform_4(%arg0: i32, %arg1: i32, %arg2: i32) -> (i32, i32) {
    %c0_i32 = arith.constant 0 : i32
    return %arg0, %arg1 : i32, i32
  }
}

module attributes {stable_mosaic.version = 11 : i64} {
  func.func @_mm_bn_kernel(%arg0: i32, %arg1: i32, %arg2: i32, %arg3: memref<32x128xbf16, #tpu.memory_space<vmem>>, %arg4: memref<128x128xbf16, #tpu.memory_space<vmem>>, %arg5: memref<1x128xf32, #tpu.memory_space<vmem>>, %arg6: memref<1x128xf32, #tpu.memory_space<vmem>>, %arg7: memref<32x128xf32, #tpu.memory_space<vmem>>, %arg8: memref<32x128xf32, #tpu.memory_space<vmem>>) attributes {dimension_semantics = [#tpu.dimension_semantics<parallel>, #tpu.dimension_semantics<parallel>, #tpu.dimension_semantics<arbitrary>], iteration_bounds = array<i64: 1, 1, 1>, scalar_prefetch = 0 : i64, scratch_operands = 1 : i64, tpu.core_type = #tpu.core_type<tc>, window_params = [{transform_indices = @transform_0, window_bounds = array<i64: 32, 128>}, {transform_indices = @transform_1, window_bounds = array<i64: 128, 128>}, {transform_indices = @transform_2, window_bounds = array<i64: 1, 128>}, {transform_indices = @transform_3, window_bounds = array<i64: 1, 128>}, {transform_indices = @transform_4, window_bounds = array<i64: 32, 128>}]} {
    %c0_i32 = arith.constant 0 : i32
    %0 = arith.cmpi eq, %arg2, %c0_i32 : i32
    %1 = arith.extui %0 : i1 to i32
    %c0_i32_0 = arith.constant 0 : i32
    %2 = arith.cmpi ne, %1, %c0_i32_0 : i32
    scf.if %2 {
      %cst_10 = arith.constant 0.000000e+00 : f32
      %12 = vector.broadcast %cst_10 : f32 to vector<32x128xf32>
      %c0_11 = arith.constant 0 : index
      %c0_12 = arith.constant 0 : index
      %13 = vector.load %arg8[%c0_11, %c0_12] : memref<32x128xf32, #tpu.memory_space<vmem>>, vector<32x128xf32>
      tpu.vector_store %arg8[%c0_11, %c0_12], %12 {strides = array<i32>} : memref<32x128xf32, #tpu.memory_space<vmem>>, vector<32x128xf32>,
    } else {
    }
    %c0 = arith.constant 0 : index
    %c0_1 = arith.constant 0 : index
    %3 = vector.load %arg8[%c0, %c0_1] : memref<32x128xf32, #tpu.memory_space<vmem>>, vector<32x128xf32>
    %c0_2 = arith.constant 0 : index
    %c0_3 = arith.constant 0 : index
    %4 = vector.load %arg3[%c0_2, %c0_3] : memref<32x128xbf16, #tpu.memory_space<vmem>>, vector<32x128xbf16>
    %c0_4 = arith.constant 0 : index
    %c0_5 = arith.constant 0 : index
    %5 = vector.load %arg4[%c0_4, %c0_5] : memref<128x128xbf16, #tpu.memory_space<vmem>>, vector<128x128xbf16>
    %cst = arith.constant dense<0.000000e+00> : vector<32x128xf32>
    %6 = tpu.matmul %4, %5, %cst {dimension_numbers = #tpu.dot_dimension_numbers<[1], [0], [0], [1], [0, 0, 1, 1], [], []>} : vector<32x128xbf16>, vector<128x128xbf16>, vector<32x128xf32> -> vector<32x128xf32>
    %7 = arith.addf %3, %6 : vector<32x128xf32>
    %c0_6 = arith.constant 0 : index
    %c0_7 = arith.constant 0 : index
    %8 = vector.load %arg8[%c0_6, %c0_7] : memref<32x128xf32, #tpu.memory_space<vmem>>, vector<32x128xf32>
    tpu.vector_store %arg8[%c0_6, %c0_7], %7 {strides = array<i32>} : memref<32x128xf32, #tpu.memory_space<vmem>>, vector<32x128xf32>,
    %c0_i32_8 = arith.constant 0 : i32
    %9 = arith.cmpi eq, %arg2, %c0_i32_8 : i32
    %10 = arith.extui %9 : i1 to i32
    %c0_i32_9 = arith.constant 0 : i32
    %11 = arith.cmpi ne, %10, %c0_i32_9 : i32
    scf.if %11 {
      %c0_10 = arith.constant 0 : index
      %c0_11 = arith.constant 0 : index
      %12 = vector.load %arg8[%c0_10, %c0_11] : memref<32x128xf32, #tpu.memory_space<vmem>>, vector<32x128xf32>
      %c0_12 = arith.constant 0 : index
      %c0_13 = arith.constant 0 : index
      %13 = vector.load %arg5[%c0_12, %c0_13] : memref<1x128xf32, #tpu.memory_space<vmem>>, vector<1x128xf32>
      %14 = vector.broadcast %13 : vector<1x128xf32> to vector<32x128xf32>
      %15 = arith.mulf %12, %14 : vector<32x128xf32>
      %c0_14 = arith.constant 0 : index
      %c0_15 = arith.constant 0 : index
      %16 = vector.load %arg6[%c0_14, %c0_15] : memref<1x128xf32, #tpu.memory_space<vmem>>, vector<1x128xf32>
      %17 = vector.broadcast %16 : vector<1x128xf32> to vector<32x128xf32>
      %18 = arith.addf %15, %17 : vector<32x128xf32>
      %cst_16 = arith.constant 0.000000e+00 : f32
      %19 = vector.broadcast %cst_16 : f32 to vector<32x128xf32>
      %20 = arith.maximumf %18, %19 : vector<32x128xf32>
      %c0_17 = arith.constant 0 : index
      %c0_18 = arith.constant 0 : index
      %21 = vector.load %arg7[%c0_17, %c0_18] : memref<32x128xf32, #tpu.memory_space<vmem>>, vector<32x128xf32>
      tpu.vector_store %arg7[%c0_17, %c0_18], %20 {strides = array<i32>} : memref<32x128xf32, #tpu.memory_space<vmem>>, vector<32x128xf32>,
    } else {
    }
    return
  }
  func.func @transform_0(%arg0: i32, %arg1: i32, %arg2: i32) -> (i32, i32) {
    %c0_i32 = arith.constant 0 : i32
    return %arg0, %arg2 : i32, i32
  }
  func.func @transform_1(%arg0: i32, %arg1: i32, %arg2: i32) -> (i32, i32) {
    %c0_i32 = arith.constant 0 : i32
    return %arg2, %arg1 : i32, i32
  }
  func.func @transform_2(%arg0: i32, %arg1: i32, %arg2: i32) -> (i32, i32) {
    %c0_i32 = arith.constant 0 : i32
    %c0_i32_0 = arith.constant 0 : i32
    return %c0_i32, %arg1 : i32, i32
  }
  func.func @transform_3(%arg0: i32, %arg1: i32, %arg2: i32) -> (i32, i32) {
    %c0_i32 = arith.constant 0 : i32
    %c0_i32_0 = arith.constant 0 : i32
    return %c0_i32, %arg1 : i32, i32
  }
  func.func @transform_4(%arg0: i32, %arg1: i32, %arg2: i32) -> (i32, i32) {
    %c0_i32 = arith.constant 0 : i32
    return %arg0, %arg1 : i32, i32
  }
}

module attributes {stable_mosaic.version = 11 : i64} {
  func.func @_mm_bn_res_relu_kernel(%arg0: i32, %arg1: i32, %arg2: i32, %arg3: memref<32x128xbf16, #tpu.memory_space<vmem>>, %arg4: memref<128x128xbf16, #tpu.memory_space<vmem>>, %arg5: memref<1x128xf32, #tpu.memory_space<vmem>>, %arg6: memref<1x128xf32, #tpu.memory_space<vmem>>, %arg7: memref<32x128xf32, #tpu.memory_space<vmem>>, %arg8: memref<32x128xf32, #tpu.memory_space<vmem>>, %arg9: memref<32x128xf32, #tpu.memory_space<vmem>>) attributes {dimension_semantics = [#tpu.dimension_semantics<parallel>, #tpu.dimension_semantics<parallel>, #tpu.dimension_semantics<arbitrary>], iteration_bounds = array<i64: 1, 1, 1>, scalar_prefetch = 0 : i64, scratch_operands = 1 : i64, tpu.core_type = #tpu.core_type<tc>, window_params = [{transform_indices = @transform_0, window_bounds = array<i64: 32, 128>}, {transform_indices = @transform_1, window_bounds = array<i64: 128, 128>}, {transform_indices = @transform_2, window_bounds = array<i64: 1, 128>}, {transform_indices = @transform_3, window_bounds = array<i64: 1, 128>}, {transform_indices = @transform_4, window_bounds = array<i64: 32, 128>}, {transform_indices = @transform_5, window_bounds = array<i64: 32, 128>}]} {
    %c0_i32 = arith.constant 0 : i32
    %0 = arith.cmpi eq, %arg2, %c0_i32 : i32
    %1 = arith.extui %0 : i1 to i32
    %c0_i32_0 = arith.constant 0 : i32
    %2 = arith.cmpi ne, %1, %c0_i32_0 : i32
    scf.if %2 {
      %cst_10 = arith.constant 0.000000e+00 : f32
      %12 = vector.broadcast %cst_10 : f32 to vector<32x128xf32>
      %c0_11 = arith.constant 0 : index
      %c0_12 = arith.constant 0 : index
      %13 = vector.load %arg9[%c0_11, %c0_12] : memref<32x128xf32, #tpu.memory_space<vmem>>, vector<32x128xf32>
      tpu.vector_store %arg9[%c0_11, %c0_12], %12 {strides = array<i32>} : memref<32x128xf32, #tpu.memory_space<vmem>>, vector<32x128xf32>,
    } else {
    }
    %c0 = arith.constant 0 : index
    %c0_1 = arith.constant 0 : index
    %3 = vector.load %arg9[%c0, %c0_1] : memref<32x128xf32, #tpu.memory_space<vmem>>, vector<32x128xf32>
    %c0_2 = arith.constant 0 : index
    %c0_3 = arith.constant 0 : index
    %4 = vector.load %arg3[%c0_2, %c0_3] : memref<32x128xbf16, #tpu.memory_space<vmem>>, vector<32x128xbf16>
    %c0_4 = arith.constant 0 : index
    %c0_5 = arith.constant 0 : index
    %5 = vector.load %arg4[%c0_4, %c0_5] : memref<128x128xbf16, #tpu.memory_space<vmem>>, vector<128x128xbf16>
    %cst = arith.constant dense<0.000000e+00> : vector<32x128xf32>
    %6 = tpu.matmul %4, %5, %cst {dimension_numbers = #tpu.dot_dimension_numbers<[1], [0], [0], [1], [0, 0, 1, 1], [], []>} : vector<32x128xbf16>, vector<128x128xbf16>, vector<32x128xf32> -> vector<32x128xf32>
    %7 = arith.addf %3, %6 : vector<32x128xf32>
    %c0_6 = arith.constant 0 : index
    %c0_7 = arith.constant 0 : index
    %8 = vector.load %arg9[%c0_6, %c0_7] : memref<32x128xf32, #tpu.memory_space<vmem>>, vector<32x128xf32>
    tpu.vector_store %arg9[%c0_6, %c0_7], %7 {strides = array<i32>} : memref<32x128xf32, #tpu.memory_space<vmem>>, vector<32x128xf32>,
    %c0_i32_8 = arith.constant 0 : i32
    %9 = arith.cmpi eq, %arg2, %c0_i32_8 : i32
    %10 = arith.extui %9 : i1 to i32
    %c0_i32_9 = arith.constant 0 : i32
    %11 = arith.cmpi ne, %10, %c0_i32_9 : i32
    scf.if %11 {
      %c0_10 = arith.constant 0 : index
      %c0_11 = arith.constant 0 : index
      %12 = vector.load %arg9[%c0_10, %c0_11] : memref<32x128xf32, #tpu.memory_space<vmem>>, vector<32x128xf32>
      %c0_12 = arith.constant 0 : index
      %c0_13 = arith.constant 0 : index
      %13 = vector.load %arg5[%c0_12, %c0_13] : memref<1x128xf32, #tpu.memory_space<vmem>>, vector<1x128xf32>
      %14 = vector.broadcast %13 : vector<1x128xf32> to vector<32x128xf32>
      %15 = arith.mulf %12, %14 : vector<32x128xf32>
      %c0_14 = arith.constant 0 : index
      %c0_15 = arith.constant 0 : index
      %16 = vector.load %arg6[%c0_14, %c0_15] : memref<1x128xf32, #tpu.memory_space<vmem>>, vector<1x128xf32>
      %17 = vector.broadcast %16 : vector<1x128xf32> to vector<32x128xf32>
      %18 = arith.addf %15, %17 : vector<32x128xf32>
      %c0_16 = arith.constant 0 : index
      %c0_17 = arith.constant 0 : index
      %19 = vector.load %arg7[%c0_16, %c0_17] : memref<32x128xf32, #tpu.memory_space<vmem>>, vector<32x128xf32>
      %20 = arith.addf %18, %19 : vector<32x128xf32>
      %cst_18 = arith.constant 0.000000e+00 : f32
      %21 = vector.broadcast %cst_18 : f32 to vector<32x128xf32>
      %22 = arith.maximumf %20, %21 : vector<32x128xf32>
      %c0_19 = arith.constant 0 : index
      %c0_20 = arith.constant 0 : index
      %23 = vector.load %arg8[%c0_19, %c0_20] : memref<32x128xf32, #tpu.memory_space<vmem>>, vector<32x128xf32>
      tpu.vector_store %arg8[%c0_19, %c0_20], %22 {strides = array<i32>} : memref<32x128xf32, #tpu.memory_space<vmem>>, vector<32x128xf32>,
    } else {
    }
    return
  }
  func.func @transform_0(%arg0: i32, %arg1: i32, %arg2: i32) -> (i32, i32) {
    %c0_i32 = arith.constant 0 : i32
    return %arg0, %arg2 : i32, i32
  }
  func.func @transform_1(%arg0: i32, %arg1: i32, %arg2: i32) -> (i32, i32) {
    %c0_i32 = arith.constant 0 : i32
    return %arg2, %arg1 : i32, i32
  }
  func.func @transform_2(%arg0: i32, %arg1: i32, %arg2: i32) -> (i32, i32) {
    %c0_i32 = arith.constant 0 : i32
    %c0_i32_0 = arith.constant 0 : i32
    return %c0_i32, %arg1 : i32, i32
  }
  func.func @transform_3(%arg0: i32, %arg1: i32, %arg2: i32) -> (i32, i32) {
    %c0_i32 = arith.constant 0 : i32
    %c0_i32_0 = arith.constant 0 : i32
    return %c0_i32, %arg1 : i32, i32
  }
  func.func @transform_4(%arg0: i32, %arg1: i32, %arg2: i32) -> (i32, i32) {
    %c0_i32 = arith.constant 0 : i32
    return %arg0, %arg1 : i32, i32
  }
  func.func @transform_5(%arg0: i32, %arg1: i32, %arg2: i32) -> (i32, i32) {
    %c0_i32 = arith.constant 0 : i32
    return %arg0, %arg1 : i32, i32
  }
}

module attributes {stable_mosaic.version = 11 : i64} {
  func.func @_mm_bn_kernel(%arg0: i32, %arg1: i32, %arg2: i32, %arg3: memref<32x256xbf16, #tpu.memory_space<vmem>>, %arg4: memref<256x128xbf16, #tpu.memory_space<vmem>>, %arg5: memref<1x128xf32, #tpu.memory_space<vmem>>, %arg6: memref<1x128xf32, #tpu.memory_space<vmem>>, %arg7: memref<32x128xf32, #tpu.memory_space<vmem>>, %arg8: memref<32x128xf32, #tpu.memory_space<vmem>>) attributes {dimension_semantics = [#tpu.dimension_semantics<parallel>, #tpu.dimension_semantics<parallel>, #tpu.dimension_semantics<arbitrary>], iteration_bounds = array<i64: 1, 1, 1>, scalar_prefetch = 0 : i64, scratch_operands = 1 : i64, tpu.core_type = #tpu.core_type<tc>, window_params = [{transform_indices = @transform_0, window_bounds = array<i64: 32, 256>}, {transform_indices = @transform_1, window_bounds = array<i64: 256, 128>}, {transform_indices = @transform_2, window_bounds = array<i64: 1, 128>}, {transform_indices = @transform_3, window_bounds = array<i64: 1, 128>}, {transform_indices = @transform_4, window_bounds = array<i64: 32, 128>}]} {
    %c0_i32 = arith.constant 0 : i32
    %0 = arith.cmpi eq, %arg2, %c0_i32 : i32
    %1 = arith.extui %0 : i1 to i32
    %c0_i32_0 = arith.constant 0 : i32
    %2 = arith.cmpi ne, %1, %c0_i32_0 : i32
    scf.if %2 {
      %cst_10 = arith.constant 0.000000e+00 : f32
      %12 = vector.broadcast %cst_10 : f32 to vector<32x128xf32>
      %c0_11 = arith.constant 0 : index
      %c0_12 = arith.constant 0 : index
      %13 = vector.load %arg8[%c0_11, %c0_12] : memref<32x128xf32, #tpu.memory_space<vmem>>, vector<32x128xf32>
      tpu.vector_store %arg8[%c0_11, %c0_12], %12 {strides = array<i32>} : memref<32x128xf32, #tpu.memory_space<vmem>>, vector<32x128xf32>,
    } else {
    }
    %c0 = arith.constant 0 : index
    %c0_1 = arith.constant 0 : index
    %3 = vector.load %arg8[%c0, %c0_1] : memref<32x128xf32, #tpu.memory_space<vmem>>, vector<32x128xf32>
    %c0_2 = arith.constant 0 : index
    %c0_3 = arith.constant 0 : index
    %4 = vector.load %arg3[%c0_2, %c0_3] : memref<32x256xbf16, #tpu.memory_space<vmem>>, vector<32x256xbf16>
    %c0_4 = arith.constant 0 : index
    %c0_5 = arith.constant 0 : index
    %5 = vector.load %arg4[%c0_4, %c0_5] : memref<256x128xbf16, #tpu.memory_space<vmem>>, vector<256x128xbf16>
    %cst = arith.constant dense<0.000000e+00> : vector<32x128xf32>
    %6 = tpu.matmul %4, %5, %cst {dimension_numbers = #tpu.dot_dimension_numbers<[1], [0], [0], [1], [0, 0, 1, 1], [], []>} : vector<32x256xbf16>, vector<256x128xbf16>, vector<32x128xf32> -> vector<32x128xf32>
    %7 = arith.addf %3, %6 : vector<32x128xf32>
    %c0_6 = arith.constant 0 : index
    %c0_7 = arith.constant 0 : index
    %8 = vector.load %arg8[%c0_6, %c0_7] : memref<32x128xf32, #tpu.memory_space<vmem>>, vector<32x128xf32>
    tpu.vector_store %arg8[%c0_6, %c0_7], %7 {strides = array<i32>} : memref<32x128xf32, #tpu.memory_space<vmem>>, vector<32x128xf32>,
    %c0_i32_8 = arith.constant 0 : i32
    %9 = arith.cmpi eq, %arg2, %c0_i32_8 : i32
    %10 = arith.extui %9 : i1 to i32
    %c0_i32_9 = arith.constant 0 : i32
    %11 = arith.cmpi ne, %10, %c0_i32_9 : i32
    scf.if %11 {
      %c0_10 = arith.constant 0 : index
      %c0_11 = arith.constant 0 : index
      %12 = vector.load %arg8[%c0_10, %c0_11] : memref<32x128xf32, #tpu.memory_space<vmem>>, vector<32x128xf32>
      %c0_12 = arith.constant 0 : index
      %c0_13 = arith.constant 0 : index
      %13 = vector.load %arg5[%c0_12, %c0_13] : memref<1x128xf32, #tpu.memory_space<vmem>>, vector<1x128xf32>
      %14 = vector.broadcast %13 : vector<1x128xf32> to vector<32x128xf32>
      %15 = arith.mulf %12, %14 : vector<32x128xf32>
      %c0_14 = arith.constant 0 : index
      %c0_15 = arith.constant 0 : index
      %16 = vector.load %arg6[%c0_14, %c0_15] : memref<1x128xf32, #tpu.memory_space<vmem>>, vector<1x128xf32>
      %17 = vector.broadcast %16 : vector<1x128xf32> to vector<32x128xf32>
      %18 = arith.addf %15, %17 : vector<32x128xf32>
      %cst_16 = arith.constant 0.000000e+00 : f32
      %19 = vector.broadcast %cst_16 : f32 to vector<32x128xf32>
      %20 = arith.maximumf %18, %19 : vector<32x128xf32>
      %c0_17 = arith.constant 0 : index
      %c0_18 = arith.constant 0 : index
      %21 = vector.load %arg7[%c0_17, %c0_18] : memref<32x128xf32, #tpu.memory_space<vmem>>, vector<32x128xf32>
      tpu.vector_store %arg7[%c0_17, %c0_18], %20 {strides = array<i32>} : memref<32x128xf32, #tpu.memory_space<vmem>>, vector<32x128xf32>,
    } else {
    }
    return
  }
  func.func @transform_0(%arg0: i32, %arg1: i32, %arg2: i32) -> (i32, i32) {
    %c0_i32 = arith.constant 0 : i32
    return %arg0, %arg2 : i32, i32
  }
  func.func @transform_1(%arg0: i32, %arg1: i32, %arg2: i32) -> (i32, i32) {
    %c0_i32 = arith.constant 0 : i32
    return %arg2, %arg1 : i32, i32
  }
  func.func @transform_2(%arg0: i32, %arg1: i32, %arg2: i32) -> (i32, i32) {
    %c0_i32 = arith.constant 0 : i32
    %c0_i32_0 = arith.constant 0 : i32
    return %c0_i32, %arg1 : i32, i32
  }
  func.func @transform_3(%arg0: i32, %arg1: i32, %arg2: i32) -> (i32, i32) {
    %c0_i32 = arith.constant 0 : i32
    %c0_i32_0 = arith.constant 0 : i32
    return %c0_i32, %arg1 : i32, i32
  }
  func.func @transform_4(%arg0: i32, %arg1: i32, %arg2: i32) -> (i32, i32) {
    %c0_i32 = arith.constant 0 : i32
    return %arg0, %arg1 : i32, i32
  }
}

module attributes {stable_mosaic.version = 11 : i64} {
  func.func @_mm_bn_kernel(%arg0: i32, %arg1: i32, %arg2: i32, %arg3: memref<16x256xbf16, #tpu.memory_space<vmem>>, %arg4: memref<256x128xbf16, #tpu.memory_space<vmem>>, %arg5: memref<1x128xf32, #tpu.memory_space<vmem>>, %arg6: memref<1x128xf32, #tpu.memory_space<vmem>>, %arg7: memref<16x128xf32, #tpu.memory_space<vmem>>, %arg8: memref<16x128xf32, #tpu.memory_space<vmem>>) attributes {dimension_semantics = [#tpu.dimension_semantics<parallel>, #tpu.dimension_semantics<parallel>, #tpu.dimension_semantics<arbitrary>], iteration_bounds = array<i64: 1, 1, 1>, scalar_prefetch = 0 : i64, scratch_operands = 1 : i64, tpu.core_type = #tpu.core_type<tc>, window_params = [{transform_indices = @transform_0, window_bounds = array<i64: 16, 256>}, {transform_indices = @transform_1, window_bounds = array<i64: 256, 128>}, {transform_indices = @transform_2, window_bounds = array<i64: 1, 128>}, {transform_indices = @transform_3, window_bounds = array<i64: 1, 128>}, {transform_indices = @transform_4, window_bounds = array<i64: 16, 128>}]} {
    %c0_i32 = arith.constant 0 : i32
    %0 = arith.cmpi eq, %arg2, %c0_i32 : i32
    %1 = arith.extui %0 : i1 to i32
    %c0_i32_0 = arith.constant 0 : i32
    %2 = arith.cmpi ne, %1, %c0_i32_0 : i32
    scf.if %2 {
      %cst_10 = arith.constant 0.000000e+00 : f32
      %12 = vector.broadcast %cst_10 : f32 to vector<16x128xf32>
      %c0_11 = arith.constant 0 : index
      %c0_12 = arith.constant 0 : index
      %13 = vector.load %arg8[%c0_11, %c0_12] : memref<16x128xf32, #tpu.memory_space<vmem>>, vector<16x128xf32>
      tpu.vector_store %arg8[%c0_11, %c0_12], %12 {strides = array<i32>} : memref<16x128xf32, #tpu.memory_space<vmem>>, vector<16x128xf32>,
    } else {
    }
    %c0 = arith.constant 0 : index
    %c0_1 = arith.constant 0 : index
    %3 = vector.load %arg8[%c0, %c0_1] : memref<16x128xf32, #tpu.memory_space<vmem>>, vector<16x128xf32>
    %c0_2 = arith.constant 0 : index
    %c0_3 = arith.constant 0 : index
    %4 = vector.load %arg3[%c0_2, %c0_3] : memref<16x256xbf16, #tpu.memory_space<vmem>>, vector<16x256xbf16>
    %c0_4 = arith.constant 0 : index
    %c0_5 = arith.constant 0 : index
    %5 = vector.load %arg4[%c0_4, %c0_5] : memref<256x128xbf16, #tpu.memory_space<vmem>>, vector<256x128xbf16>
    %cst = arith.constant dense<0.000000e+00> : vector<16x128xf32>
    %6 = tpu.matmul %4, %5, %cst {dimension_numbers = #tpu.dot_dimension_numbers<[1], [0], [0], [1], [0, 0, 1, 1], [], []>} : vector<16x256xbf16>, vector<256x128xbf16>, vector<16x128xf32> -> vector<16x128xf32>
    %7 = arith.addf %3, %6 : vector<16x128xf32>
    %c0_6 = arith.constant 0 : index
    %c0_7 = arith.constant 0 : index
    %8 = vector.load %arg8[%c0_6, %c0_7] : memref<16x128xf32, #tpu.memory_space<vmem>>, vector<16x128xf32>
    tpu.vector_store %arg8[%c0_6, %c0_7], %7 {strides = array<i32>} : memref<16x128xf32, #tpu.memory_space<vmem>>, vector<16x128xf32>,
    %c0_i32_8 = arith.constant 0 : i32
    %9 = arith.cmpi eq, %arg2, %c0_i32_8 : i32
    %10 = arith.extui %9 : i1 to i32
    %c0_i32_9 = arith.constant 0 : i32
    %11 = arith.cmpi ne, %10, %c0_i32_9 : i32
    scf.if %11 {
      %c0_10 = arith.constant 0 : index
      %c0_11 = arith.constant 0 : index
      %12 = vector.load %arg8[%c0_10, %c0_11] : memref<16x128xf32, #tpu.memory_space<vmem>>, vector<16x128xf32>
      %c0_12 = arith.constant 0 : index
      %c0_13 = arith.constant 0 : index
      %13 = vector.load %arg5[%c0_12, %c0_13] : memref<1x128xf32, #tpu.memory_space<vmem>>, vector<1x128xf32>
      %14 = vector.broadcast %13 : vector<1x128xf32> to vector<16x128xf32>
      %15 = arith.mulf %12, %14 : vector<16x128xf32>
      %c0_14 = arith.constant 0 : index
      %c0_15 = arith.constant 0 : index
      %16 = vector.load %arg6[%c0_14, %c0_15] : memref<1x128xf32, #tpu.memory_space<vmem>>, vector<1x128xf32>
      %17 = vector.broadcast %16 : vector<1x128xf32> to vector<16x128xf32>
      %18 = arith.addf %15, %17 : vector<16x128xf32>
      %c0_16 = arith.constant 0 : index
      %c0_17 = arith.constant 0 : index
      %19 = vector.load %arg7[%c0_16, %c0_17] : memref<16x128xf32, #tpu.memory_space<vmem>>, vector<16x128xf32>
      tpu.vector_store %arg7[%c0_16, %c0_17], %18 {strides = array<i32>} : memref<16x128xf32, #tpu.memory_space<vmem>>, vector<16x128xf32>,
    } else {
    }
    return
  }
  func.func @transform_0(%arg0: i32, %arg1: i32, %arg2: i32) -> (i32, i32) {
    %c0_i32 = arith.constant 0 : i32
    return %arg0, %arg2 : i32, i32
  }
  func.func @transform_1(%arg0: i32, %arg1: i32, %arg2: i32) -> (i32, i32) {
    %c0_i32 = arith.constant 0 : i32
    return %arg2, %arg1 : i32, i32
  }
  func.func @transform_2(%arg0: i32, %arg1: i32, %arg2: i32) -> (i32, i32) {
    %c0_i32 = arith.constant 0 : i32
    %c0_i32_0 = arith.constant 0 : i32
    return %c0_i32, %arg1 : i32, i32
  }
  func.func @transform_3(%arg0: i32, %arg1: i32, %arg2: i32) -> (i32, i32) {
    %c0_i32 = arith.constant 0 : i32
    %c0_i32_0 = arith.constant 0 : i32
    return %c0_i32, %arg1 : i32, i32
  }
  func.func @transform_4(%arg0: i32, %arg1: i32, %arg2: i32) -> (i32, i32) {
    %c0_i32 = arith.constant 0 : i32
    return %arg0, %arg1 : i32, i32
  }
}

module attributes {stable_mosaic.version = 11 : i64} {
  func.func @_mm_bn_kernel(%arg0: i32, %arg1: i32, %arg2: i32, %arg3: memref<32x384xbf16, #tpu.memory_space<vmem>>, %arg4: memref<384x128xbf16, #tpu.memory_space<vmem>>, %arg5: memref<1x128xf32, #tpu.memory_space<vmem>>, %arg6: memref<1x128xf32, #tpu.memory_space<vmem>>, %arg7: memref<32x128xf32, #tpu.memory_space<vmem>>, %arg8: memref<32x128xf32, #tpu.memory_space<vmem>>) attributes {dimension_semantics = [#tpu.dimension_semantics<parallel>, #tpu.dimension_semantics<parallel>, #tpu.dimension_semantics<arbitrary>], iteration_bounds = array<i64: 1, 1, 1>, scalar_prefetch = 0 : i64, scratch_operands = 1 : i64, tpu.core_type = #tpu.core_type<tc>, window_params = [{transform_indices = @transform_0, window_bounds = array<i64: 32, 384>}, {transform_indices = @transform_1, window_bounds = array<i64: 384, 128>}, {transform_indices = @transform_2, window_bounds = array<i64: 1, 128>}, {transform_indices = @transform_3, window_bounds = array<i64: 1, 128>}, {transform_indices = @transform_4, window_bounds = array<i64: 32, 128>}]} {
    %c0_i32 = arith.constant 0 : i32
    %0 = arith.cmpi eq, %arg2, %c0_i32 : i32
    %1 = arith.extui %0 : i1 to i32
    %c0_i32_0 = arith.constant 0 : i32
    %2 = arith.cmpi ne, %1, %c0_i32_0 : i32
    scf.if %2 {
      %cst_10 = arith.constant 0.000000e+00 : f32
      %12 = vector.broadcast %cst_10 : f32 to vector<32x128xf32>
      %c0_11 = arith.constant 0 : index
      %c0_12 = arith.constant 0 : index
      %13 = vector.load %arg8[%c0_11, %c0_12] : memref<32x128xf32, #tpu.memory_space<vmem>>, vector<32x128xf32>
      tpu.vector_store %arg8[%c0_11, %c0_12], %12 {strides = array<i32>} : memref<32x128xf32, #tpu.memory_space<vmem>>, vector<32x128xf32>,
    } else {
    }
    %c0 = arith.constant 0 : index
    %c0_1 = arith.constant 0 : index
    %3 = vector.load %arg8[%c0, %c0_1] : memref<32x128xf32, #tpu.memory_space<vmem>>, vector<32x128xf32>
    %c0_2 = arith.constant 0 : index
    %c0_3 = arith.constant 0 : index
    %4 = vector.load %arg3[%c0_2, %c0_3] : memref<32x384xbf16, #tpu.memory_space<vmem>>, vector<32x384xbf16>
    %c0_4 = arith.constant 0 : index
    %c0_5 = arith.constant 0 : index
    %5 = vector.load %arg4[%c0_4, %c0_5] : memref<384x128xbf16, #tpu.memory_space<vmem>>, vector<384x128xbf16>
    %cst = arith.constant dense<0.000000e+00> : vector<32x128xf32>
    %6 = tpu.matmul %4, %5, %cst {dimension_numbers = #tpu.dot_dimension_numbers<[1], [0], [0], [1], [0, 0, 1, 1], [], []>} : vector<32x384xbf16>, vector<384x128xbf16>, vector<32x128xf32> -> vector<32x128xf32>
    %7 = arith.addf %3, %6 : vector<32x128xf32>
    %c0_6 = arith.constant 0 : index
    %c0_7 = arith.constant 0 : index
    %8 = vector.load %arg8[%c0_6, %c0_7] : memref<32x128xf32, #tpu.memory_space<vmem>>, vector<32x128xf32>
    tpu.vector_store %arg8[%c0_6, %c0_7], %7 {strides = array<i32>} : memref<32x128xf32, #tpu.memory_space<vmem>>, vector<32x128xf32>,
    %c0_i32_8 = arith.constant 0 : i32
    %9 = arith.cmpi eq, %arg2, %c0_i32_8 : i32
    %10 = arith.extui %9 : i1 to i32
    %c0_i32_9 = arith.constant 0 : i32
    %11 = arith.cmpi ne, %10, %c0_i32_9 : i32
    scf.if %11 {
      %c0_10 = arith.constant 0 : index
      %c0_11 = arith.constant 0 : index
      %12 = vector.load %arg8[%c0_10, %c0_11] : memref<32x128xf32, #tpu.memory_space<vmem>>, vector<32x128xf32>
      %c0_12 = arith.constant 0 : index
      %c0_13 = arith.constant 0 : index
      %13 = vector.load %arg5[%c0_12, %c0_13] : memref<1x128xf32, #tpu.memory_space<vmem>>, vector<1x128xf32>
      %14 = vector.broadcast %13 : vector<1x128xf32> to vector<32x128xf32>
      %15 = arith.mulf %12, %14 : vector<32x128xf32>
      %c0_14 = arith.constant 0 : index
      %c0_15 = arith.constant 0 : index
      %16 = vector.load %arg6[%c0_14, %c0_15] : memref<1x128xf32, #tpu.memory_space<vmem>>, vector<1x128xf32>
      %17 = vector.broadcast %16 : vector<1x128xf32> to vector<32x128xf32>
      %18 = arith.addf %15, %17 : vector<32x128xf32>
      %cst_16 = arith.constant 0.000000e+00 : f32
      %19 = vector.broadcast %cst_16 : f32 to vector<32x128xf32>
      %20 = arith.maximumf %18, %19 : vector<32x128xf32>
      %c0_17 = arith.constant 0 : index
      %c0_18 = arith.constant 0 : index
      %21 = vector.load %arg7[%c0_17, %c0_18] : memref<32x128xf32, #tpu.memory_space<vmem>>, vector<32x128xf32>
      tpu.vector_store %arg7[%c0_17, %c0_18], %20 {strides = array<i32>} : memref<32x128xf32, #tpu.memory_space<vmem>>, vector<32x128xf32>,
    } else {
    }
    return
  }
  func.func @transform_0(%arg0: i32, %arg1: i32, %arg2: i32) -> (i32, i32) {
    %c0_i32 = arith.constant 0 : i32
    return %arg0, %arg2 : i32, i32
  }
  func.func @transform_1(%arg0: i32, %arg1: i32, %arg2: i32) -> (i32, i32) {
    %c0_i32 = arith.constant 0 : i32
    return %arg2, %arg1 : i32, i32
  }
  func.func @transform_2(%arg0: i32, %arg1: i32, %arg2: i32) -> (i32, i32) {
    %c0_i32 = arith.constant 0 : i32
    %c0_i32_0 = arith.constant 0 : i32
    return %c0_i32, %arg1 : i32, i32
  }
  func.func @transform_3(%arg0: i32, %arg1: i32, %arg2: i32) -> (i32, i32) {
    %c0_i32 = arith.constant 0 : i32
    %c0_i32_0 = arith.constant 0 : i32
    return %c0_i32, %arg1 : i32, i32
  }
  func.func @transform_4(%arg0: i32, %arg1: i32, %arg2: i32) -> (i32, i32) {
    %c0_i32 = arith.constant 0 : i32
    return %arg0, %arg1 : i32, i32
  }
}

module attributes {stable_mosaic.version = 11 : i64} {
  func.func @_mm_bn_res_relu_kernel(%arg0: i32, %arg1: i32, %arg2: i32, %arg3: memref<16x128xbf16, #tpu.memory_space<vmem>>, %arg4: memref<128x128xbf16, #tpu.memory_space<vmem>>, %arg5: memref<1x128xf32, #tpu.memory_space<vmem>>, %arg6: memref<1x128xf32, #tpu.memory_space<vmem>>, %arg7: memref<16x128xf32, #tpu.memory_space<vmem>>, %arg8: memref<16x128xf32, #tpu.memory_space<vmem>>, %arg9: memref<16x128xf32, #tpu.memory_space<vmem>>) attributes {dimension_semantics = [#tpu.dimension_semantics<parallel>, #tpu.dimension_semantics<parallel>, #tpu.dimension_semantics<arbitrary>], iteration_bounds = array<i64: 1, 1, 1>, scalar_prefetch = 0 : i64, scratch_operands = 1 : i64, tpu.core_type = #tpu.core_type<tc>, window_params = [{transform_indices = @transform_0, window_bounds = array<i64: 16, 128>}, {transform_indices = @transform_1, window_bounds = array<i64: 128, 128>}, {transform_indices = @transform_2, window_bounds = array<i64: 1, 128>}, {transform_indices = @transform_3, window_bounds = array<i64: 1, 128>}, {transform_indices = @transform_4, window_bounds = array<i64: 16, 128>}, {transform_indices = @transform_5, window_bounds = array<i64: 16, 128>}]} {
    %c0_i32 = arith.constant 0 : i32
    %0 = arith.cmpi eq, %arg2, %c0_i32 : i32
    %1 = arith.extui %0 : i1 to i32
    %c0_i32_0 = arith.constant 0 : i32
    %2 = arith.cmpi ne, %1, %c0_i32_0 : i32
    scf.if %2 {
      %cst_10 = arith.constant 0.000000e+00 : f32
      %12 = vector.broadcast %cst_10 : f32 to vector<16x128xf32>
      %c0_11 = arith.constant 0 : index
      %c0_12 = arith.constant 0 : index
      %13 = vector.load %arg9[%c0_11, %c0_12] : memref<16x128xf32, #tpu.memory_space<vmem>>, vector<16x128xf32>
      tpu.vector_store %arg9[%c0_11, %c0_12], %12 {strides = array<i32>} : memref<16x128xf32, #tpu.memory_space<vmem>>, vector<16x128xf32>,
    } else {
    }
    %c0 = arith.constant 0 : index
    %c0_1 = arith.constant 0 : index
    %3 = vector.load %arg9[%c0, %c0_1] : memref<16x128xf32, #tpu.memory_space<vmem>>, vector<16x128xf32>
    %c0_2 = arith.constant 0 : index
    %c0_3 = arith.constant 0 : index
    %4 = vector.load %arg3[%c0_2, %c0_3] : memref<16x128xbf16, #tpu.memory_space<vmem>>, vector<16x128xbf16>
    %c0_4 = arith.constant 0 : index
    %c0_5 = arith.constant 0 : index
    %5 = vector.load %arg4[%c0_4, %c0_5] : memref<128x128xbf16, #tpu.memory_space<vmem>>, vector<128x128xbf16>
    %cst = arith.constant dense<0.000000e+00> : vector<16x128xf32>
    %6 = tpu.matmul %4, %5, %cst {dimension_numbers = #tpu.dot_dimension_numbers<[1], [0], [0], [1], [0, 0, 1, 1], [], []>} : vector<16x128xbf16>, vector<128x128xbf16>, vector<16x128xf32> -> vector<16x128xf32>
    %7 = arith.addf %3, %6 : vector<16x128xf32>
    %c0_6 = arith.constant 0 : index
    %c0_7 = arith.constant 0 : index
    %8 = vector.load %arg9[%c0_6, %c0_7] : memref<16x128xf32, #tpu.memory_space<vmem>>, vector<16x128xf32>
    tpu.vector_store %arg9[%c0_6, %c0_7], %7 {strides = array<i32>} : memref<16x128xf32, #tpu.memory_space<vmem>>, vector<16x128xf32>,
    %c0_i32_8 = arith.constant 0 : i32
    %9 = arith.cmpi eq, %arg2, %c0_i32_8 : i32
    %10 = arith.extui %9 : i1 to i32
    %c0_i32_9 = arith.constant 0 : i32
    %11 = arith.cmpi ne, %10, %c0_i32_9 : i32
    scf.if %11 {
      %c0_10 = arith.constant 0 : index
      %c0_11 = arith.constant 0 : index
      %12 = vector.load %arg9[%c0_10, %c0_11] : memref<16x128xf32, #tpu.memory_space<vmem>>, vector<16x128xf32>
      %c0_12 = arith.constant 0 : index
      %c0_13 = arith.constant 0 : index
      %13 = vector.load %arg5[%c0_12, %c0_13] : memref<1x128xf32, #tpu.memory_space<vmem>>, vector<1x128xf32>
      %14 = vector.broadcast %13 : vector<1x128xf32> to vector<16x128xf32>
      %15 = arith.mulf %12, %14 : vector<16x128xf32>
      %c0_14 = arith.constant 0 : index
      %c0_15 = arith.constant 0 : index
      %16 = vector.load %arg6[%c0_14, %c0_15] : memref<1x128xf32, #tpu.memory_space<vmem>>, vector<1x128xf32>
      %17 = vector.broadcast %16 : vector<1x128xf32> to vector<16x128xf32>
      %18 = arith.addf %15, %17 : vector<16x128xf32>
      %c0_16 = arith.constant 0 : index
      %c0_17 = arith.constant 0 : index
      %19 = vector.load %arg7[%c0_16, %c0_17] : memref<16x128xf32, #tpu.memory_space<vmem>>, vector<16x128xf32>
      %20 = arith.addf %18, %19 : vector<16x128xf32>
      %cst_18 = arith.constant 0.000000e+00 : f32
      %21 = vector.broadcast %cst_18 : f32 to vector<16x128xf32>
      %22 = arith.maximumf %20, %21 : vector<16x128xf32>
      %c0_19 = arith.constant 0 : index
      %c0_20 = arith.constant 0 : index
      %23 = vector.load %arg8[%c0_19, %c0_20] : memref<16x128xf32, #tpu.memory_space<vmem>>, vector<16x128xf32>
      tpu.vector_store %arg8[%c0_19, %c0_20], %22 {strides = array<i32>} : memref<16x128xf32, #tpu.memory_space<vmem>>, vector<16x128xf32>,
    } else {
    }
    return
  }
  func.func @transform_0(%arg0: i32, %arg1: i32, %arg2: i32) -> (i32, i32) {
    %c0_i32 = arith.constant 0 : i32
    return %arg0, %arg2 : i32, i32
  }
  func.func @transform_1(%arg0: i32, %arg1: i32, %arg2: i32) -> (i32, i32) {
    %c0_i32 = arith.constant 0 : i32
    return %arg2, %arg1 : i32, i32
  }
  func.func @transform_2(%arg0: i32, %arg1: i32, %arg2: i32) -> (i32, i32) {
    %c0_i32 = arith.constant 0 : i32
    %c0_i32_0 = arith.constant 0 : i32
    return %c0_i32, %arg1 : i32, i32
  }
  func.func @transform_3(%arg0: i32, %arg1: i32, %arg2: i32) -> (i32, i32) {
    %c0_i32 = arith.constant 0 : i32
    %c0_i32_0 = arith.constant 0 : i32
    return %c0_i32, %arg1 : i32, i32
  }
  func.func @transform_4(%arg0: i32, %arg1: i32, %arg2: i32) -> (i32, i32) {
    %c0_i32 = arith.constant 0 : i32
    return %arg0, %arg1 : i32, i32
  }
  func.func @transform_5(%arg0: i32, %arg1: i32, %arg2: i32) -> (i32, i32) {
    %c0_i32 = arith.constant 0 : i32
    return %arg0, %arg1 : i32, i32
  }
}

module attributes {stable_mosaic.version = 11 : i64} {
  func.func @_mm_bn_kernel(%arg0: i32, %arg1: i32, %arg2: i32, %arg3: memref<16x128xbf16, #tpu.memory_space<vmem>>, %arg4: memref<128x128xbf16, #tpu.memory_space<vmem>>, %arg5: memref<1x128xf32, #tpu.memory_space<vmem>>, %arg6: memref<1x128xf32, #tpu.memory_space<vmem>>, %arg7: memref<16x128xf32, #tpu.memory_space<vmem>>, %arg8: memref<16x128xf32, #tpu.memory_space<vmem>>) attributes {dimension_semantics = [#tpu.dimension_semantics<parallel>, #tpu.dimension_semantics<parallel>, #tpu.dimension_semantics<arbitrary>], iteration_bounds = array<i64: 1, 1, 1>, scalar_prefetch = 0 : i64, scratch_operands = 1 : i64, tpu.core_type = #tpu.core_type<tc>, window_params = [{transform_indices = @transform_0, window_bounds = array<i64: 16, 128>}, {transform_indices = @transform_1, window_bounds = array<i64: 128, 128>}, {transform_indices = @transform_2, window_bounds = array<i64: 1, 128>}, {transform_indices = @transform_3, window_bounds = array<i64: 1, 128>}, {transform_indices = @transform_4, window_bounds = array<i64: 16, 128>}]} {
    %c0_i32 = arith.constant 0 : i32
    %0 = arith.cmpi eq, %arg2, %c0_i32 : i32
    %1 = arith.extui %0 : i1 to i32
    %c0_i32_0 = arith.constant 0 : i32
    %2 = arith.cmpi ne, %1, %c0_i32_0 : i32
    scf.if %2 {
      %cst_10 = arith.constant 0.000000e+00 : f32
      %12 = vector.broadcast %cst_10 : f32 to vector<16x128xf32>
      %c0_11 = arith.constant 0 : index
      %c0_12 = arith.constant 0 : index
      %13 = vector.load %arg8[%c0_11, %c0_12] : memref<16x128xf32, #tpu.memory_space<vmem>>, vector<16x128xf32>
      tpu.vector_store %arg8[%c0_11, %c0_12], %12 {strides = array<i32>} : memref<16x128xf32, #tpu.memory_space<vmem>>, vector<16x128xf32>,
    } else {
    }
    %c0 = arith.constant 0 : index
    %c0_1 = arith.constant 0 : index
    %3 = vector.load %arg8[%c0, %c0_1] : memref<16x128xf32, #tpu.memory_space<vmem>>, vector<16x128xf32>
    %c0_2 = arith.constant 0 : index
    %c0_3 = arith.constant 0 : index
    %4 = vector.load %arg3[%c0_2, %c0_3] : memref<16x128xbf16, #tpu.memory_space<vmem>>, vector<16x128xbf16>
    %c0_4 = arith.constant 0 : index
    %c0_5 = arith.constant 0 : index
    %5 = vector.load %arg4[%c0_4, %c0_5] : memref<128x128xbf16, #tpu.memory_space<vmem>>, vector<128x128xbf16>
    %cst = arith.constant dense<0.000000e+00> : vector<16x128xf32>
    %6 = tpu.matmul %4, %5, %cst {dimension_numbers = #tpu.dot_dimension_numbers<[1], [0], [0], [1], [0, 0, 1, 1], [], []>} : vector<16x128xbf16>, vector<128x128xbf16>, vector<16x128xf32> -> vector<16x128xf32>
    %7 = arith.addf %3, %6 : vector<16x128xf32>
    %c0_6 = arith.constant 0 : index
    %c0_7 = arith.constant 0 : index
    %8 = vector.load %arg8[%c0_6, %c0_7] : memref<16x128xf32, #tpu.memory_space<vmem>>, vector<16x128xf32>
    tpu.vector_store %arg8[%c0_6, %c0_7], %7 {strides = array<i32>} : memref<16x128xf32, #tpu.memory_space<vmem>>, vector<16x128xf32>,
    %c0_i32_8 = arith.constant 0 : i32
    %9 = arith.cmpi eq, %arg2, %c0_i32_8 : i32
    %10 = arith.extui %9 : i1 to i32
    %c0_i32_9 = arith.constant 0 : i32
    %11 = arith.cmpi ne, %10, %c0_i32_9 : i32
    scf.if %11 {
      %c0_10 = arith.constant 0 : index
      %c0_11 = arith.constant 0 : index
      %12 = vector.load %arg8[%c0_10, %c0_11] : memref<16x128xf32, #tpu.memory_space<vmem>>, vector<16x128xf32>
      %c0_12 = arith.constant 0 : index
      %c0_13 = arith.constant 0 : index
      %13 = vector.load %arg5[%c0_12, %c0_13] : memref<1x128xf32, #tpu.memory_space<vmem>>, vector<1x128xf32>
      %14 = vector.broadcast %13 : vector<1x128xf32> to vector<16x128xf32>
      %15 = arith.mulf %12, %14 : vector<16x128xf32>
      %c0_14 = arith.constant 0 : index
      %c0_15 = arith.constant 0 : index
      %16 = vector.load %arg6[%c0_14, %c0_15] : memref<1x128xf32, #tpu.memory_space<vmem>>, vector<1x128xf32>
      %17 = vector.broadcast %16 : vector<1x128xf32> to vector<16x128xf32>
      %18 = arith.addf %15, %17 : vector<16x128xf32>
      %cst_16 = arith.constant 0.000000e+00 : f32
      %19 = vector.broadcast %cst_16 : f32 to vector<16x128xf32>
      %20 = arith.maximumf %18, %19 : vector<16x128xf32>
      %c0_17 = arith.constant 0 : index
      %c0_18 = arith.constant 0 : index
      %21 = vector.load %arg7[%c0_17, %c0_18] : memref<16x128xf32, #tpu.memory_space<vmem>>, vector<16x128xf32>
      tpu.vector_store %arg7[%c0_17, %c0_18], %20 {strides = array<i32>} : memref<16x128xf32, #tpu.memory_space<vmem>>, vector<16x128xf32>,
    } else {
    }
    return
  }
  func.func @transform_0(%arg0: i32, %arg1: i32, %arg2: i32) -> (i32, i32) {
    %c0_i32 = arith.constant 0 : i32
    return %arg0, %arg2 : i32, i32
  }
  func.func @transform_1(%arg0: i32, %arg1: i32, %arg2: i32) -> (i32, i32) {
    %c0_i32 = arith.constant 0 : i32
    return %arg2, %arg1 : i32, i32
  }
  func.func @transform_2(%arg0: i32, %arg1: i32, %arg2: i32) -> (i32, i32) {
    %c0_i32 = arith.constant 0 : i32
    %c0_i32_0 = arith.constant 0 : i32
    return %c0_i32, %arg1 : i32, i32
  }
  func.func @transform_3(%arg0: i32, %arg1: i32, %arg2: i32) -> (i32, i32) {
    %c0_i32 = arith.constant 0 : i32
    %c0_i32_0 = arith.constant 0 : i32
    return %c0_i32, %arg1 : i32, i32
  }
  func.func @transform_4(%arg0: i32, %arg1: i32, %arg2: i32) -> (i32, i32) {
    %c0_i32 = arith.constant 0 : i32
    return %arg0, %arg1 : i32, i32
  }
}

module attributes {stable_mosaic.version = 11 : i64} {
  func.func @_mm_bn_kernel(%arg0: i32, %arg1: i32, %arg2: i32, %arg3: memref<16x384xbf16, #tpu.memory_space<vmem>>, %arg4: memref<384x128xbf16, #tpu.memory_space<vmem>>, %arg5: memref<1x128xf32, #tpu.memory_space<vmem>>, %arg6: memref<1x128xf32, #tpu.memory_space<vmem>>, %arg7: memref<16x128xf32, #tpu.memory_space<vmem>>, %arg8: memref<16x128xf32, #tpu.memory_space<vmem>>) attributes {dimension_semantics = [#tpu.dimension_semantics<parallel>, #tpu.dimension_semantics<parallel>, #tpu.dimension_semantics<arbitrary>], iteration_bounds = array<i64: 1, 1, 1>, scalar_prefetch = 0 : i64, scratch_operands = 1 : i64, tpu.core_type = #tpu.core_type<tc>, window_params = [{transform_indices = @transform_0, window_bounds = array<i64: 16, 384>}, {transform_indices = @transform_1, window_bounds = array<i64: 384, 128>}, {transform_indices = @transform_2, window_bounds = array<i64: 1, 128>}, {transform_indices = @transform_3, window_bounds = array<i64: 1, 128>}, {transform_indices = @transform_4, window_bounds = array<i64: 16, 128>}]} {
    %c0_i32 = arith.constant 0 : i32
    %0 = arith.cmpi eq, %arg2, %c0_i32 : i32
    %1 = arith.extui %0 : i1 to i32
    %c0_i32_0 = arith.constant 0 : i32
    %2 = arith.cmpi ne, %1, %c0_i32_0 : i32
    scf.if %2 {
      %cst_10 = arith.constant 0.000000e+00 : f32
      %12 = vector.broadcast %cst_10 : f32 to vector<16x128xf32>
      %c0_11 = arith.constant 0 : index
      %c0_12 = arith.constant 0 : index
      %13 = vector.load %arg8[%c0_11, %c0_12] : memref<16x128xf32, #tpu.memory_space<vmem>>, vector<16x128xf32>
      tpu.vector_store %arg8[%c0_11, %c0_12], %12 {strides = array<i32>} : memref<16x128xf32, #tpu.memory_space<vmem>>, vector<16x128xf32>,
    } else {
    }
    %c0 = arith.constant 0 : index
    %c0_1 = arith.constant 0 : index
    %3 = vector.load %arg8[%c0, %c0_1] : memref<16x128xf32, #tpu.memory_space<vmem>>, vector<16x128xf32>
    %c0_2 = arith.constant 0 : index
    %c0_3 = arith.constant 0 : index
    %4 = vector.load %arg3[%c0_2, %c0_3] : memref<16x384xbf16, #tpu.memory_space<vmem>>, vector<16x384xbf16>
    %c0_4 = arith.constant 0 : index
    %c0_5 = arith.constant 0 : index
    %5 = vector.load %arg4[%c0_4, %c0_5] : memref<384x128xbf16, #tpu.memory_space<vmem>>, vector<384x128xbf16>
    %cst = arith.constant dense<0.000000e+00> : vector<16x128xf32>
    %6 = tpu.matmul %4, %5, %cst {dimension_numbers = #tpu.dot_dimension_numbers<[1], [0], [0], [1], [0, 0, 1, 1], [], []>} : vector<16x384xbf16>, vector<384x128xbf16>, vector<16x128xf32> -> vector<16x128xf32>
    %7 = arith.addf %3, %6 : vector<16x128xf32>
    %c0_6 = arith.constant 0 : index
    %c0_7 = arith.constant 0 : index
    %8 = vector.load %arg8[%c0_6, %c0_7] : memref<16x128xf32, #tpu.memory_space<vmem>>, vector<16x128xf32>
    tpu.vector_store %arg8[%c0_6, %c0_7], %7 {strides = array<i32>} : memref<16x128xf32, #tpu.memory_space<vmem>>, vector<16x128xf32>,
    %c0_i32_8 = arith.constant 0 : i32
    %9 = arith.cmpi eq, %arg2, %c0_i32_8 : i32
    %10 = arith.extui %9 : i1 to i32
    %c0_i32_9 = arith.constant 0 : i32
    %11 = arith.cmpi ne, %10, %c0_i32_9 : i32
    scf.if %11 {
      %c0_10 = arith.constant 0 : index
      %c0_11 = arith.constant 0 : index
      %12 = vector.load %arg8[%c0_10, %c0_11] : memref<16x128xf32, #tpu.memory_space<vmem>>, vector<16x128xf32>
      %c0_12 = arith.constant 0 : index
      %c0_13 = arith.constant 0 : index
      %13 = vector.load %arg5[%c0_12, %c0_13] : memref<1x128xf32, #tpu.memory_space<vmem>>, vector<1x128xf32>
      %14 = vector.broadcast %13 : vector<1x128xf32> to vector<16x128xf32>
      %15 = arith.mulf %12, %14 : vector<16x128xf32>
      %c0_14 = arith.constant 0 : index
      %c0_15 = arith.constant 0 : index
      %16 = vector.load %arg6[%c0_14, %c0_15] : memref<1x128xf32, #tpu.memory_space<vmem>>, vector<1x128xf32>
      %17 = vector.broadcast %16 : vector<1x128xf32> to vector<16x128xf32>
      %18 = arith.addf %15, %17 : vector<16x128xf32>
      %cst_16 = arith.constant 0.000000e+00 : f32
      %19 = vector.broadcast %cst_16 : f32 to vector<16x128xf32>
      %20 = arith.maximumf %18, %19 : vector<16x128xf32>
      %c0_17 = arith.constant 0 : index
      %c0_18 = arith.constant 0 : index
      %21 = vector.load %arg7[%c0_17, %c0_18] : memref<16x128xf32, #tpu.memory_space<vmem>>, vector<16x128xf32>
      tpu.vector_store %arg7[%c0_17, %c0_18], %20 {strides = array<i32>} : memref<16x128xf32, #tpu.memory_space<vmem>>, vector<16x128xf32>,
    } else {
    }
    return
  }
  func.func @transform_0(%arg0: i32, %arg1: i32, %arg2: i32) -> (i32, i32) {
    %c0_i32 = arith.constant 0 : i32
    return %arg0, %arg2 : i32, i32
  }
  func.func @transform_1(%arg0: i32, %arg1: i32, %arg2: i32) -> (i32, i32) {
    %c0_i32 = arith.constant 0 : i32
    return %arg2, %arg1 : i32, i32
  }
  func.func @transform_2(%arg0: i32, %arg1: i32, %arg2: i32) -> (i32, i32) {
    %c0_i32 = arith.constant 0 : i32
    %c0_i32_0 = arith.constant 0 : i32
    return %c0_i32, %arg1 : i32, i32
  }
  func.func @transform_3(%arg0: i32, %arg1: i32, %arg2: i32) -> (i32, i32) {
    %c0_i32 = arith.constant 0 : i32
    %c0_i32_0 = arith.constant 0 : i32
    return %c0_i32, %arg1 : i32, i32
  }
  func.func @transform_4(%arg0: i32, %arg1: i32, %arg2: i32) -> (i32, i32) {
    %c0_i32 = arith.constant 0 : i32
    return %arg0, %arg1 : i32, i32
  }
}

module attributes {stable_mosaic.version = 11 : i64} {
  func.func @_mm_bn_kernel(%arg0: i32, %arg1: i32, %arg2: i32, %arg3: memref<16x512xbf16, #tpu.memory_space<vmem>>, %arg4: memref<512x256xbf16, #tpu.memory_space<vmem>>, %arg5: memref<1x256xf32, #tpu.memory_space<vmem>>, %arg6: memref<1x256xf32, #tpu.memory_space<vmem>>, %arg7: memref<16x256xf32, #tpu.memory_space<vmem>>, %arg8: memref<16x256xf32, #tpu.memory_space<vmem>>) attributes {dimension_semantics = [#tpu.dimension_semantics<parallel>, #tpu.dimension_semantics<parallel>, #tpu.dimension_semantics<arbitrary>], iteration_bounds = array<i64: 1, 1, 1>, scalar_prefetch = 0 : i64, scratch_operands = 1 : i64, tpu.core_type = #tpu.core_type<tc>, window_params = [{transform_indices = @transform_0, window_bounds = array<i64: 16, 512>}, {transform_indices = @transform_1, window_bounds = array<i64: 512, 256>}, {transform_indices = @transform_2, window_bounds = array<i64: 1, 256>}, {transform_indices = @transform_3, window_bounds = array<i64: 1, 256>}, {transform_indices = @transform_4, window_bounds = array<i64: 16, 256>}]} {
    %c0_i32 = arith.constant 0 : i32
    %0 = arith.cmpi eq, %arg2, %c0_i32 : i32
    %1 = arith.extui %0 : i1 to i32
    %c0_i32_0 = arith.constant 0 : i32
    %2 = arith.cmpi ne, %1, %c0_i32_0 : i32
    scf.if %2 {
      %cst_10 = arith.constant 0.000000e+00 : f32
      %12 = vector.broadcast %cst_10 : f32 to vector<16x256xf32>
      %c0_11 = arith.constant 0 : index
      %c0_12 = arith.constant 0 : index
      %13 = vector.load %arg8[%c0_11, %c0_12] : memref<16x256xf32, #tpu.memory_space<vmem>>, vector<16x256xf32>
      tpu.vector_store %arg8[%c0_11, %c0_12], %12 {strides = array<i32>} : memref<16x256xf32, #tpu.memory_space<vmem>>, vector<16x256xf32>,
    } else {
    }
    %c0 = arith.constant 0 : index
    %c0_1 = arith.constant 0 : index
    %3 = vector.load %arg8[%c0, %c0_1] : memref<16x256xf32, #tpu.memory_space<vmem>>, vector<16x256xf32>
    %c0_2 = arith.constant 0 : index
    %c0_3 = arith.constant 0 : index
    %4 = vector.load %arg3[%c0_2, %c0_3] : memref<16x512xbf16, #tpu.memory_space<vmem>>, vector<16x512xbf16>
    %c0_4 = arith.constant 0 : index
    %c0_5 = arith.constant 0 : index
    %5 = vector.load %arg4[%c0_4, %c0_5] : memref<512x256xbf16, #tpu.memory_space<vmem>>, vector<512x256xbf16>
    %cst = arith.constant dense<0.000000e+00> : vector<16x256xf32>
    %6 = tpu.matmul %4, %5, %cst {dimension_numbers = #tpu.dot_dimension_numbers<[1], [0], [0], [1], [0, 0, 1, 1], [], []>} : vector<16x512xbf16>, vector<512x256xbf16>, vector<16x256xf32> -> vector<16x256xf32>
    %7 = arith.addf %3, %6 : vector<16x256xf32>
    %c0_6 = arith.constant 0 : index
    %c0_7 = arith.constant 0 : index
    %8 = vector.load %arg8[%c0_6, %c0_7] : memref<16x256xf32, #tpu.memory_space<vmem>>, vector<16x256xf32>
    tpu.vector_store %arg8[%c0_6, %c0_7], %7 {strides = array<i32>} : memref<16x256xf32, #tpu.memory_space<vmem>>, vector<16x256xf32>,
    %c0_i32_8 = arith.constant 0 : i32
    %9 = arith.cmpi eq, %arg2, %c0_i32_8 : i32
    %10 = arith.extui %9 : i1 to i32
    %c0_i32_9 = arith.constant 0 : i32
    %11 = arith.cmpi ne, %10, %c0_i32_9 : i32
    scf.if %11 {
      %c0_10 = arith.constant 0 : index
      %c0_11 = arith.constant 0 : index
      %12 = vector.load %arg8[%c0_10, %c0_11] : memref<16x256xf32, #tpu.memory_space<vmem>>, vector<16x256xf32>
      %c0_12 = arith.constant 0 : index
      %c0_13 = arith.constant 0 : index
      %13 = vector.load %arg5[%c0_12, %c0_13] : memref<1x256xf32, #tpu.memory_space<vmem>>, vector<1x256xf32>
      %14 = vector.broadcast %13 : vector<1x256xf32> to vector<16x256xf32>
      %15 = arith.mulf %12, %14 : vector<16x256xf32>
      %c0_14 = arith.constant 0 : index
      %c0_15 = arith.constant 0 : index
      %16 = vector.load %arg6[%c0_14, %c0_15] : memref<1x256xf32, #tpu.memory_space<vmem>>, vector<1x256xf32>
      %17 = vector.broadcast %16 : vector<1x256xf32> to vector<16x256xf32>
      %18 = arith.addf %15, %17 : vector<16x256xf32>
      %c0_16 = arith.constant 0 : index
      %c0_17 = arith.constant 0 : index
      %19 = vector.load %arg7[%c0_16, %c0_17] : memref<16x256xf32, #tpu.memory_space<vmem>>, vector<16x256xf32>
      tpu.vector_store %arg7[%c0_16, %c0_17], %18 {strides = array<i32>} : memref<16x256xf32, #tpu.memory_space<vmem>>, vector<16x256xf32>,
    } else {
    }
    return
  }
  func.func @transform_0(%arg0: i32, %arg1: i32, %arg2: i32) -> (i32, i32) {
    %c0_i32 = arith.constant 0 : i32
    return %arg0, %arg2 : i32, i32
  }
  func.func @transform_1(%arg0: i32, %arg1: i32, %arg2: i32) -> (i32, i32) {
    %c0_i32 = arith.constant 0 : i32
    return %arg2, %arg1 : i32, i32
  }
  func.func @transform_2(%arg0: i32, %arg1: i32, %arg2: i32) -> (i32, i32) {
    %c0_i32 = arith.constant 0 : i32
    %c0_i32_0 = arith.constant 0 : i32
    return %c0_i32, %arg1 : i32, i32
  }
  func.func @transform_3(%arg0: i32, %arg1: i32, %arg2: i32) -> (i32, i32) {
    %c0_i32 = arith.constant 0 : i32
    %c0_i32_0 = arith.constant 0 : i32
    return %c0_i32, %arg1 : i32, i32
  }
  func.func @transform_4(%arg0: i32, %arg1: i32, %arg2: i32) -> (i32, i32) {
    %c0_i32 = arith.constant 0 : i32
    return %arg0, %arg1 : i32, i32
  }
}

module attributes {stable_mosaic.version = 11 : i64} {
  func.func @_mm_bn_kernel(%arg0: i32, %arg1: i32, %arg2: i32, %arg3: memref<16x128xbf16, #tpu.memory_space<vmem>>, %arg4: memref<128x128xbf16, #tpu.memory_space<vmem>>, %arg5: memref<1x128xf32, #tpu.memory_space<vmem>>, %arg6: memref<1x128xf32, #tpu.memory_space<vmem>>, %arg7: memref<16x128xf32, #tpu.memory_space<vmem>>, %arg8: memref<16x128xf32, #tpu.memory_space<vmem>>) attributes {dimension_semantics = [#tpu.dimension_semantics<parallel>, #tpu.dimension_semantics<parallel>, #tpu.dimension_semantics<arbitrary>], iteration_bounds = array<i64: 1, 1, 5>, scalar_prefetch = 0 : i64, scratch_operands = 1 : i64, tpu.core_type = #tpu.core_type<tc>, window_params = [{transform_indices = @transform_0, window_bounds = array<i64: 16, 128>}, {transform_indices = @transform_1, window_bounds = array<i64: 128, 128>}, {transform_indices = @transform_2, window_bounds = array<i64: 1, 128>}, {transform_indices = @transform_3, window_bounds = array<i64: 1, 128>}, {transform_indices = @transform_4, window_bounds = array<i64: 16, 128>}]} {
    %c0_i32 = arith.constant 0 : i32
    %0 = arith.cmpi eq, %arg2, %c0_i32 : i32
    %1 = arith.extui %0 : i1 to i32
    %c0_i32_0 = arith.constant 0 : i32
    %2 = arith.cmpi ne, %1, %c0_i32_0 : i32
    scf.if %2 {
      %cst_9 = arith.constant 0.000000e+00 : f32
      %12 = vector.broadcast %cst_9 : f32 to vector<16x128xf32>
      %c0_10 = arith.constant 0 : index
      %c0_11 = arith.constant 0 : index
      %13 = vector.load %arg8[%c0_10, %c0_11] : memref<16x128xf32, #tpu.memory_space<vmem>>, vector<16x128xf32>
      tpu.vector_store %arg8[%c0_10, %c0_11], %12 {strides = array<i32>} : memref<16x128xf32, #tpu.memory_space<vmem>>, vector<16x128xf32>,
    } else {
    }
    %c0 = arith.constant 0 : index
    %c0_1 = arith.constant 0 : index
    %3 = vector.load %arg8[%c0, %c0_1] : memref<16x128xf32, #tpu.memory_space<vmem>>, vector<16x128xf32>
    %c0_2 = arith.constant 0 : index
    %c0_3 = arith.constant 0 : index
    %4 = vector.load %arg3[%c0_2, %c0_3] : memref<16x128xbf16, #tpu.memory_space<vmem>>, vector<16x128xbf16>
    %c0_4 = arith.constant 0 : index
    %c0_5 = arith.constant 0 : index
    %5 = vector.load %arg4[%c0_4, %c0_5] : memref<128x128xbf16, #tpu.memory_space<vmem>>, vector<128x128xbf16>
    %cst = arith.constant dense<0.000000e+00> : vector<16x128xf32>
    %6 = tpu.matmul %4, %5, %cst {dimension_numbers = #tpu.dot_dimension_numbers<[1], [0], [0], [1], [0, 0, 1, 1], [], []>} : vector<16x128xbf16>, vector<128x128xbf16>, vector<16x128xf32> -> vector<16x128xf32>
    %7 = arith.addf %3, %6 : vector<16x128xf32>
    %c0_6 = arith.constant 0 : index
    %c0_7 = arith.constant 0 : index
    %8 = vector.load %arg8[%c0_6, %c0_7] : memref<16x128xf32, #tpu.memory_space<vmem>>, vector<16x128xf32>
    tpu.vector_store %arg8[%c0_6, %c0_7], %7 {strides = array<i32>} : memref<16x128xf32, #tpu.memory_space<vmem>>, vector<16x128xf32>,
    %c4_i32 = arith.constant 4 : i32
    %9 = arith.cmpi eq, %arg2, %c4_i32 : i32
    %10 = arith.extui %9 : i1 to i32
    %c0_i32_8 = arith.constant 0 : i32
    %11 = arith.cmpi ne, %10, %c0_i32_8 : i32
    scf.if %11 {
      %c0_9 = arith.constant 0 : index
      %c0_10 = arith.constant 0 : index
      %12 = vector.load %arg8[%c0_9, %c0_10] : memref<16x128xf32, #tpu.memory_space<vmem>>, vector<16x128xf32>
      %c0_11 = arith.constant 0 : index
      %c0_12 = arith.constant 0 : index
      %13 = vector.load %arg5[%c0_11, %c0_12] : memref<1x128xf32, #tpu.memory_space<vmem>>, vector<1x128xf32>
      %14 = vector.broadcast %13 : vector<1x128xf32> to vector<16x128xf32>
      %15 = arith.mulf %12, %14 : vector<16x128xf32>
      %c0_13 = arith.constant 0 : index
      %c0_14 = arith.constant 0 : index
      %16 = vector.load %arg6[%c0_13, %c0_14] : memref<1x128xf32, #tpu.memory_space<vmem>>, vector<1x128xf32>
      %17 = vector.broadcast %16 : vector<1x128xf32> to vector<16x128xf32>
      %18 = arith.addf %15, %17 : vector<16x128xf32>
      %cst_15 = arith.constant 0.000000e+00 : f32
      %19 = vector.broadcast %cst_15 : f32 to vector<16x128xf32>
      %20 = arith.maximumf %18, %19 : vector<16x128xf32>
      %c0_16 = arith.constant 0 : index
      %c0_17 = arith.constant 0 : index
      %21 = vector.load %arg7[%c0_16, %c0_17] : memref<16x128xf32, #tpu.memory_space<vmem>>, vector<16x128xf32>
      tpu.vector_store %arg7[%c0_16, %c0_17], %20 {strides = array<i32>} : memref<16x128xf32, #tpu.memory_space<vmem>>, vector<16x128xf32>,
    } else {
    }
    return
  }
  func.func @transform_0(%arg0: i32, %arg1: i32, %arg2: i32) -> (i32, i32) {
    %c0_i32 = arith.constant 0 : i32
    return %arg0, %arg2 : i32, i32
  }
  func.func @transform_1(%arg0: i32, %arg1: i32, %arg2: i32) -> (i32, i32) {
    %c0_i32 = arith.constant 0 : i32
    return %arg2, %arg1 : i32, i32
  }
  func.func @transform_2(%arg0: i32, %arg1: i32, %arg2: i32) -> (i32, i32) {
    %c0_i32 = arith.constant 0 : i32
    %c0_i32_0 = arith.constant 0 : i32
    return %c0_i32, %arg1 : i32, i32
  }
  func.func @transform_3(%arg0: i32, %arg1: i32, %arg2: i32) -> (i32, i32) {
    %c0_i32 = arith.constant 0 : i32
    %c0_i32_0 = arith.constant 0 : i32
    return %c0_i32, %arg1 : i32, i32
  }
  func.func @transform_4(%arg0: i32, %arg1: i32, %arg2: i32) -> (i32, i32) {
    %c0_i32 = arith.constant 0 : i32
    return %arg0, %arg1 : i32, i32
  }
}

module attributes {stable_mosaic.version = 11 : i64} {
  func.func @_mm_bn_res_relu_kernel(%arg0: i32, %arg1: i32, %arg2: i32, %arg3: memref<16x256xbf16, #tpu.memory_space<vmem>>, %arg4: memref<256x256xbf16, #tpu.memory_space<vmem>>, %arg5: memref<1x256xf32, #tpu.memory_space<vmem>>, %arg6: memref<1x256xf32, #tpu.memory_space<vmem>>, %arg7: memref<16x256xf32, #tpu.memory_space<vmem>>, %arg8: memref<16x256xf32, #tpu.memory_space<vmem>>, %arg9: memref<16x256xf32, #tpu.memory_space<vmem>>) attributes {dimension_semantics = [#tpu.dimension_semantics<parallel>, #tpu.dimension_semantics<parallel>, #tpu.dimension_semantics<arbitrary>], iteration_bounds = array<i64: 1, 1, 1>, scalar_prefetch = 0 : i64, scratch_operands = 1 : i64, tpu.core_type = #tpu.core_type<tc>, window_params = [{transform_indices = @transform_0, window_bounds = array<i64: 16, 256>}, {transform_indices = @transform_1, window_bounds = array<i64: 256, 256>}, {transform_indices = @transform_2, window_bounds = array<i64: 1, 256>}, {transform_indices = @transform_3, window_bounds = array<i64: 1, 256>}, {transform_indices = @transform_4, window_bounds = array<i64: 16, 256>}, {transform_indices = @transform_5, window_bounds = array<i64: 16, 256>}]} {
    %c0_i32 = arith.constant 0 : i32
    %0 = arith.cmpi eq, %arg2, %c0_i32 : i32
    %1 = arith.extui %0 : i1 to i32
    %c0_i32_0 = arith.constant 0 : i32
    %2 = arith.cmpi ne, %1, %c0_i32_0 : i32
    scf.if %2 {
      %cst_10 = arith.constant 0.000000e+00 : f32
      %12 = vector.broadcast %cst_10 : f32 to vector<16x256xf32>
      %c0_11 = arith.constant 0 : index
      %c0_12 = arith.constant 0 : index
      %13 = vector.load %arg9[%c0_11, %c0_12] : memref<16x256xf32, #tpu.memory_space<vmem>>, vector<16x256xf32>
      tpu.vector_store %arg9[%c0_11, %c0_12], %12 {strides = array<i32>} : memref<16x256xf32, #tpu.memory_space<vmem>>, vector<16x256xf32>,
    } else {
    }
    %c0 = arith.constant 0 : index
    %c0_1 = arith.constant 0 : index
    %3 = vector.load %arg9[%c0, %c0_1] : memref<16x256xf32, #tpu.memory_space<vmem>>, vector<16x256xf32>
    %c0_2 = arith.constant 0 : index
    %c0_3 = arith.constant 0 : index
    %4 = vector.load %arg3[%c0_2, %c0_3] : memref<16x256xbf16, #tpu.memory_space<vmem>>, vector<16x256xbf16>
    %c0_4 = arith.constant 0 : index
    %c0_5 = arith.constant 0 : index
    %5 = vector.load %arg4[%c0_4, %c0_5] : memref<256x256xbf16, #tpu.memory_space<vmem>>, vector<256x256xbf16>
    %cst = arith.constant dense<0.000000e+00> : vector<16x256xf32>
    %6 = tpu.matmul %4, %5, %cst {dimension_numbers = #tpu.dot_dimension_numbers<[1], [0], [0], [1], [0, 0, 1, 1], [], []>} : vector<16x256xbf16>, vector<256x256xbf16>, vector<16x256xf32> -> vector<16x256xf32>
    %7 = arith.addf %3, %6 : vector<16x256xf32>
    %c0_6 = arith.constant 0 : index
    %c0_7 = arith.constant 0 : index
    %8 = vector.load %arg9[%c0_6, %c0_7] : memref<16x256xf32, #tpu.memory_space<vmem>>, vector<16x256xf32>
    tpu.vector_store %arg9[%c0_6, %c0_7], %7 {strides = array<i32>} : memref<16x256xf32, #tpu.memory_space<vmem>>, vector<16x256xf32>,
    %c0_i32_8 = arith.constant 0 : i32
    %9 = arith.cmpi eq, %arg2, %c0_i32_8 : i32
    %10 = arith.extui %9 : i1 to i32
    %c0_i32_9 = arith.constant 0 : i32
    %11 = arith.cmpi ne, %10, %c0_i32_9 : i32
    scf.if %11 {
      %c0_10 = arith.constant 0 : index
      %c0_11 = arith.constant 0 : index
      %12 = vector.load %arg9[%c0_10, %c0_11] : memref<16x256xf32, #tpu.memory_space<vmem>>, vector<16x256xf32>
      %c0_12 = arith.constant 0 : index
      %c0_13 = arith.constant 0 : index
      %13 = vector.load %arg5[%c0_12, %c0_13] : memref<1x256xf32, #tpu.memory_space<vmem>>, vector<1x256xf32>
      %14 = vector.broadcast %13 : vector<1x256xf32> to vector<16x256xf32>
      %15 = arith.mulf %12, %14 : vector<16x256xf32>
      %c0_14 = arith.constant 0 : index
      %c0_15 = arith.constant 0 : index
      %16 = vector.load %arg6[%c0_14, %c0_15] : memref<1x256xf32, #tpu.memory_space<vmem>>, vector<1x256xf32>
      %17 = vector.broadcast %16 : vector<1x256xf32> to vector<16x256xf32>
      %18 = arith.addf %15, %17 : vector<16x256xf32>
      %c0_16 = arith.constant 0 : index
      %c0_17 = arith.constant 0 : index
      %19 = vector.load %arg7[%c0_16, %c0_17] : memref<16x256xf32, #tpu.memory_space<vmem>>, vector<16x256xf32>
      %20 = arith.addf %18, %19 : vector<16x256xf32>
      %cst_18 = arith.constant 0.000000e+00 : f32
      %21 = vector.broadcast %cst_18 : f32 to vector<16x256xf32>
      %22 = arith.maximumf %20, %21 : vector<16x256xf32>
      %c0_19 = arith.constant 0 : index
      %c0_20 = arith.constant 0 : index
      %23 = vector.load %arg8[%c0_19, %c0_20] : memref<16x256xf32, #tpu.memory_space<vmem>>, vector<16x256xf32>
      tpu.vector_store %arg8[%c0_19, %c0_20], %22 {strides = array<i32>} : memref<16x256xf32, #tpu.memory_space<vmem>>, vector<16x256xf32>,
    } else {
    }
    return
  }
  func.func @transform_0(%arg0: i32, %arg1: i32, %arg2: i32) -> (i32, i32) {
    %c0_i32 = arith.constant 0 : i32
    return %arg0, %arg2 : i32, i32
  }
  func.func @transform_1(%arg0: i32, %arg1: i32, %arg2: i32) -> (i32, i32) {
    %c0_i32 = arith.constant 0 : i32
    return %arg2, %arg1 : i32, i32
  }
  func.func @transform_2(%arg0: i32, %arg1: i32, %arg2: i32) -> (i32, i32) {
    %c0_i32 = arith.constant 0 : i32
    %c0_i32_0 = arith.constant 0 : i32
    return %c0_i32, %arg1 : i32, i32
  }
  func.func @transform_3(%arg0: i32, %arg1: i32, %arg2: i32) -> (i32, i32) {
    %c0_i32 = arith.constant 0 : i32
    %c0_i32_0 = arith.constant 0 : i32
    return %c0_i32, %arg1 : i32, i32
  }
  func.func @transform_4(%arg0: i32, %arg1: i32, %arg2: i32) -> (i32, i32) {
    %c0_i32 = arith.constant 0 : i32
    return %arg0, %arg1 : i32, i32
  }
  func.func @transform_5(%arg0: i32, %arg1: i32, %arg2: i32) -> (i32, i32) {
    %c0_i32 = arith.constant 0 : i32
    return %arg0, %arg1 : i32, i32
  }
}

module attributes {stable_mosaic.version = 11 : i64} {
  func.func @_mm_bn_kernel(%arg0: i32, %arg1: i32, %arg2: i32, %arg3: memref<16x256xbf16, #tpu.memory_space<vmem>>, %arg4: memref<256x128xbf16, #tpu.memory_space<vmem>>, %arg5: memref<1x128xf32, #tpu.memory_space<vmem>>, %arg6: memref<1x128xf32, #tpu.memory_space<vmem>>, %arg7: memref<16x128xf32, #tpu.memory_space<vmem>>, %arg8: memref<16x128xf32, #tpu.memory_space<vmem>>) attributes {dimension_semantics = [#tpu.dimension_semantics<parallel>, #tpu.dimension_semantics<parallel>, #tpu.dimension_semantics<arbitrary>], iteration_bounds = array<i64: 1, 1, 1>, scalar_prefetch = 0 : i64, scratch_operands = 1 : i64, tpu.core_type = #tpu.core_type<tc>, window_params = [{transform_indices = @transform_0, window_bounds = array<i64: 16, 256>}, {transform_indices = @transform_1, window_bounds = array<i64: 256, 128>}, {transform_indices = @transform_2, window_bounds = array<i64: 1, 128>}, {transform_indices = @transform_3, window_bounds = array<i64: 1, 128>}, {transform_indices = @transform_4, window_bounds = array<i64: 16, 128>}]} {
    %c0_i32 = arith.constant 0 : i32
    %0 = arith.cmpi eq, %arg2, %c0_i32 : i32
    %1 = arith.extui %0 : i1 to i32
    %c0_i32_0 = arith.constant 0 : i32
    %2 = arith.cmpi ne, %1, %c0_i32_0 : i32
    scf.if %2 {
      %cst_10 = arith.constant 0.000000e+00 : f32
      %12 = vector.broadcast %cst_10 : f32 to vector<16x128xf32>
      %c0_11 = arith.constant 0 : index
      %c0_12 = arith.constant 0 : index
      %13 = vector.load %arg8[%c0_11, %c0_12] : memref<16x128xf32, #tpu.memory_space<vmem>>, vector<16x128xf32>
      tpu.vector_store %arg8[%c0_11, %c0_12], %12 {strides = array<i32>} : memref<16x128xf32, #tpu.memory_space<vmem>>, vector<16x128xf32>,
    } else {
    }
    %c0 = arith.constant 0 : index
    %c0_1 = arith.constant 0 : index
    %3 = vector.load %arg8[%c0, %c0_1] : memref<16x128xf32, #tpu.memory_space<vmem>>, vector<16x128xf32>
    %c0_2 = arith.constant 0 : index
    %c0_3 = arith.constant 0 : index
    %4 = vector.load %arg3[%c0_2, %c0_3] : memref<16x256xbf16, #tpu.memory_space<vmem>>, vector<16x256xbf16>
    %c0_4 = arith.constant 0 : index
    %c0_5 = arith.constant 0 : index
    %5 = vector.load %arg4[%c0_4, %c0_5] : memref<256x128xbf16, #tpu.memory_space<vmem>>, vector<256x128xbf16>
    %cst = arith.constant dense<0.000000e+00> : vector<16x128xf32>
    %6 = tpu.matmul %4, %5, %cst {dimension_numbers = #tpu.dot_dimension_numbers<[1], [0], [0], [1], [0, 0, 1, 1], [], []>} : vector<16x256xbf16>, vector<256x128xbf16>, vector<16x128xf32> -> vector<16x128xf32>
    %7 = arith.addf %3, %6 : vector<16x128xf32>
    %c0_6 = arith.constant 0 : index
    %c0_7 = arith.constant 0 : index
    %8 = vector.load %arg8[%c0_6, %c0_7] : memref<16x128xf32, #tpu.memory_space<vmem>>, vector<16x128xf32>
    tpu.vector_store %arg8[%c0_6, %c0_7], %7 {strides = array<i32>} : memref<16x128xf32, #tpu.memory_space<vmem>>, vector<16x128xf32>,
    %c0_i32_8 = arith.constant 0 : i32
    %9 = arith.cmpi eq, %arg2, %c0_i32_8 : i32
    %10 = arith.extui %9 : i1 to i32
    %c0_i32_9 = arith.constant 0 : i32
    %11 = arith.cmpi ne, %10, %c0_i32_9 : i32
    scf.if %11 {
      %c0_10 = arith.constant 0 : index
      %c0_11 = arith.constant 0 : index
      %12 = vector.load %arg8[%c0_10, %c0_11] : memref<16x128xf32, #tpu.memory_space<vmem>>, vector<16x128xf32>
      %c0_12 = arith.constant 0 : index
      %c0_13 = arith.constant 0 : index
      %13 = vector.load %arg5[%c0_12, %c0_13] : memref<1x128xf32, #tpu.memory_space<vmem>>, vector<1x128xf32>
      %14 = vector.broadcast %13 : vector<1x128xf32> to vector<16x128xf32>
      %15 = arith.mulf %12, %14 : vector<16x128xf32>
      %c0_14 = arith.constant 0 : index
      %c0_15 = arith.constant 0 : index
      %16 = vector.load %arg6[%c0_14, %c0_15] : memref<1x128xf32, #tpu.memory_space<vmem>>, vector<1x128xf32>
      %17 = vector.broadcast %16 : vector<1x128xf32> to vector<16x128xf32>
      %18 = arith.addf %15, %17 : vector<16x128xf32>
      %cst_16 = arith.constant 0.000000e+00 : f32
      %19 = vector.broadcast %cst_16 : f32 to vector<16x128xf32>
      %20 = arith.maximumf %18, %19 : vector<16x128xf32>
      %c0_17 = arith.constant 0 : index
      %c0_18 = arith.constant 0 : index
      %21 = vector.load %arg7[%c0_17, %c0_18] : memref<16x128xf32, #tpu.memory_space<vmem>>, vector<16x128xf32>
      tpu.vector_store %arg7[%c0_17, %c0_18], %20 {strides = array<i32>} : memref<16x128xf32, #tpu.memory_space<vmem>>, vector<16x128xf32>,
    } else {
    }
    return
  }
  func.func @transform_0(%arg0: i32, %arg1: i32, %arg2: i32) -> (i32, i32) {
    %c0_i32 = arith.constant 0 : i32
    return %arg0, %arg2 : i32, i32
  }
  func.func @transform_1(%arg0: i32, %arg1: i32, %arg2: i32) -> (i32, i32) {
    %c0_i32 = arith.constant 0 : i32
    return %arg2, %arg1 : i32, i32
  }
  func.func @transform_2(%arg0: i32, %arg1: i32, %arg2: i32) -> (i32, i32) {
    %c0_i32 = arith.constant 0 : i32
    %c0_i32_0 = arith.constant 0 : i32
    return %c0_i32, %arg1 : i32, i32
  }
  func.func @transform_3(%arg0: i32, %arg1: i32, %arg2: i32) -> (i32, i32) {
    %c0_i32 = arith.constant 0 : i32
    %c0_i32_0 = arith.constant 0 : i32
    return %c0_i32, %arg1 : i32, i32
  }
  func.func @transform_4(%arg0: i32, %arg1: i32, %arg2: i32) -> (i32, i32) {
    %c0_i32 = arith.constant 0 : i32
    return %arg0, %arg1 : i32, i32
  }
}

module attributes {stable_mosaic.version = 11 : i64} {
  func.func @_mm_bn_res_relu_kernel(%arg0: i32, %arg1: i32, %arg2: i32, %arg3: memref<16x128xbf16, #tpu.memory_space<vmem>>, %arg4: memref<128x256xbf16, #tpu.memory_space<vmem>>, %arg5: memref<1x256xf32, #tpu.memory_space<vmem>>, %arg6: memref<1x256xf32, #tpu.memory_space<vmem>>, %arg7: memref<16x256xf32, #tpu.memory_space<vmem>>, %arg8: memref<16x256xf32, #tpu.memory_space<vmem>>, %arg9: memref<16x256xf32, #tpu.memory_space<vmem>>) attributes {dimension_semantics = [#tpu.dimension_semantics<parallel>, #tpu.dimension_semantics<parallel>, #tpu.dimension_semantics<arbitrary>], iteration_bounds = array<i64: 1, 1, 1>, scalar_prefetch = 0 : i64, scratch_operands = 1 : i64, tpu.core_type = #tpu.core_type<tc>, window_params = [{transform_indices = @transform_0, window_bounds = array<i64: 16, 128>}, {transform_indices = @transform_1, window_bounds = array<i64: 128, 256>}, {transform_indices = @transform_2, window_bounds = array<i64: 1, 256>}, {transform_indices = @transform_3, window_bounds = array<i64: 1, 256>}, {transform_indices = @transform_4, window_bounds = array<i64: 16, 256>}, {transform_indices = @transform_5, window_bounds = array<i64: 16, 256>}]} {
    %c0_i32 = arith.constant 0 : i32
    %0 = arith.cmpi eq, %arg2, %c0_i32 : i32
    %1 = arith.extui %0 : i1 to i32
    %c0_i32_0 = arith.constant 0 : i32
    %2 = arith.cmpi ne, %1, %c0_i32_0 : i32
    scf.if %2 {
      %cst_10 = arith.constant 0.000000e+00 : f32
      %12 = vector.broadcast %cst_10 : f32 to vector<16x256xf32>
      %c0_11 = arith.constant 0 : index
      %c0_12 = arith.constant 0 : index
      %13 = vector.load %arg9[%c0_11, %c0_12] : memref<16x256xf32, #tpu.memory_space<vmem>>, vector<16x256xf32>
      tpu.vector_store %arg9[%c0_11, %c0_12], %12 {strides = array<i32>} : memref<16x256xf32, #tpu.memory_space<vmem>>, vector<16x256xf32>,
    } else {
    }
    %c0 = arith.constant 0 : index
    %c0_1 = arith.constant 0 : index
    %3 = vector.load %arg9[%c0, %c0_1] : memref<16x256xf32, #tpu.memory_space<vmem>>, vector<16x256xf32>
    %c0_2 = arith.constant 0 : index
    %c0_3 = arith.constant 0 : index
    %4 = vector.load %arg3[%c0_2, %c0_3] : memref<16x128xbf16, #tpu.memory_space<vmem>>, vector<16x128xbf16>
    %c0_4 = arith.constant 0 : index
    %c0_5 = arith.constant 0 : index
    %5 = vector.load %arg4[%c0_4, %c0_5] : memref<128x256xbf16, #tpu.memory_space<vmem>>, vector<128x256xbf16>
    %cst = arith.constant dense<0.000000e+00> : vector<16x256xf32>
    %6 = tpu.matmul %4, %5, %cst {dimension_numbers = #tpu.dot_dimension_numbers<[1], [0], [0], [1], [0, 0, 1, 1], [], []>} : vector<16x128xbf16>, vector<128x256xbf16>, vector<16x256xf32> -> vector<16x256xf32>
    %7 = arith.addf %3, %6 : vector<16x256xf32>
    %c0_6 = arith.constant 0 : index
    %c0_7 = arith.constant 0 : index
    %8 = vector.load %arg9[%c0_6, %c0_7] : memref<16x256xf32, #tpu.memory_space<vmem>>, vector<16x256xf32>
    tpu.vector_store %arg9[%c0_6, %c0_7], %7 {strides = array<i32>} : memref<16x256xf32, #tpu.memory_space<vmem>>, vector<16x256xf32>,
    %c0_i32_8 = arith.constant 0 : i32
    %9 = arith.cmpi eq, %arg2, %c0_i32_8 : i32
    %10 = arith.extui %9 : i1 to i32
    %c0_i32_9 = arith.constant 0 : i32
    %11 = arith.cmpi ne, %10, %c0_i32_9 : i32
    scf.if %11 {
      %c0_10 = arith.constant 0 : index
      %c0_11 = arith.constant 0 : index
      %12 = vector.load %arg9[%c0_10, %c0_11] : memref<16x256xf32, #tpu.memory_space<vmem>>, vector<16x256xf32>
      %c0_12 = arith.constant 0 : index
      %c0_13 = arith.constant 0 : index
      %13 = vector.load %arg5[%c0_12, %c0_13] : memref<1x256xf32, #tpu.memory_space<vmem>>, vector<1x256xf32>
      %14 = vector.broadcast %13 : vector<1x256xf32> to vector<16x256xf32>
      %15 = arith.mulf %12, %14 : vector<16x256xf32>
      %c0_14 = arith.constant 0 : index
      %c0_15 = arith.constant 0 : index
      %16 = vector.load %arg6[%c0_14, %c0_15] : memref<1x256xf32, #tpu.memory_space<vmem>>, vector<1x256xf32>
      %17 = vector.broadcast %16 : vector<1x256xf32> to vector<16x256xf32>
      %18 = arith.addf %15, %17 : vector<16x256xf32>
      %c0_16 = arith.constant 0 : index
      %c0_17 = arith.constant 0 : index
      %19 = vector.load %arg7[%c0_16, %c0_17] : memref<16x256xf32, #tpu.memory_space<vmem>>, vector<16x256xf32>
      %20 = arith.addf %18, %19 : vector<16x256xf32>
      %cst_18 = arith.constant 0.000000e+00 : f32
      %21 = vector.broadcast %cst_18 : f32 to vector<16x256xf32>
      %22 = arith.maximumf %20, %21 : vector<16x256xf32>
      %c0_19 = arith.constant 0 : index
      %c0_20 = arith.constant 0 : index
      %23 = vector.load %arg8[%c0_19, %c0_20] : memref<16x256xf32, #tpu.memory_space<vmem>>, vector<16x256xf32>
      tpu.vector_store %arg8[%c0_19, %c0_20], %22 {strides = array<i32>} : memref<16x256xf32, #tpu.memory_space<vmem>>, vector<16x256xf32>,
    } else {
    }
    return
  }
  func.func @transform_0(%arg0: i32, %arg1: i32, %arg2: i32) -> (i32, i32) {
    %c0_i32 = arith.constant 0 : i32
    return %arg0, %arg2 : i32, i32
  }
  func.func @transform_1(%arg0: i32, %arg1: i32, %arg2: i32) -> (i32, i32) {
    %c0_i32 = arith.constant 0 : i32
    return %arg2, %arg1 : i32, i32
  }
  func.func @transform_2(%arg0: i32, %arg1: i32, %arg2: i32) -> (i32, i32) {
    %c0_i32 = arith.constant 0 : i32
    %c0_i32_0 = arith.constant 0 : i32
    return %c0_i32, %arg1 : i32, i32
  }
  func.func @transform_3(%arg0: i32, %arg1: i32, %arg2: i32) -> (i32, i32) {
    %c0_i32 = arith.constant 0 : i32
    %c0_i32_0 = arith.constant 0 : i32
    return %c0_i32, %arg1 : i32, i32
  }
  func.func @transform_4(%arg0: i32, %arg1: i32, %arg2: i32) -> (i32, i32) {
    %c0_i32 = arith.constant 0 : i32
    return %arg0, %arg1 : i32, i32
  }
  func.func @transform_5(%arg0: i32, %arg1: i32, %arg2: i32) -> (i32, i32) {
    %c0_i32 = arith.constant 0 : i32
    return %arg0, %arg1 : i32, i32
  }
}

</mosaic_0001>

<bundles_post_ra>
// kernel: modified_resnet_forward.38
= control target key start
LH: loop header
LB: loop body
LE: loop exit
PB: predicated region body
PF: predicated region fallthrough
CT: control target
= control target key end

     0   :  { %s1921_s1 = inlined_call_operand.vmem [shape: bf16[128,128], index: 1, kind: input, shape index: {}]   ;;  %s1922_s0 = inlined_call_operand.vmem [shape: bf16[512,128], index: 0, kind: input, shape index: {}]   ;;  %s1923_s2 = inlined_call_operand.vmem [shape: f32[1,128], index: 2, kind: input, shape index: {}]   ;;  %s1924_s3 = inlined_call_operand.vmem [shape: f32[1,128], index: 3, kind: input, shape index: {}]   ;;  %s1925_s4 = inlined_call_operand.vmem [shape: f32[512,128], index: 4, kind: output, shape index: {}]  }
   0x1   :  { %v1406_v0 = vld [vmem:[%s1921_s1 + $0x38] sm:$0xff]   ;;  %v1407_v1 = vld [vmem:[%s1921_s1 + $0x30] sm:$0xff]   ;;  %v1408_v2 = vld [vmem:[%s1921_s1 + $0x28] sm:$0xff]  }
   0x2   :  { %1310 = vmatprep.subr.bf16.mxu0 %v1406_v0  ;;  %1390 = vmatprep.subr.bf16.mxu1 %v1406_v0  ;;  %v1409_v3 = vld [vmem:[%s1921_s1 + $0x20] sm:$0xff]   ;;  %v1410_v6 = vld [vmem:[%s1921_s1 + $0x18] sm:$0xff]   ;;  %v1411_v7 = vld [vmem:[%s1921_s1 + $0x10] sm:$0xff]  }
   0x3   :  { %1311 = vmatpush3.bf16.msra.mxu0 %v1406_v0  ;;  %1398 = vmatpush3.bf16.msra.mxu1 %v1406_v0  ;;  %v1414_v4 = vld [vmem:[%s1922_s0] sm:$0xff]   ;;  %v1412_v8 = vld [vmem:[%s1921_s1 + $0x8] sm:$0xff]   ;;  %v1418_v12 = vld [vmem:[%s1922_s0 + $0x10] sm:$0xff]  }
   0x4   :  { %1312 = vmatprep.subr.bf16.mxu0 %v1407_v1  ;;  %1391 = vmatprep.subr.bf16.mxu1 %v1407_v1  ;;  %v1415_v5 = vld [vmem:[%s1922_s0 + $0x80] sm:$0xff]   ;;  %v1416_v10 = vld [vmem:[%s1922_s0 + $0x8] sm:$0xff]   ;;  %v1419_v13 = vld [vmem:[%s1922_s0 + $0x90] sm:$0xff]  }
   0x5   :  { %1326 = vmatprep.mubr.bf16.mxu0 %v1414_v4  ;;  %1358 = vmatprep.mubr.bf16.mxu1 %v1415_v5  ;;  %v1413_v9 = vld [vmem:[%s1921_s1] sm:$0xff]   ;;  %v1417_v11 = vld [vmem:[%s1922_s0 + $0x88] sm:$0xff]   ;;  %v1420_v14 = vld [vmem:[%s1922_s0 + $0x18] sm:$0xff]  }
   0x6   :  { %v1421_v15 = vld [vmem:[%s1922_s0 + $0x98] sm:$0xff]   ;;  %v1422_v16 = vld [vmem:[%s1922_s0 + $0x20] sm:$0xff]   ;;  %v1424_v18 = vld [vmem:[%s1922_s0 + $0x28] sm:$0xff]  }
   0x7   :  { %1313 = vmatpush3.bf16.msra.mxu0 %v1407_v1  ;;  %1399 = vmatpush3.bf16.msra.mxu1 %v1407_v1  ;;  %v1423_v17 = vld [vmem:[%s1922_s0 + $0xa0] sm:$0xff]   ;;  %v1425_v19 = vld [vmem:[%s1922_s0 + $0xa8] sm:$0xff]   ;;  %v1426_v20 = vld [vmem:[%s1922_s0 + $0x30] sm:$0xff]  }
   0x8   :  { %1314 = vmatprep.subr.bf16.mxu0 %v1408_v2  ;;  %1392 = vmatprep.subr.bf16.mxu1 %v1408_v2  ;;  %v1427_v21 = vld [vmem:[%s1922_s0 + $0xb0] sm:$0xff]   ;;  %v1428_v22 = vld [vmem:[%s1922_s0 + $0x38] sm:$0xff]   ;;  %v1430_v24 = vld [vmem:[%s1922_s0 + $0x40] sm:$0xff]  }
   0x9   :  { %v1429_v23 = vld [vmem:[%s1922_s0 + $0xb8] sm:$0xff]   ;;  %v1431_v25 = vld [vmem:[%s1922_s0 + $0xc0] sm:$0xff]   ;;  %v1432_v26 = vld [vmem:[%s1922_s0 + $0x48] sm:$0xff]  }
   0xa   :  { %v1433_v27 = vld [vmem:[%s1922_s0 + $0xc8] sm:$0xff]   ;;  %v1434_v28 = vld [vmem:[%s1922_s0 + $0x50] sm:$0xff]   ;;  %v1436_v30 = vld [vmem:[%s1922_s0 + $0x58] sm:$0xff]  }
   0xb   :  { %1315 = vmatpush3.bf16.msra.mxu0 %v1408_v2  ;;  %1400 = vmatpush3.bf16.msra.mxu1 %v1408_v2  ;;  %v1435_v29 = vld [vmem:[%s1922_s0 + $0xd0] sm:$0xff]   ;;  %v1437_v31 = vld [vmem:[%s1922_s0 + $0xd8] sm:$0xff]   ;;  %v1438_v32 = vld [vmem:[%s1922_s0 + $0x60] sm:$0xff]  }
   0xc   :  { %1316 = vmatprep.subr.bf16.mxu0 %v1409_v3  ;;  %1393 = vmatprep.subr.bf16.mxu1 %v1409_v3  ;;  %v1439_v33 = vld [vmem:[%s1922_s0 + $0xe0] sm:$0xff]   ;;  %v1440_v34 = vld [vmem:[%s1922_s0 + $0x68] sm:$0xff]   ;;  %v1442_v36 = vld [vmem:[%s1922_s0 + $0x70] sm:$0xff]  }
   0xd   :  { %v1441_v35 = vld [vmem:[%s1922_s0 + $0xe8] sm:$0xff]   ;;  %v1443_v37 = vld [vmem:[%s1922_s0 + $0xf0] sm:$0xff]   ;;  %v1444_v38 = vld [vmem:[%s1922_s0 + $0x78] sm:$0xff]  }
   0xe   :  { %v1445_v39 = vld [vmem:[%s1922_s0 + $0xf8] sm:$0xff]   ;;  %v1594_v40 = vld [vmem:[%s1923_s2] ss:$0 sm:$0xff] }
   0xf   :  { %1317 = vmatpush3.bf16.msra.mxu0 %v1409_v3  ;;  %1401 = vmatpush3.bf16.msra.mxu1 %v1409_v3  ;;  %v1599_v42 = vld [vmem:[%s1924_s3] ss:$0 sm:$0xff] }
  0x10   :  { %1318 = vmatprep.subr.bf16.mxu0 %v1410_v6  ;;  %1394 = vmatprep.subr.bf16.mxu1 %v1410_v6 }
  0x13   :  { %1319 = vmatpush3.bf16.msra.mxu0 %v1410_v6  ;;  %1402 = vmatpush3.bf16.msra.mxu1 %v1410_v6 }
  0x14   :  { %1320 = vmatprep.subr.bf16.mxu0 %v1411_v7  ;;  %1395 = vmatprep.subr.bf16.mxu1 %v1411_v7 }
  0x17   :  { %1321 = vmatpush3.bf16.msra.mxu0 %v1411_v7  ;;  %1403 = vmatpush3.bf16.msra.mxu1 %v1411_v7 }
  0x18   :  { %1322 = vmatprep.subr.bf16.mxu0 %v1412_v8  ;;  %1396 = vmatprep.subr.bf16.mxu1 %v1412_v8 }
  0x1b   :  { %1323 = vmatpush3.bf16.msra.mxu0 %v1412_v8  ;;  %1404 = vmatpush3.bf16.msra.mxu1 %v1412_v8 }
  0x1c   :  { %1324 = vmatprep.subr.bf16.mxu0 %v1413_v9  ;;  %1397 = vmatprep.subr.bf16.mxu1 %v1413_v9 }
  0x1f   :  { %1325 = vmatpush3.bf16.msra.mxu0 %v1413_v9  ;;  %1405 = vmatpush3.bf16.msra.mxu1 %v1413_v9 }
  0x22   :  { %1327 = vmatmul.mubr.bf16.vlgmr.msra.gmra.mxu0 %v1416_v10  ;;  %1359 = vmatmul.mubr.bf16.vlgmr.msra.gmra.mxu1 %v1417_v11 }
  0x23   :  { %1330 = vmatprep.mubr.bf16.mxu0 %v1418_v12  ;;  %1362 = vmatprep.mubr.bf16.mxu1 %v1419_v13 }
  0x2a   :  { %1331 = vmatmul.mubr.bf16.gmra.mxu0 %v1420_v14  ;;  %1363 = vmatmul.mubr.bf16.gmra.mxu1 %v1421_v15 }
  0x2b   :  { %1334 = vmatprep.mubr.bf16.mxu0 %v1422_v16  ;;  %1366 = vmatprep.mubr.bf16.mxu1 %v1423_v17 }
  0x32   :  { %1335 = vmatmul.mubr.bf16.gmra.mxu0 %v1424_v18  ;;  %1367 = vmatmul.mubr.bf16.gmra.mxu1 %v1425_v19 }
  0x33   :  { %1338 = vmatprep.mubr.bf16.mxu0 %v1426_v20  ;;  %1370 = vmatprep.mubr.bf16.mxu1 %v1427_v21 }
  0x3a   :  { %1339 = vmatmul.mubr.bf16.gmra.mxu0 %v1428_v22  ;;  %1371 = vmatmul.mubr.bf16.gmra.mxu1 %v1429_v23 }
  0x3b   :  { %1342 = vmatprep.mubr.bf16.mxu0 %v1430_v24  ;;  %1374 = vmatprep.mubr.bf16.mxu1 %v1431_v25 }
  0x42   :  { %1343 = vmatmul.mubr.bf16.gmra.mxu0 %v1432_v26  ;;  %1375 = vmatmul.mubr.bf16.gmra.mxu1 %v1433_v27 }
  0x43   :  { %1346 = vmatprep.mubr.bf16.mxu0 %v1434_v28  ;;  %1378 = vmatprep.mubr.bf16.mxu1 %v1435_v29 }
  0x4a   :  { %1347 = vmatmul.mubr.bf16.gmra.mxu0 %v1436_v30  ;;  %1379 = vmatmul.mubr.bf16.gmra.mxu1 %v1437_v31 }
  0x4b   :  { %1350 = vmatprep.mubr.bf16.mxu0 %v1438_v32  ;;  %1382 = vmatprep.mubr.bf16.mxu1 %v1439_v33 }
  0x52   :  { %1351 = vmatmul.mubr.bf16.gmra.mxu0 %v1440_v34  ;;  %1383 = vmatmul.mubr.bf16.gmra.mxu1 %v1441_v35 }
  0x53   :  { %1354 = vmatprep.mubr.bf16.mxu0 %v1442_v36  ;;  %1386 = vmatprep.mubr.bf16.mxu1 %v1443_v37 }
  0x5a   :  { %1355 = vmatmul.mubr.bf16.gmra.mxu0 %v1444_v38  ;;  %1387 = vmatmul.mubr.bf16.gmra.mxu1 %v1445_v39 }
  0xe2   :  { %v1328_v41 = vpop.f32.mrf.mxu0  ;;  %v1360_v43 = vpop.f32.mrf.mxu1 }
  0xe3   :  { %v963_v44 = vmul.f32 %v1328_v41, %v1594_v40  ;;  %v995_v45 = vmul.f32 %v1360_v43, %v1594_v40 }
  0xe4   :  { %v504_v46 = vpop.f32.mrf.mxu0  ;;  %v632_v47 = vpop.f32.mrf.mxu1 }
  0xe5   :  { %v1034_v48 = vadd.f32 %v1599_v42, %v963_v44  ;;  %v1066_v49 = vadd.f32 %v1599_v42, %v995_v45  ;;  %v961_v50 = vmul.f32 %v1594_v40, %v504_v46  ;;  %v993_v51 = vmul.f32 %v1594_v40, %v632_v47 }
  0xe6   :  { %v1329_v52 = vpop.f32.mrf.mxu0  ;;  %v1361_v53 = vpop.f32.mrf.mxu1 }
  0xe7   :  { %v1098_v54 = vmax.f32 %v1034_v48, 0.0  ;;  %v1130_v55 = vmax.f32 %v1066_v49, 0.0  ;;  %v1032_v56 = vadd.f32 %v1599_v42, %v961_v50  ;;  %v1064_v57 = vadd.f32 %v1599_v42, %v993_v51 }
  0xe8   :  { %v964_v58 = vmul.f32 %v1329_v52, %v1594_v40  ;;  %v996_v59 = vmul.f32 %v1361_v53, %v1594_v40  ;;  %v507_v60 = vpop.f32.mrf.mxu0  ;;  %v635_v61 = vpop.f32.mrf.mxu1 }
  0xe9   :  { %1162 = vst [vmem:[%s1925_s4 + $0x10] sm:$0xff] %v1098_v54  ;;  %1194 = vst [vmem:[%s1925_s4 + $0x110] sm:$0xff] %v1130_v55  ;;  %v1096_v62 = vmax.f32 %v1032_v56, 0.0  ;;  %v1128_v63 = vmax.f32 %v1064_v57, 0.0  ;;  %v962_v0 = vmul.f32 %v1594_v40, %v507_v60  ;;  %v994_v1 = vmul.f32 %v1594_v40, %v635_v61 }
  0xea   :  { %v1035_v2 = vadd.f32 %v1599_v42, %v964_v58  ;;  %v1067_v3 = vadd.f32 %v1599_v42, %v996_v59  ;;  %v1332_v4 = vpop.f32.mrf.mxu0  ;;  %v1364_v5 = vpop.f32.mrf.mxu1 }
  0xeb   :  { %1160 = vst [vmem:[%s1925_s4] sm:$0xff] %v1096_v62  ;;  %1192 = vst [vmem:[%s1925_s4 + $0x100] sm:$0xff] %v1128_v63  ;;  %v1033_v6 = vadd.f32 %v1599_v42, %v962_v0  ;;  %v1065_v7 = vadd.f32 %v1599_v42, %v994_v1  ;;  %v967_v8 = vmul.f32 %v1332_v4, %v1594_v40 }
  0xec   :  { %v999_v9 = vmul.f32 %v1364_v5, %v1594_v40  ;;  %v1099_v10 = vmax.f32 %v1035_v2, 0.0  ;;  %v1131_v11 = vmax.f32 %v1067_v3, 0.0  ;;  %v520_v12 = vpop.f32.mrf.mxu0  ;;  %v648_v13 = vpop.f32.mrf.mxu1 }
  0xed   :  { %v1097_v14 = vmax.f32 %v1033_v6, 0.0  ;;  %v1129_v15 = vmax.f32 %v1065_v7, 0.0  ;;  %v1038_v16 = vadd.f32 %v1599_v42, %v967_v8  ;;  %v965_v18 = vmul.f32 %v1594_v40, %v520_v12 }
  0xee   :  { %v1070_v17 = vadd.f32 %v1599_v42, %v999_v9  ;;  %1163 = vst [vmem:[%s1925_s4 + $0x18] sm:$0xff] %v1099_v10  ;;  %1195 = vst [vmem:[%s1925_s4 + $0x118] sm:$0xff] %v1131_v11  ;;  %v997_v19 = vmul.f32 %v1594_v40, %v648_v13  ;;  %v1333_v20 = vpop.f32.mrf.mxu0  ;;  %v1365_v21 = vpop.f32.mrf.mxu1 }
  0xef   :  { %1161 = vst [vmem:[%s1925_s4 + $0x8] sm:$0xff] %v1097_v14  ;;  %1193 = vst [vmem:[%s1925_s4 + $0x108] sm:$0xff] %v1129_v15  ;;  %v1102_v22 = vmax.f32 %v1038_v16, 0.0  ;;  %v968_v24 = vmul.f32 %v1333_v20, %v1594_v40  ;;  %v1000_v25 = vmul.f32 %v1365_v21, %v1594_v40  ;;  %v1036_v26 = vadd.f32 %v1599_v42, %v965_v18 }
  0xf0   :  { %v1134_v23 = vmax.f32 %v1070_v17, 0.0  ;;  %v1068_v27 = vadd.f32 %v1599_v42, %v997_v19  ;;  %v523_v28 = vpop.f32.mrf.mxu0  ;;  %v651_v29 = vpop.f32.mrf.mxu1 }
  0xf1   :  { %1166 = vst [vmem:[%s1925_s4 + $0x30] sm:$0xff] %v1102_v22  ;;  %v1039_v30 = vadd.f32 %v1599_v42, %v968_v24  ;;  %v1071_v31 = vadd.f32 %v1599_v42, %v1000_v25  ;;  %v966_v32 = vmul.f32 %v1594_v40, %v523_v28  ;;  %v998_v33 = vmul.f32 %v1594_v40, %v651_v29 }
  0xf2   :  { %1198 = vst [vmem:[%s1925_s4 + $0x130] sm:$0xff] %v1134_v23  ;;  %v1100_v34 = vmax.f32 %v1036_v26, 0.0  ;;  %v1132_v35 = vmax.f32 %v1068_v27, 0.0  ;;  %v1336_v36 = vpop.f32.mrf.mxu0  ;;  %v1368_v37 = vpop.f32.mrf.mxu1 }
  0xf3   :  { %v1103_v38 = vmax.f32 %v1039_v30, 0.0  ;;  %v1135_v39 = vmax.f32 %v1071_v31, 0.0  ;;  %v1037_v41 = vadd.f32 %v1599_v42, %v966_v32  ;;  %v1069_v43 = vadd.f32 %v1599_v42, %v998_v33 }
  0xf4   :  { %1164 = vst [vmem:[%s1925_s4 + $0x20] sm:$0xff] %v1100_v34  ;;  %1196 = vst [vmem:[%s1925_s4 + $0x120] sm:$0xff] %v1132_v35  ;;  %v971_v44 = vmul.f32 %v1336_v36, %v1594_v40  ;;  %v1003_v45 = vmul.f32 %v1368_v37, %v1594_v40  ;;  %v536_v46 = vpop.f32.mrf.mxu0  ;;  %v664_v47 = vpop.f32.mrf.mxu1 }
  0xf5   :  { %1167 = vst [vmem:[%s1925_s4 + $0x38] sm:$0xff] %v1103_v38  ;;  %1199 = vst [vmem:[%s1925_s4 + $0x138] sm:$0xff] %v1135_v39  ;;  %v1101_v48 = vmax.f32 %v1037_v41, 0.0  ;;  %v1133_v49 = vmax.f32 %v1069_v43, 0.0  ;;  %v969_v50 = vmul.f32 %v1594_v40, %v536_v46  ;;  %v1001_v51 = vmul.f32 %v1594_v40, %v664_v47 }
  0xf6   :  { %v1042_v52 = vadd.f32 %v1599_v42, %v971_v44  ;;  %v1074_v53 = vadd.f32 %v1599_v42, %v1003_v45  ;;  %v1337_v54 = vpop.f32.mrf.mxu0  ;;  %v1369_v55 = vpop.f32.mrf.mxu1 }
  0xf7   :  { %1165 = vst [vmem:[%s1925_s4 + $0x28] sm:$0xff] %v1101_v48  ;;  %1197 = vst [vmem:[%s1925_s4 + $0x128] sm:$0xff] %v1133_v49  ;;  %v1040_v56 = vadd.f32 %v1599_v42, %v969_v50  ;;  %v1072_v57 = vadd.f32 %v1599_v42, %v1001_v51  ;;  %v972_v58 = vmul.f32 %v1337_v54, %v1594_v40 }
  0xf8   :  { %v1004_v59 = vmul.f32 %v1369_v55, %v1594_v40  ;;  %v1106_v60 = vmax.f32 %v1042_v52, 0.0  ;;  %v1138_v61 = vmax.f32 %v1074_v53, 0.0  ;;  %v539_v62 = vpop.f32.mrf.mxu0  ;;  %v667_v63 = vpop.f32.mrf.mxu1 }
  0xf9   :  { %v1104_v0 = vmax.f32 %v1040_v56, 0.0  ;;  %v1136_v1 = vmax.f32 %v1072_v57, 0.0  ;;  %v1043_v2 = vadd.f32 %v1599_v42, %v972_v58  ;;  %v970_v4 = vmul.f32 %v1594_v40, %v539_v62 }
  0xfa   :  { %v1075_v3 = vadd.f32 %v1599_v42, %v1004_v59  ;;  %1170 = vst [vmem:[%s1925_s4 + $0x50] sm:$0xff] %v1106_v60  ;;  %1202 = vst [vmem:[%s1925_s4 + $0x150] sm:$0xff] %v1138_v61  ;;  %v1002_v5 = vmul.f32 %v1594_v40, %v667_v63  ;;  %v1340_v6 = vpop.f32.mrf.mxu0  ;;  %v1372_v7 = vpop.f32.mrf.mxu1 }
  0xfb   :  { %1168 = vst [vmem:[%s1925_s4 + $0x40] sm:$0xff] %v1104_v0  ;;  %1200 = vst [vmem:[%s1925_s4 + $0x140] sm:$0xff] %v1136_v1  ;;  %v1107_v8 = vmax.f32 %v1043_v2, 0.0  ;;  %v975_v10 = vmul.f32 %v1340_v6, %v1594_v40  ;;  %v1007_v11 = vmul.f32 %v1372_v7, %v1594_v40  ;;  %v1041_v12 = vadd.f32 %v1599_v42, %v970_v4 }
  0xfc   :  { %v1139_v9 = vmax.f32 %v1075_v3, 0.0  ;;  %v1073_v13 = vadd.f32 %v1599_v42, %v1002_v5  ;;  %v552_v14 = vpop.f32.mrf.mxu0  ;;  %v680_v15 = vpop.f32.mrf.mxu1 }
  0xfd   :  { %1171 = vst [vmem:[%s1925_s4 + $0x58] sm:$0xff] %v1107_v8  ;;  %v1046_v16 = vadd.f32 %v1599_v42, %v975_v10  ;;  %v1078_v17 = vadd.f32 %v1599_v42, %v1007_v11  ;;  %v973_v18 = vmul.f32 %v1594_v40, %v552_v14  ;;  %v1005_v19 = vmul.f32 %v1594_v40, %v680_v15 }
  0xfe   :  { %1203 = vst [vmem:[%s1925_s4 + $0x158] sm:$0xff] %v1139_v9  ;;  %v1105_v20 = vmax.f32 %v1041_v12, 0.0  ;;  %v1137_v21 = vmax.f32 %v1073_v13, 0.0  ;;  %v1341_v22 = vpop.f32.mrf.mxu0  ;;  %v1373_v23 = vpop.f32.mrf.mxu1 }
  0xff   :  { %v1110_v24 = vmax.f32 %v1046_v16, 0.0  ;;  %v1142_v25 = vmax.f32 %v1078_v17, 0.0  ;;  %v1044_v26 = vadd.f32 %v1599_v42, %v973_v18  ;;  %v1076_v27 = vadd.f32 %v1599_v42, %v1005_v19 }
 0x100   :  { %1169 = vst [vmem:[%s1925_s4 + $0x48] sm:$0xff] %v1105_v20  ;;  %1201 = vst [vmem:[%s1925_s4 + $0x148] sm:$0xff] %v1137_v21  ;;  %v976_v28 = vmul.f32 %v1341_v22, %v1594_v40  ;;  %v1008_v29 = vmul.f32 %v1373_v23, %v1594_v40  ;;  %v555_v30 = vpop.f32.mrf.mxu0  ;;  %v683_v31 = vpop.f32.mrf.mxu1 }
 0x101   :  { %1174 = vst [vmem:[%s1925_s4 + $0x70] sm:$0xff] %v1110_v24  ;;  %1206 = vst [vmem:[%s1925_s4 + $0x170] sm:$0xff] %v1142_v25  ;;  %v1108_v32 = vmax.f32 %v1044_v26, 0.0  ;;  %v1140_v33 = vmax.f32 %v1076_v27, 0.0  ;;  %v974_v34 = vmul.f32 %v1594_v40, %v555_v30  ;;  %v1006_v35 = vmul.f32 %v1594_v40, %v683_v31 }
 0x102   :  { %v1047_v36 = vadd.f32 %v1599_v42, %v976_v28  ;;  %v1079_v37 = vadd.f32 %v1599_v42, %v1008_v29  ;;  %v1344_v38 = vpop.f32.mrf.mxu0  ;;  %v1376_v39 = vpop.f32.mrf.mxu1 }
 0x103   :  { %1172 = vst [vmem:[%s1925_s4 + $0x60] sm:$0xff] %v1108_v32  ;;  %1204 = vst [vmem:[%s1925_s4 + $0x160] sm:$0xff] %v1140_v33  ;;  %v1045_v41 = vadd.f32 %v1599_v42, %v974_v34  ;;  %v1077_v43 = vadd.f32 %v1599_v42, %v1006_v35  ;;  %v979_v44 = vmul.f32 %v1344_v38, %v1594_v40 }
 0x104   :  { %v1011_v45 = vmul.f32 %v1376_v39, %v1594_v40  ;;  %v1111_v46 = vmax.f32 %v1047_v36, 0.0  ;;  %v1143_v47 = vmax.f32 %v1079_v37, 0.0  ;;  %v568_v48 = vpop.f32.mrf.mxu0  ;;  %v696_v49 = vpop.f32.mrf.mxu1 }
 0x105   :  { %v1109_v50 = vmax.f32 %v1045_v41, 0.0  ;;  %v1141_v51 = vmax.f32 %v1077_v43, 0.0  ;;  %v1050_v52 = vadd.f32 %v1599_v42, %v979_v44  ;;  %v977_v54 = vmul.f32 %v1594_v40, %v568_v48 }
 0x106   :  { %v1082_v53 = vadd.f32 %v1599_v42, %v1011_v45  ;;  %1175 = vst [vmem:[%s1925_s4 + $0x78] sm:$0xff] %v1111_v46  ;;  %1207 = vst [vmem:[%s1925_s4 + $0x178] sm:$0xff] %v1143_v47  ;;  %v1009_v55 = vmul.f32 %v1594_v40, %v696_v49  ;;  %v1345_v56 = vpop.f32.mrf.mxu0  ;;  %v1377_v57 = vpop.f32.mrf.mxu1 }
 0x107   :  { %1173 = vst [vmem:[%s1925_s4 + $0x68] sm:$0xff] %v1109_v50  ;;  %1205 = vst [vmem:[%s1925_s4 + $0x168] sm:$0xff] %v1141_v51  ;;  %v1114_v58 = vmax.f32 %v1050_v52, 0.0  ;;  %v980_v60 = vmul.f32 %v1345_v56, %v1594_v40  ;;  %v1012_v61 = vmul.f32 %v1377_v57, %v1594_v40  ;;  %v1048_v62 = vadd.f32 %v1599_v42, %v977_v54 }
 0x108   :  { %v1146_v59 = vmax.f32 %v1082_v53, 0.0  ;;  %v1080_v63 = vadd.f32 %v1599_v42, %v1009_v55  ;;  %v571_v0 = vpop.f32.mrf.mxu0  ;;  %v699_v1 = vpop.f32.mrf.mxu1 }
 0x109   :  { %1178 = vst [vmem:[%s1925_s4 + $0x90] sm:$0xff] %v1114_v58  ;;  %v1051_v2 = vadd.f32 %v1599_v42, %v980_v60  ;;  %v1083_v3 = vadd.f32 %v1599_v42, %v1012_v61  ;;  %v978_v4 = vmul.f32 %v1594_v40, %v571_v0  ;;  %v1010_v5 = vmul.f32 %v1594_v40, %v699_v1 }
 0x10a   :  { %1210 = vst [vmem:[%s1925_s4 + $0x190] sm:$0xff] %v1146_v59  ;;  %v1112_v6 = vmax.f32 %v1048_v62, 0.0  ;;  %v1144_v7 = vmax.f32 %v1080_v63, 0.0  ;;  %v1348_v8 = vpop.f32.mrf.mxu0  ;;  %v1380_v9 = vpop.f32.mrf.mxu1 }
 0x10b   :  { %v1115_v10 = vmax.f32 %v1051_v2, 0.0  ;;  %v1147_v11 = vmax.f32 %v1083_v3, 0.0  ;;  %v1049_v12 = vadd.f32 %v1599_v42, %v978_v4  ;;  %v1081_v13 = vadd.f32 %v1599_v42, %v1010_v5 }
 0x10c   :  { %1176 = vst [vmem:[%s1925_s4 + $0x80] sm:$0xff] %v1112_v6  ;;  %1208 = vst [vmem:[%s1925_s4 + $0x180] sm:$0xff] %v1144_v7  ;;  %v983_v14 = vmul.f32 %v1348_v8, %v1594_v40  ;;  %v1015_v15 = vmul.f32 %v1380_v9, %v1594_v40  ;;  %v584_v16 = vpop.f32.mrf.mxu0  ;;  %v712_v17 = vpop.f32.mrf.mxu1 }
 0x10d   :  { %1179 = vst [vmem:[%s1925_s4 + $0x98] sm:$0xff] %v1115_v10  ;;  %1211 = vst [vmem:[%s1925_s4 + $0x198] sm:$0xff] %v1147_v11  ;;  %v1113_v18 = vmax.f32 %v1049_v12, 0.0  ;;  %v1145_v19 = vmax.f32 %v1081_v13, 0.0  ;;  %v981_v20 = vmul.f32 %v1594_v40, %v584_v16  ;;  %v1013_v21 = vmul.f32 %v1594_v40, %v712_v17 }
 0x10e   :  { %v1054_v22 = vadd.f32 %v1599_v42, %v983_v14  ;;  %v1086_v23 = vadd.f32 %v1599_v42, %v1015_v15  ;;  %v1349_v24 = vpop.f32.mrf.mxu0  ;;  %v1381_v25 = vpop.f32.mrf.mxu1 }
 0x10f   :  { %1177 = vst [vmem:[%s1925_s4 + $0x88] sm:$0xff] %v1113_v18  ;;  %1209 = vst [vmem:[%s1925_s4 + $0x188] sm:$0xff] %v1145_v19  ;;  %v1052_v26 = vadd.f32 %v1599_v42, %v981_v20  ;;  %v1084_v27 = vadd.f32 %v1599_v42, %v1013_v21  ;;  %v984_v28 = vmul.f32 %v1349_v24, %v1594_v40 }
 0x110   :  { %v1016_v29 = vmul.f32 %v1381_v25, %v1594_v40  ;;  %v1118_v30 = vmax.f32 %v1054_v22, 0.0  ;;  %v1150_v31 = vmax.f32 %v1086_v23, 0.0  ;;  %v587_v32 = vpop.f32.mrf.mxu0  ;;  %v715_v33 = vpop.f32.mrf.mxu1 }
 0x111   :  { %v1116_v34 = vmax.f32 %v1052_v26, 0.0  ;;  %v1148_v35 = vmax.f32 %v1084_v27, 0.0  ;;  %v1055_v36 = vadd.f32 %v1599_v42, %v984_v28  ;;  %v982_v38 = vmul.f32 %v1594_v40, %v587_v32 }
 0x112   :  { %v1087_v37 = vadd.f32 %v1599_v42, %v1016_v29  ;;  %1182 = vst [vmem:[%s1925_s4 + $0xb0] sm:$0xff] %v1118_v30  ;;  %1214 = vst [vmem:[%s1925_s4 + $0x1b0] sm:$0xff] %v1150_v31  ;;  %v1014_v39 = vmul.f32 %v1594_v40, %v715_v33  ;;  %v1352_v41 = vpop.f32.mrf.mxu0  ;;  %v1384_v43 = vpop.f32.mrf.mxu1 }
 0x113   :  { %1180 = vst [vmem:[%s1925_s4 + $0xa0] sm:$0xff] %v1116_v34  ;;  %1212 = vst [vmem:[%s1925_s4 + $0x1a0] sm:$0xff] %v1148_v35  ;;  %v1119_v44 = vmax.f32 %v1055_v36, 0.0  ;;  %v987_v46 = vmul.f32 %v1352_v41, %v1594_v40  ;;  %v1019_v47 = vmul.f32 %v1384_v43, %v1594_v40  ;;  %v1053_v48 = vadd.f32 %v1599_v42, %v982_v38 }
 0x114   :  { %v1151_v45 = vmax.f32 %v1087_v37, 0.0  ;;  %v1085_v49 = vadd.f32 %v1599_v42, %v1014_v39  ;;  %v600_v50 = vpop.f32.mrf.mxu0  ;;  %v728_v51 = vpop.f32.mrf.mxu1 }
 0x115   :  { %1183 = vst [vmem:[%s1925_s4 + $0xb8] sm:$0xff] %v1119_v44  ;;  %v1058_v52 = vadd.f32 %v1599_v42, %v987_v46  ;;  %v1090_v53 = vadd.f32 %v1599_v42, %v1019_v47  ;;  %v985_v54 = vmul.f32 %v1594_v40, %v600_v50  ;;  %v1017_v55 = vmul.f32 %v1594_v40, %v728_v51 }
 0x116   :  { %1215 = vst [vmem:[%s1925_s4 + $0x1b8] sm:$0xff] %v1151_v45  ;;  %v1117_v56 = vmax.f32 %v1053_v48, 0.0  ;;  %v1149_v57 = vmax.f32 %v1085_v49, 0.0  ;;  %v1353_v58 = vpop.f32.mrf.mxu0  ;;  %v1385_v59 = vpop.f32.mrf.mxu1 }
 0x117   :  { %v1122_v60 = vmax.f32 %v1058_v52, 0.0  ;;  %v1154_v61 = vmax.f32 %v1090_v53, 0.0  ;;  %v1056_v62 = vadd.f32 %v1599_v42, %v985_v54  ;;  %v1088_v63 = vadd.f32 %v1599_v42, %v1017_v55 }
 0x118   :  { %1181 = vst [vmem:[%s1925_s4 + $0xa8] sm:$0xff] %v1117_v56  ;;  %1213 = vst [vmem:[%s1925_s4 + $0x1a8] sm:$0xff] %v1149_v57  ;;  %v988_v0 = vmul.f32 %v1353_v58, %v1594_v40  ;;  %v1020_v1 = vmul.f32 %v1385_v59, %v1594_v40  ;;  %v603_v2 = vpop.f32.mrf.mxu0  ;;  %v731_v3 = vpop.f32.mrf.mxu1 }
 0x119   :  { %1186 = vst [vmem:[%s1925_s4 + $0xd0] sm:$0xff] %v1122_v60  ;;  %1218 = vst [vmem:[%s1925_s4 + $0x1d0] sm:$0xff] %v1154_v61  ;;  %v1120_v4 = vmax.f32 %v1056_v62, 0.0  ;;  %v1152_v5 = vmax.f32 %v1088_v63, 0.0  ;;  %v986_v6 = vmul.f32 %v1594_v40, %v603_v2  ;;  %v1018_v7 = vmul.f32 %v1594_v40, %v731_v3 }
 0x11a   :  { %v1059_v8 = vadd.f32 %v1599_v42, %v988_v0  ;;  %v1091_v9 = vadd.f32 %v1599_v42, %v1020_v1  ;;  %v1356_v10 = vpop.f32.mrf.mxu0  ;;  %v1388_v11 = vpop.f32.mrf.mxu1 }
 0x11b   :  { %1184 = vst [vmem:[%s1925_s4 + $0xc0] sm:$0xff] %v1120_v4  ;;  %1216 = vst [vmem:[%s1925_s4 + $0x1c0] sm:$0xff] %v1152_v5  ;;  %v1057_v12 = vadd.f32 %v1599_v42, %v986_v6  ;;  %v1089_v13 = vadd.f32 %v1599_v42, %v1018_v7  ;;  %v991_v14 = vmul.f32 %v1356_v10, %v1594_v40 }
 0x11c   :  { %v1023_v15 = vmul.f32 %v1388_v11, %v1594_v40  ;;  %v1123_v16 = vmax.f32 %v1059_v8, 0.0  ;;  %v1155_v17 = vmax.f32 %v1091_v9, 0.0  ;;  %v616_v18 = vpop.f32.mrf.mxu0  ;;  %v744_v19 = vpop.f32.mrf.mxu1 }
 0x11d   :  { %v1121_v20 = vmax.f32 %v1057_v12, 0.0  ;;  %v1153_v21 = vmax.f32 %v1089_v13, 0.0  ;;  %v1062_v22 = vadd.f32 %v1599_v42, %v991_v14  ;;  %v989_v24 = vmul.f32 %v1594_v40, %v616_v18 }
 0x11e   :  { %v1094_v23 = vadd.f32 %v1599_v42, %v1023_v15  ;;  %1187 = vst [vmem:[%s1925_s4 + $0xd8] sm:$0xff] %v1123_v16  ;;  %1219 = vst [vmem:[%s1925_s4 + $0x1d8] sm:$0xff] %v1155_v17  ;;  %v1021_v25 = vmul.f32 %v1594_v40, %v744_v19  ;;  %v1357_v26 = vpop.f32.mrf.mxu0  ;;  %v1389_v27 = vpop.f32.mrf.mxu1 }
 0x11f   :  { %1185 = vst [vmem:[%s1925_s4 + $0xc8] sm:$0xff] %v1121_v20  ;;  %1217 = vst [vmem:[%s1925_s4 + $0x1c8] sm:$0xff] %v1153_v21  ;;  %v1126_v28 = vmax.f32 %v1062_v22, 0.0  ;;  %v992_v30 = vmul.f32 %v1357_v26, %v1594_v40  ;;  %v1024_v31 = vmul.f32 %v1389_v27, %v1594_v40  ;;  %v1060_v32 = vadd.f32 %v1599_v42, %v989_v24 }
 0x120   :  { %v1158_v29 = vmax.f32 %v1094_v23, 0.0  ;;  %v1092_v33 = vadd.f32 %v1599_v42, %v1021_v25  ;;  %v619_v34 = vpop.f32.mrf.mxu0  ;;  %v747_v35 = vpop.f32.mrf.mxu1 }
 0x121   :  { %1190 = vst [vmem:[%s1925_s4 + $0xf0] sm:$0xff] %v1126_v28  ;;  %v1063_v36 = vadd.f32 %v1599_v42, %v992_v30  ;;  %v1095_v37 = vadd.f32 %v1599_v42, %v1024_v31  ;;  %v990_v38 = vmul.f32 %v1594_v40, %v619_v34  ;;  %v1022_v39 = vmul.f32 %v1594_v40, %v747_v35 }
 0x122   :  { %1222 = vst [vmem:[%s1925_s4 + $0x1f0] sm:$0xff] %v1158_v29  ;;  %v1124_v41 = vmax.f32 %v1060_v32, 0.0  ;;  %v1156_v43 = vmax.f32 %v1092_v33, 0.0 }
 0x123   :  { %v1127_v44 = vmax.f32 %v1063_v36, 0.0  ;;  %v1159_v45 = vmax.f32 %v1095_v37, 0.0  ;;  %v1061_v46 = vadd.f32 %v1599_v42, %v990_v38  ;;  %v1093_v47 = vadd.f32 %v1599_v42, %v1022_v39 }
 0x124   :  { %1188 = vst [vmem:[%s1925_s4 + $0xe0] sm:$0xff] %v1124_v41  ;;  %1220 = vst [vmem:[%s1925_s4 + $0x1e0] sm:$0xff] %v1156_v43 }
 0x125   :  { %1191 = vst [vmem:[%s1925_s4 + $0xf8] sm:$0xff] %v1127_v44  ;;  %1223 = vst [vmem:[%s1925_s4 + $0x1f8] sm:$0xff] %v1159_v45  ;;  %v1125_v40 = vmax.f32 %v1061_v46, 0.0  ;;  %v1157_v48 = vmax.f32 %v1093_v47, 0.0 }
 0x127   :  { %1189 = vst [vmem:[%s1925_s4 + $0xe8] sm:$0xff] %v1125_v40  ;;  %1221 = vst [vmem:[%s1925_s4 + $0x1e8] sm:$0xff] %v1157_v48 }

// kernel: modified_resnet_forward.41
= control target key start
LH: loop header
LB: loop body
LE: loop exit
PB: predicated region body
PF: predicated region fallthrough
CT: control target
= control target key end

     0   :  { %s621_s1 = inlined_call_operand.vmem [shape: bf16[128,128], index: 1, kind: input, shape index: {}]   ;;  %s622_s0 = inlined_call_operand.vmem [shape: bf16[128,128], index: 0, kind: input, shape index: {}]   ;;  %s623_s2 = inlined_call_operand.vmem [shape: f32[1,128], index: 2, kind: input, shape index: {}]   ;;  %s624_s3 = inlined_call_operand.vmem [shape: f32[1,128], index: 3, kind: input, shape index: {}]   ;;  %s625_s4 = inlined_call_operand.vmem [shape: f32[128,128], index: 4, kind: output, shape index: {}]  }
   0x1   :  { %v478_v0 = vld [vmem:[%s621_s1 + $0x38] sm:$0xff]   ;;  %v479_v1 = vld [vmem:[%s621_s1 + $0x30] sm:$0xff]   ;;  %v480_v2 = vld [vmem:[%s621_s1 + $0x28] sm:$0xff]  }
   0x2   :  { %430 = vmatprep.subr.bf16.mxu0 %v478_v0  ;;  %462 = vmatprep.subr.bf16.mxu1 %v478_v0  ;;  %v481_v3 = vld [vmem:[%s621_s1 + $0x20] sm:$0xff]   ;;  %v482_v6 = vld [vmem:[%s621_s1 + $0x18] sm:$0xff]   ;;  %v483_v7 = vld [vmem:[%s621_s1 + $0x10] sm:$0xff]  }
   0x3   :  { %431 = vmatpush3.bf16.msra.mxu0 %v478_v0  ;;  %470 = vmatpush3.bf16.msra.mxu1 %v478_v0  ;;  %v486_v4 = vld [vmem:[%s622_s0] sm:$0xff]   ;;  %v484_v8 = vld [vmem:[%s621_s1 + $0x8] sm:$0xff]   ;;  %v490_v12 = vld [vmem:[%s622_s0 + $0x10] sm:$0xff]  }
   0x4   :  { %432 = vmatprep.subr.bf16.mxu0 %v479_v1  ;;  %463 = vmatprep.subr.bf16.mxu1 %v479_v1  ;;  %v487_v5 = vld [vmem:[%s622_s0 + $0x20] sm:$0xff]   ;;  %v488_v10 = vld [vmem:[%s622_s0 + $0x8] sm:$0xff]   ;;  %v491_v13 = vld [vmem:[%s622_s0 + $0x30] sm:$0xff]  }
   0x5   :  { %446 = vmatprep.mubr.bf16.mxu0 %v486_v4  ;;  %454 = vmatprep.mubr.bf16.mxu1 %v487_v5  ;;  %v485_v9 = vld [vmem:[%s621_s1] sm:$0xff]   ;;  %v489_v11 = vld [vmem:[%s622_s0 + $0x28] sm:$0xff]   ;;  %v492_v14 = vld [vmem:[%s622_s0 + $0x18] sm:$0xff]  }
   0x6   :  { %v493_v15 = vld [vmem:[%s622_s0 + $0x38] sm:$0xff]   ;;  %v412_v16 = vld [vmem:[%s623_s2] ss:$0 sm:$0xff] }
   0x7   :  { %433 = vmatpush3.bf16.msra.mxu0 %v479_v1  ;;  %471 = vmatpush3.bf16.msra.mxu1 %v479_v1  ;;  %v413_v18 = vld [vmem:[%s624_s3] ss:$0 sm:$0xff] }
   0x8   :  { %434 = vmatprep.subr.bf16.mxu0 %v480_v2  ;;  %464 = vmatprep.subr.bf16.mxu1 %v480_v2 }
   0xb   :  { %435 = vmatpush3.bf16.msra.mxu0 %v480_v2  ;;  %472 = vmatpush3.bf16.msra.mxu1 %v480_v2 }
   0xc   :  { %436 = vmatprep.subr.bf16.mxu0 %v481_v3  ;;  %465 = vmatprep.subr.bf16.mxu1 %v481_v3 }
   0xf   :  { %437 = vmatpush3.bf16.msra.mxu0 %v481_v3  ;;  %473 = vmatpush3.bf16.msra.mxu1 %v481_v3 }
  0x10   :  { %438 = vmatprep.subr.bf16.mxu0 %v482_v6  ;;  %466 = vmatprep.subr.bf16.mxu1 %v482_v6 }
  0x13   :  { %439 = vmatpush3.bf16.msra.mxu0 %v482_v6  ;;  %474 = vmatpush3.bf16.msra.mxu1 %v482_v6 }
  0x14   :  { %440 = vmatprep.subr.bf16.mxu0 %v483_v7  ;;  %467 = vmatprep.subr.bf16.mxu1 %v483_v7 }
  0x17   :  { %441 = vmatpush3.bf16.msra.mxu0 %v483_v7  ;;  %475 = vmatpush3.bf16.msra.mxu1 %v483_v7 }
  0x18   :  { %442 = vmatprep.subr.bf16.mxu0 %v484_v8  ;;  %468 = vmatprep.subr.bf16.mxu1 %v484_v8 }
  0x1b   :  { %443 = vmatpush3.bf16.msra.mxu0 %v484_v8  ;;  %476 = vmatpush3.bf16.msra.mxu1 %v484_v8 }
  0x1c   :  { %444 = vmatprep.subr.bf16.mxu0 %v485_v9  ;;  %469 = vmatprep.subr.bf16.mxu1 %v485_v9 }
  0x1f   :  { %445 = vmatpush3.bf16.msra.mxu0 %v485_v9  ;;  %477 = vmatpush3.bf16.msra.mxu1 %v485_v9 }
  0x22   :  { %447 = vmatmul.mubr.bf16.vlgmr.msra.gmra.mxu0 %v488_v10  ;;  %455 = vmatmul.mubr.bf16.vlgmr.msra.gmra.mxu1 %v489_v11 }
  0x23   :  { %450 = vmatprep.mubr.bf16.mxu0 %v490_v12  ;;  %458 = vmatprep.mubr.bf16.mxu1 %v491_v13 }
  0x2a   :  { %451 = vmatmul.mubr.bf16.gmra.mxu0 %v492_v14  ;;  %459 = vmatmul.mubr.bf16.gmra.mxu1 %v493_v15 }
  0xe2   :  { %v448_v17 = vpop.f32.mrf.mxu0  ;;  %v456_v19 = vpop.f32.mrf.mxu1 }
  0xe3   :  { %v339_v20 = vmul.f32 %v448_v17, %v412_v16  ;;  %v347_v21 = vmul.f32 %v456_v19, %v412_v16 }
  0xe4   :  { %v216_v22 = vpop.f32.mrf.mxu0  ;;  %v248_v23 = vpop.f32.mrf.mxu1 }
  0xe5   :  { %v362_v24 = vadd.f32 %v413_v18, %v339_v20  ;;  %v370_v25 = vadd.f32 %v413_v18, %v347_v21  ;;  %v337_v26 = vmul.f32 %v412_v16, %v216_v22  ;;  %v345_v27 = vmul.f32 %v412_v16, %v248_v23 }
  0xe6   :  { %v449_v28 = vpop.f32.mrf.mxu0  ;;  %v457_v29 = vpop.f32.mrf.mxu1 }
  0xe7   :  { %378 = vst [vmem:[%s625_s4 + $0x10] sm:$0xff] %v362_v24  ;;  %386 = vst [vmem:[%s625_s4 + $0x50] sm:$0xff] %v370_v25  ;;  %v360_v30 = vadd.f32 %v413_v18, %v337_v26  ;;  %v368_v31 = vadd.f32 %v413_v18, %v345_v27  ;;  %v340_v32 = vmul.f32 %v449_v28, %v412_v16 }
  0xe8   :  { %v348_v33 = vmul.f32 %v457_v29, %v412_v16  ;;  %v219_v34 = vpop.f32.mrf.mxu0  ;;  %v251_v35 = vpop.f32.mrf.mxu1 }
  0xe9   :  { %376 = vst [vmem:[%s625_s4] sm:$0xff] %v360_v30  ;;  %384 = vst [vmem:[%s625_s4 + $0x40] sm:$0xff] %v368_v31  ;;  %v363_v36 = vadd.f32 %v413_v18, %v340_v32  ;;  %v338_v38 = vmul.f32 %v412_v16, %v219_v34  ;;  %v346_v39 = vmul.f32 %v412_v16, %v251_v35 }
  0xea   :  { %v371_v37 = vadd.f32 %v413_v18, %v348_v33  ;;  %v452_v40 = vpop.f32.mrf.mxu0  ;;  %v460_v41 = vpop.f32.mrf.mxu1 }
  0xeb   :  { %379 = vst [vmem:[%s625_s4 + $0x18] sm:$0xff] %v363_v36  ;;  %v361_v42 = vadd.f32 %v413_v18, %v338_v38  ;;  %v369_v43 = vadd.f32 %v413_v18, %v346_v39  ;;  %v343_v44 = vmul.f32 %v452_v40, %v412_v16  ;;  %v351_v45 = vmul.f32 %v460_v41, %v412_v16 }
  0xec   :  { %387 = vst [vmem:[%s625_s4 + $0x58] sm:$0xff] %v371_v37  ;;  %v232_v46 = vpop.f32.mrf.mxu0  ;;  %v264_v47 = vpop.f32.mrf.mxu1 }
  0xed   :  { %377 = vst [vmem:[%s625_s4 + $0x8] sm:$0xff] %v361_v42  ;;  %385 = vst [vmem:[%s625_s4 + $0x48] sm:$0xff] %v369_v43  ;;  %v366_v48 = vadd.f32 %v413_v18, %v343_v44  ;;  %v374_v49 = vadd.f32 %v413_v18, %v351_v45  ;;  %v341_v50 = vmul.f32 %v412_v16, %v232_v46 }
  0xee   :  { %v349_v51 = vmul.f32 %v412_v16, %v264_v47  ;;  %v453_v52 = vpop.f32.mrf.mxu0  ;;  %v461_v53 = vpop.f32.mrf.mxu1 }
  0xef   :  { %382 = vst [vmem:[%s625_s4 + $0x30] sm:$0xff] %v366_v48  ;;  %390 = vst [vmem:[%s625_s4 + $0x70] sm:$0xff] %v374_v49  ;;  %v364_v54 = vadd.f32 %v413_v18, %v341_v50  ;;  %v344_v56 = vmul.f32 %v453_v52, %v412_v16  ;;  %v352_v57 = vmul.f32 %v461_v53, %v412_v16 }
  0xf0   :  { %v372_v55 = vadd.f32 %v413_v18, %v349_v51  ;;  %v235_v58 = vpop.f32.mrf.mxu0  ;;  %v267_v59 = vpop.f32.mrf.mxu1 }
  0xf1   :  { %380 = vst [vmem:[%s625_s4 + $0x20] sm:$0xff] %v364_v54  ;;  %v367_v60 = vadd.f32 %v413_v18, %v344_v56  ;;  %v375_v61 = vadd.f32 %v413_v18, %v352_v57  ;;  %v342_v62 = vmul.f32 %v412_v16, %v235_v58  ;;  %v350_v63 = vmul.f32 %v412_v16, %v267_v59 }
  0xf2   :  { %388 = vst [vmem:[%s625_s4 + $0x60] sm:$0xff] %v372_v55 }
  0xf3   :  { %383 = vst [vmem:[%s625_s4 + $0x38] sm:$0xff] %v367_v60  ;;  %391 = vst [vmem:[%s625_s4 + $0x78] sm:$0xff] %v375_v61  ;;  %v365_v0 = vadd.f32 %v413_v18, %v342_v62  ;;  %v373_v1 = vadd.f32 %v413_v18, %v350_v63 }
  0xf5   :  { %381 = vst [vmem:[%s625_s4 + $0x28] sm:$0xff] %v365_v0  ;;  %389 = vst [vmem:[%s625_s4 + $0x68] sm:$0xff] %v373_v1 }

// kernel: modified_resnet_forward.42
= control target key start
LH: loop header
LB: loop body
LE: loop exit
PB: predicated region body
PF: predicated region fallthrough
CT: control target
= control target key end

     0   :  { %s673_s1 = inlined_call_operand.vmem [shape: bf16[128,128], index: 1, kind: input, shape index: {}]   ;;  %s674_s0 = inlined_call_operand.vmem [shape: bf16[128,128], index: 0, kind: input, shape index: {}]   ;;  %s675_s2 = inlined_call_operand.vmem [shape: f32[1,128], index: 2, kind: input, shape index: {}]   ;;  %s676_s3 = inlined_call_operand.vmem [shape: f32[1,128], index: 3, kind: input, shape index: {}]   ;;  %s677_s4 = inlined_call_operand.vmem [shape: f32[128,128], index: 4, kind: output, shape index: {}]  }
   0x1   :  { %v494_v0 = vld [vmem:[%s673_s1 + $0x38] sm:$0xff]   ;;  %v495_v1 = vld [vmem:[%s673_s1 + $0x30] sm:$0xff]   ;;  %v496_v2 = vld [vmem:[%s673_s1 + $0x28] sm:$0xff]  }
   0x2   :  { %446 = vmatprep.subr.bf16.mxu0 %v494_v0  ;;  %478 = vmatprep.subr.bf16.mxu1 %v494_v0  ;;  %v497_v3 = vld [vmem:[%s673_s1 + $0x20] sm:$0xff]   ;;  %v498_v6 = vld [vmem:[%s673_s1 + $0x18] sm:$0xff]   ;;  %v499_v7 = vld [vmem:[%s673_s1 + $0x10] sm:$0xff]  }
   0x3   :  { %447 = vmatpush3.bf16.msra.mxu0 %v494_v0  ;;  %486 = vmatpush3.bf16.msra.mxu1 %v494_v0  ;;  %v502_v4 = vld [vmem:[%s674_s0] sm:$0xff]   ;;  %v500_v8 = vld [vmem:[%s673_s1 + $0x8] sm:$0xff]   ;;  %v506_v12 = vld [vmem:[%s674_s0 + $0x10] sm:$0xff]  }
   0x4   :  { %448 = vmatprep.subr.bf16.mxu0 %v495_v1  ;;  %479 = vmatprep.subr.bf16.mxu1 %v495_v1  ;;  %v503_v5 = vld [vmem:[%s674_s0 + $0x20] sm:$0xff]   ;;  %v504_v10 = vld [vmem:[%s674_s0 + $0x8] sm:$0xff]   ;;  %v507_v13 = vld [vmem:[%s674_s0 + $0x30] sm:$0xff]  }
   0x5   :  { %462 = vmatprep.mubr.bf16.mxu0 %v502_v4  ;;  %470 = vmatprep.mubr.bf16.mxu1 %v503_v5  ;;  %v501_v9 = vld [vmem:[%s673_s1] sm:$0xff]   ;;  %v505_v11 = vld [vmem:[%s674_s0 + $0x28] sm:$0xff]   ;;  %v508_v14 = vld [vmem:[%s674_s0 + $0x18] sm:$0xff]  }
   0x6   :  { %v509_v15 = vld [vmem:[%s674_s0 + $0x38] sm:$0xff]   ;;  %v586_v16 = vld [vmem:[%s675_s2] ss:$0 sm:$0xff] }
   0x7   :  { %449 = vmatpush3.bf16.msra.mxu0 %v495_v1  ;;  %487 = vmatpush3.bf16.msra.mxu1 %v495_v1  ;;  %v591_v18 = vld [vmem:[%s676_s3] ss:$0 sm:$0xff] }
   0x8   :  { %450 = vmatprep.subr.bf16.mxu0 %v496_v2  ;;  %480 = vmatprep.subr.bf16.mxu1 %v496_v2 }
   0xb   :  { %451 = vmatpush3.bf16.msra.mxu0 %v496_v2  ;;  %488 = vmatpush3.bf16.msra.mxu1 %v496_v2 }
   0xc   :  { %452 = vmatprep.subr.bf16.mxu0 %v497_v3  ;;  %481 = vmatprep.subr.bf16.mxu1 %v497_v3 }
   0xf   :  { %453 = vmatpush3.bf16.msra.mxu0 %v497_v3  ;;  %489 = vmatpush3.bf16.msra.mxu1 %v497_v3 }
  0x10   :  { %454 = vmatprep.subr.bf16.mxu0 %v498_v6  ;;  %482 = vmatprep.subr.bf16.mxu1 %v498_v6 }
  0x13   :  { %455 = vmatpush3.bf16.msra.mxu0 %v498_v6  ;;  %490 = vmatpush3.bf16.msra.mxu1 %v498_v6 }
  0x14   :  { %456 = vmatprep.subr.bf16.mxu0 %v499_v7  ;;  %483 = vmatprep.subr.bf16.mxu1 %v499_v7 }
  0x17   :  { %457 = vmatpush3.bf16.msra.mxu0 %v499_v7  ;;  %491 = vmatpush3.bf16.msra.mxu1 %v499_v7 }
  0x18   :  { %458 = vmatprep.subr.bf16.mxu0 %v500_v8  ;;  %484 = vmatprep.subr.bf16.mxu1 %v500_v8 }
  0x1b   :  { %459 = vmatpush3.bf16.msra.mxu0 %v500_v8  ;;  %492 = vmatpush3.bf16.msra.mxu1 %v500_v8 }
  0x1c   :  { %460 = vmatprep.subr.bf16.mxu0 %v501_v9  ;;  %485 = vmatprep.subr.bf16.mxu1 %v501_v9 }
  0x1f   :  { %461 = vmatpush3.bf16.msra.mxu0 %v501_v9  ;;  %493 = vmatpush3.bf16.msra.mxu1 %v501_v9 }
  0x22   :  { %463 = vmatmul.mubr.bf16.vlgmr.msra.gmra.mxu0 %v504_v10  ;;  %471 = vmatmul.mubr.bf16.vlgmr.msra.gmra.mxu1 %v505_v11 }
  0x23   :  { %466 = vmatprep.mubr.bf16.mxu0 %v506_v12  ;;  %474 = vmatprep.mubr.bf16.mxu1 %v507_v13 }
  0x2a   :  { %467 = vmatmul.mubr.bf16.gmra.mxu0 %v508_v14  ;;  %475 = vmatmul.mubr.bf16.gmra.mxu1 %v509_v15 }
  0xe2   :  { %v464_v17 = vpop.f32.mrf.mxu0  ;;  %v472_v19 = vpop.f32.mrf.mxu1 }
  0xe3   :  { %v339_v20 = vmul.f32 %v464_v17, %v586_v16  ;;  %v347_v21 = vmul.f32 %v472_v19, %v586_v16 }
  0xe4   :  { %v216_v22 = vpop.f32.mrf.mxu0  ;;  %v248_v23 = vpop.f32.mrf.mxu1 }
  0xe5   :  { %v362_v24 = vadd.f32 %v591_v18, %v339_v20  ;;  %v370_v25 = vadd.f32 %v591_v18, %v347_v21  ;;  %v337_v26 = vmul.f32 %v586_v16, %v216_v22  ;;  %v345_v27 = vmul.f32 %v586_v16, %v248_v23 }
  0xe6   :  { %v465_v28 = vpop.f32.mrf.mxu0  ;;  %v473_v29 = vpop.f32.mrf.mxu1 }
  0xe7   :  { %v378_v30 = vmax.f32 %v362_v24, 0.0  ;;  %v386_v31 = vmax.f32 %v370_v25, 0.0  ;;  %v360_v32 = vadd.f32 %v591_v18, %v337_v26  ;;  %v368_v33 = vadd.f32 %v591_v18, %v345_v27 }
  0xe8   :  { %v340_v34 = vmul.f32 %v465_v28, %v586_v16  ;;  %v348_v35 = vmul.f32 %v473_v29, %v586_v16  ;;  %v219_v36 = vpop.f32.mrf.mxu0  ;;  %v251_v37 = vpop.f32.mrf.mxu1 }
  0xe9   :  { %394 = vst [vmem:[%s677_s4 + $0x10] sm:$0xff] %v378_v30  ;;  %402 = vst [vmem:[%s677_s4 + $0x50] sm:$0xff] %v386_v31  ;;  %v376_v38 = vmax.f32 %v360_v32, 0.0  ;;  %v384_v39 = vmax.f32 %v368_v33, 0.0  ;;  %v338_v40 = vmul.f32 %v586_v16, %v219_v36  ;;  %v346_v41 = vmul.f32 %v586_v16, %v251_v37 }
  0xea   :  { %v363_v42 = vadd.f32 %v591_v18, %v340_v34  ;;  %v371_v43 = vadd.f32 %v591_v18, %v348_v35  ;;  %v468_v44 = vpop.f32.mrf.mxu0  ;;  %v476_v45 = vpop.f32.mrf.mxu1 }
  0xeb   :  { %392 = vst [vmem:[%s677_s4] sm:$0xff] %v376_v38  ;;  %400 = vst [vmem:[%s677_s4 + $0x40] sm:$0xff] %v384_v39  ;;  %v361_v46 = vadd.f32 %v591_v18, %v338_v40  ;;  %v369_v47 = vadd.f32 %v591_v18, %v346_v41  ;;  %v343_v48 = vmul.f32 %v468_v44, %v586_v16 }
  0xec   :  { %v351_v49 = vmul.f32 %v476_v45, %v586_v16  ;;  %v379_v50 = vmax.f32 %v363_v42, 0.0  ;;  %v387_v51 = vmax.f32 %v371_v43, 0.0  ;;  %v232_v52 = vpop.f32.mrf.mxu0  ;;  %v264_v53 = vpop.f32.mrf.mxu1 }
  0xed   :  { %v377_v54 = vmax.f32 %v361_v46, 0.0  ;;  %v385_v55 = vmax.f32 %v369_v47, 0.0  ;;  %v366_v56 = vadd.f32 %v591_v18, %v343_v48  ;;  %v341_v58 = vmul.f32 %v586_v16, %v232_v52 }
  0xee   :  { %v374_v57 = vadd.f32 %v591_v18, %v351_v49  ;;  %395 = vst [vmem:[%s677_s4 + $0x18] sm:$0xff] %v379_v50  ;;  %403 = vst [vmem:[%s677_s4 + $0x58] sm:$0xff] %v387_v51  ;;  %v349_v59 = vmul.f32 %v586_v16, %v264_v53  ;;  %v469_v60 = vpop.f32.mrf.mxu0  ;;  %v477_v61 = vpop.f32.mrf.mxu1 }
  0xef   :  { %393 = vst [vmem:[%s677_s4 + $0x8] sm:$0xff] %v377_v54  ;;  %401 = vst [vmem:[%s677_s4 + $0x48] sm:$0xff] %v385_v55  ;;  %v382_v62 = vmax.f32 %v366_v56, 0.0  ;;  %v344_v0 = vmul.f32 %v469_v60, %v586_v16  ;;  %v352_v1 = vmul.f32 %v477_v61, %v586_v16  ;;  %v364_v2 = vadd.f32 %v591_v18, %v341_v58 }
  0xf0   :  { %v390_v63 = vmax.f32 %v374_v57, 0.0  ;;  %v372_v3 = vadd.f32 %v591_v18, %v349_v59  ;;  %v235_v4 = vpop.f32.mrf.mxu0  ;;  %v267_v5 = vpop.f32.mrf.mxu1 }
  0xf1   :  { %398 = vst [vmem:[%s677_s4 + $0x30] sm:$0xff] %v382_v62  ;;  %v367_v6 = vadd.f32 %v591_v18, %v344_v0  ;;  %v375_v7 = vadd.f32 %v591_v18, %v352_v1  ;;  %v342_v8 = vmul.f32 %v586_v16, %v235_v4  ;;  %v350_v9 = vmul.f32 %v586_v16, %v267_v5 }
  0xf2   :  { %406 = vst [vmem:[%s677_s4 + $0x70] sm:$0xff] %v390_v63  ;;  %v380_v10 = vmax.f32 %v364_v2, 0.0  ;;  %v388_v11 = vmax.f32 %v372_v3, 0.0 }
  0xf3   :  { %v383_v12 = vmax.f32 %v367_v6, 0.0  ;;  %v391_v13 = vmax.f32 %v375_v7, 0.0  ;;  %v365_v14 = vadd.f32 %v591_v18, %v342_v8  ;;  %v373_v15 = vadd.f32 %v591_v18, %v350_v9 }
  0xf4   :  { %396 = vst [vmem:[%s677_s4 + $0x20] sm:$0xff] %v380_v10  ;;  %404 = vst [vmem:[%s677_s4 + $0x60] sm:$0xff] %v388_v11 }
  0xf5   :  { %399 = vst [vmem:[%s677_s4 + $0x38] sm:$0xff] %v383_v12  ;;  %407 = vst [vmem:[%s677_s4 + $0x78] sm:$0xff] %v391_v13  ;;  %v381_v16 = vmax.f32 %v365_v14, 0.0  ;;  %v389_v17 = vmax.f32 %v373_v15, 0.0 }
  0xf7   :  { %397 = vst [vmem:[%s677_s4 + $0x28] sm:$0xff] %v381_v16  ;;  %405 = vst [vmem:[%s677_s4 + $0x68] sm:$0xff] %v389_v17 }

// kernel: modified_resnet_forward.45
= control target key start
LH: loop header
LB: loop body
LE: loop exit
PB: predicated region body
PF: predicated region fallthrough
CT: control target
= control target key end

     0   :  { %s761_s1 = inlined_call_operand.vmem [shape: bf16[128,128], index: 1, kind: input, shape index: {}]   ;;  %s762_s0 = inlined_call_operand.vmem [shape: bf16[128,128], index: 0, kind: input, shape index: {}]   ;;  %s763_s2 = inlined_call_operand.vmem [shape: f32[1,128], index: 2, kind: input, shape index: {}]   ;;  %s764_s3 = inlined_call_operand.vmem [shape: f32[1,128], index: 3, kind: input, shape index: {}]   ;;  %s765_s4 = inlined_call_operand.vmem [shape: f32[128,128], index: 4, kind: input, shape index: {}]   ;;  %s766_s5 = inlined_call_operand.vmem [shape: f32[128,128], index: 5, kind: output, shape index: {}]  }
   0x1   :  { %v529_v0 = vld [vmem:[%s761_s1 + $0x38] sm:$0xff]   ;;  %v530_v1 = vld [vmem:[%s761_s1 + $0x30] sm:$0xff]   ;;  %v531_v2 = vld [vmem:[%s761_s1 + $0x28] sm:$0xff]  }
   0x2   :  { %481 = vmatprep.subr.bf16.mxu0 %v529_v0  ;;  %513 = vmatprep.subr.bf16.mxu1 %v529_v0  ;;  %v532_v3 = vld [vmem:[%s761_s1 + $0x20] sm:$0xff]   ;;  %v533_v6 = vld [vmem:[%s761_s1 + $0x18] sm:$0xff]   ;;  %v534_v7 = vld [vmem:[%s761_s1 + $0x10] sm:$0xff]  }
   0x3   :  { %482 = vmatpush3.bf16.msra.mxu0 %v529_v0  ;;  %521 = vmatpush3.bf16.msra.mxu1 %v529_v0  ;;  %v537_v4 = vld [vmem:[%s762_s0] sm:$0xff]   ;;  %v535_v8 = vld [vmem:[%s761_s1 + $0x8] sm:$0xff]   ;;  %v541_v12 = vld [vmem:[%s762_s0 + $0x10] sm:$0xff]  }
   0x4   :  { %483 = vmatprep.subr.bf16.mxu0 %v530_v1  ;;  %514 = vmatprep.subr.bf16.mxu1 %v530_v1  ;;  %v538_v5 = vld [vmem:[%s762_s0 + $0x20] sm:$0xff]   ;;  %v539_v10 = vld [vmem:[%s762_s0 + $0x8] sm:$0xff]   ;;  %v542_v13 = vld [vmem:[%s762_s0 + $0x30] sm:$0xff]  }
   0x5   :  { %497 = vmatprep.mubr.bf16.mxu0 %v537_v4  ;;  %505 = vmatprep.mubr.bf16.mxu1 %v538_v5  ;;  %v536_v9 = vld [vmem:[%s761_s1] sm:$0xff]   ;;  %v540_v11 = vld [vmem:[%s762_s0 + $0x28] sm:$0xff]   ;;  %v543_v14 = vld [vmem:[%s762_s0 + $0x18] sm:$0xff]  }
   0x6   :  { %v544_v15 = vld [vmem:[%s762_s0 + $0x38] sm:$0xff]   ;;  %v626_v16 = vld [vmem:[%s763_s2] ss:$0 sm:$0xff]  ;;  %v381_v22 = vld [vmem:[%s765_s4 + $0x10] sm:$0xff] }
   0x7   :  { %484 = vmatpush3.bf16.msra.mxu0 %v530_v1  ;;  %522 = vmatpush3.bf16.msra.mxu1 %v530_v1  ;;  %v631_v18 = vld [vmem:[%s764_s3] ss:$0 sm:$0xff]  ;;  %v389_v23 = vld [vmem:[%s765_s4 + $0x50] sm:$0xff]  ;;  %v382_v46 = vld [vmem:[%s765_s4 + $0x18] sm:$0xff] }
   0x8   :  { %485 = vmatprep.subr.bf16.mxu0 %v531_v2  ;;  %515 = vmatprep.subr.bf16.mxu1 %v531_v2  ;;  %v379_v30 = vld [vmem:[%s765_s4] sm:$0xff]  ;;  %v390_v47 = vld [vmem:[%s765_s4 + $0x58] sm:$0xff]  ;;  %v380_v56 = vld [vmem:[%s765_s4 + $0x8] sm:$0xff] }
   0x9   :  { %v387_v31 = vld [vmem:[%s765_s4 + $0x40] sm:$0xff]  ;;  %v388_v57 = vld [vmem:[%s765_s4 + $0x48] sm:$0xff]  ;;  %v385_v0 = vld [vmem:[%s765_s4 + $0x30] sm:$0xff] }
   0xa   :  { %v393_v1 = vld [vmem:[%s765_s4 + $0x70] sm:$0xff] }
   0xb   :  { %486 = vmatpush3.bf16.msra.mxu0 %v531_v2  ;;  %523 = vmatpush3.bf16.msra.mxu1 %v531_v2 }
   0xc   :  { %487 = vmatprep.subr.bf16.mxu0 %v532_v3  ;;  %516 = vmatprep.subr.bf16.mxu1 %v532_v3 }
   0xf   :  { %488 = vmatpush3.bf16.msra.mxu0 %v532_v3  ;;  %524 = vmatpush3.bf16.msra.mxu1 %v532_v3 }
  0x10   :  { %489 = vmatprep.subr.bf16.mxu0 %v533_v6  ;;  %517 = vmatprep.subr.bf16.mxu1 %v533_v6 }
  0x13   :  { %490 = vmatpush3.bf16.msra.mxu0 %v533_v6  ;;  %525 = vmatpush3.bf16.msra.mxu1 %v533_v6 }
  0x14   :  { %491 = vmatprep.subr.bf16.mxu0 %v534_v7  ;;  %518 = vmatprep.subr.bf16.mxu1 %v534_v7 }
  0x17   :  { %492 = vmatpush3.bf16.msra.mxu0 %v534_v7  ;;  %526 = vmatpush3.bf16.msra.mxu1 %v534_v7 }
  0x18   :  { %493 = vmatprep.subr.bf16.mxu0 %v535_v8  ;;  %519 = vmatprep.subr.bf16.mxu1 %v535_v8 }
  0x1b   :  { %494 = vmatpush3.bf16.msra.mxu0 %v535_v8  ;;  %527 = vmatpush3.bf16.msra.mxu1 %v535_v8 }
  0x1c   :  { %495 = vmatprep.subr.bf16.mxu0 %v536_v9  ;;  %520 = vmatprep.subr.bf16.mxu1 %v536_v9 }
  0x1f   :  { %496 = vmatpush3.bf16.msra.mxu0 %v536_v9  ;;  %528 = vmatpush3.bf16.msra.mxu1 %v536_v9 }
  0x22   :  { %498 = vmatmul.mubr.bf16.vlgmr.msra.gmra.mxu0 %v539_v10  ;;  %506 = vmatmul.mubr.bf16.vlgmr.msra.gmra.mxu1 %v540_v11 }
  0x23   :  { %501 = vmatprep.mubr.bf16.mxu0 %v541_v12  ;;  %509 = vmatprep.mubr.bf16.mxu1 %v542_v13  ;;  %v383_v12 = vld [vmem:[%s765_s4 + $0x20] sm:$0xff] }
  0x24   :  { %v391_v13 = vld [vmem:[%s765_s4 + $0x60] sm:$0xff] }
  0x2a   :  { %502 = vmatmul.mubr.bf16.gmra.mxu0 %v543_v14  ;;  %510 = vmatmul.mubr.bf16.gmra.mxu1 %v544_v15 }
  0xe2   :  { %v499_v17 = vpop.f32.mrf.mxu0  ;;  %v507_v19 = vpop.f32.mrf.mxu1 }
  0xe3   :  { %v342_v20 = vmul.f32 %v499_v17, %v626_v16  ;;  %v350_v21 = vmul.f32 %v507_v19, %v626_v16 }
  0xe4   :  { %v219_v24 = vpop.f32.mrf.mxu0  ;;  %v251_v25 = vpop.f32.mrf.mxu1 }
  0xe5   :  { %v365_v26 = vadd.f32 %v631_v18, %v342_v20  ;;  %v373_v27 = vadd.f32 %v631_v18, %v350_v21  ;;  %v340_v28 = vmul.f32 %v626_v16, %v219_v24  ;;  %v348_v29 = vmul.f32 %v626_v16, %v251_v25 }
  0xe6   :  { %v500_v32 = vpop.f32.mrf.mxu0  ;;  %v508_v33 = vpop.f32.mrf.mxu1 }
  0xe7   :  { %v397_v34 = vadd.f32 %v381_v22, %v365_v26  ;;  %v405_v35 = vadd.f32 %v389_v23, %v373_v27  ;;  %v363_v36 = vadd.f32 %v631_v18, %v340_v28  ;;  %v371_v37 = vadd.f32 %v631_v18, %v348_v29 }
  0xe8   :  { %v343_v38 = vmul.f32 %v500_v32, %v626_v16  ;;  %v351_v39 = vmul.f32 %v508_v33, %v626_v16  ;;  %v222_v40 = vpop.f32.mrf.mxu0  ;;  %v254_v41 = vpop.f32.mrf.mxu1  ;;  %v386_v32 = vld [vmem:[%s765_s4 + $0x38] sm:$0xff] }
  0xe9   :  { %v413_v42 = vmax.f32 %v397_v34, 0.0  ;;  %v421_v43 = vmax.f32 %v405_v35, 0.0  ;;  %v395_v44 = vadd.f32 %v379_v30, %v363_v36  ;;  %v403_v45 = vadd.f32 %v387_v31, %v371_v37  ;;  %v394_v33 = vld [vmem:[%s765_s4 + $0x78] sm:$0xff] }
  0xea   :  { %v366_v48 = vadd.f32 %v631_v18, %v343_v38  ;;  %v374_v49 = vadd.f32 %v631_v18, %v351_v39  ;;  %v341_v50 = vmul.f32 %v626_v16, %v222_v40  ;;  %v349_v51 = vmul.f32 %v626_v16, %v254_v41  ;;  %v503_v52 = vpop.f32.mrf.mxu0  ;;  %v511_v53 = vpop.f32.mrf.mxu1  ;;  %v384_v40 = vld [vmem:[%s765_s4 + $0x28] sm:$0xff] }
  0xeb   :  { %429 = vst [vmem:[%s766_s5 + $0x10] sm:$0xff] %v413_v42  ;;  %437 = vst [vmem:[%s766_s5 + $0x50] sm:$0xff] %v421_v43  ;;  %v411_v54 = vmax.f32 %v395_v44, 0.0  ;;  %v419_v55 = vmax.f32 %v403_v45, 0.0  ;;  %v346_v58 = vmul.f32 %v503_v52, %v626_v16  ;;  %v354_v59 = vmul.f32 %v511_v53, %v626_v16  ;;  %v392_v41 = vld [vmem:[%s765_s4 + $0x68] sm:$0xff] }
  0xec   :  { %v398_v60 = vadd.f32 %v382_v46, %v366_v48  ;;  %v406_v61 = vadd.f32 %v390_v47, %v374_v49  ;;  %v364_v62 = vadd.f32 %v631_v18, %v341_v50  ;;  %v372_v63 = vadd.f32 %v631_v18, %v349_v51  ;;  %v235_v2 = vpop.f32.mrf.mxu0  ;;  %v267_v3 = vpop.f32.mrf.mxu1 }
  0xed   :  { %427 = vst [vmem:[%s766_s5] sm:$0xff] %v411_v54  ;;  %435 = vst [vmem:[%s766_s5 + $0x40] sm:$0xff] %v419_v55  ;;  %v369_v4 = vadd.f32 %v631_v18, %v346_v58  ;;  %v377_v5 = vadd.f32 %v631_v18, %v354_v59  ;;  %v344_v6 = vmul.f32 %v626_v16, %v235_v2 }
  0xee   :  { %v352_v7 = vmul.f32 %v626_v16, %v267_v3  ;;  %v414_v8 = vmax.f32 %v398_v60, 0.0  ;;  %v422_v9 = vmax.f32 %v406_v61, 0.0  ;;  %v396_v10 = vadd.f32 %v380_v56, %v364_v62  ;;  %v504_v14 = vpop.f32.mrf.mxu0  ;;  %v512_v15 = vpop.f32.mrf.mxu1 }
  0xef   :  { %v404_v11 = vadd.f32 %v388_v57, %v372_v63  ;;  %v401_v17 = vadd.f32 %v385_v0, %v369_v4  ;;  %v409_v19 = vadd.f32 %v393_v1, %v377_v5  ;;  %v367_v20 = vadd.f32 %v631_v18, %v344_v6 }
  0xf0   :  { %v375_v21 = vadd.f32 %v631_v18, %v352_v7  ;;  %430 = vst [vmem:[%s766_s5 + $0x18] sm:$0xff] %v414_v8  ;;  %438 = vst [vmem:[%s766_s5 + $0x58] sm:$0xff] %v422_v9  ;;  %v412_v22 = vmax.f32 %v396_v10, 0.0  ;;  %v347_v24 = vmul.f32 %v504_v14, %v626_v16  ;;  %v355_v25 = vmul.f32 %v512_v15, %v626_v16  ;;  %v238_v26 = vpop.f32.mrf.mxu0  ;;  %v270_v27 = vpop.f32.mrf.mxu1 }
  0xf1   :  { %v420_v23 = vmax.f32 %v404_v11, 0.0  ;;  %v417_v28 = vmax.f32 %v401_v17, 0.0  ;;  %v425_v29 = vmax.f32 %v409_v19, 0.0  ;;  %v399_v30 = vadd.f32 %v383_v12, %v367_v20 }
  0xf2   :  { %v407_v31 = vadd.f32 %v391_v13, %v375_v21  ;;  %428 = vst [vmem:[%s766_s5 + $0x8] sm:$0xff] %v412_v22  ;;  %v370_v34 = vadd.f32 %v631_v18, %v347_v24  ;;  %v378_v35 = vadd.f32 %v631_v18, %v355_v25  ;;  %v345_v36 = vmul.f32 %v626_v16, %v238_v26 }
  0xf3   :  { %436 = vst [vmem:[%s766_s5 + $0x48] sm:$0xff] %v420_v23  ;;  %v353_v37 = vmul.f32 %v626_v16, %v270_v27  ;;  %433 = vst [vmem:[%s766_s5 + $0x30] sm:$0xff] %v417_v28  ;;  %v415_v38 = vmax.f32 %v399_v30, 0.0 }
  0xf4   :  { %441 = vst [vmem:[%s766_s5 + $0x70] sm:$0xff] %v425_v29  ;;  %v423_v39 = vmax.f32 %v407_v31, 0.0  ;;  %v402_v42 = vadd.f32 %v386_v32, %v370_v34  ;;  %v410_v16 = vadd.f32 %v394_v33, %v378_v35  ;;  %v368_v43 = vadd.f32 %v631_v18, %v345_v36 }
  0xf5   :  { %v376_v44 = vadd.f32 %v631_v18, %v353_v37  ;;  %431 = vst [vmem:[%s766_s5 + $0x20] sm:$0xff] %v415_v38 }
  0xf6   :  { %439 = vst [vmem:[%s766_s5 + $0x60] sm:$0xff] %v423_v39  ;;  %v418_v45 = vmax.f32 %v402_v42, 0.0  ;;  %v426_v46 = vmax.f32 %v410_v16, 0.0  ;;  %v400_v47 = vadd.f32 %v384_v40, %v368_v43 }
  0xf7   :  { %v408_v48 = vadd.f32 %v392_v41, %v376_v44 }
  0xf8   :  { %434 = vst [vmem:[%s766_s5 + $0x38] sm:$0xff] %v418_v45  ;;  %442 = vst [vmem:[%s766_s5 + $0x78] sm:$0xff] %v426_v46  ;;  %v416_v18 = vmax.f32 %v400_v47, 0.0 }
  0xf9   :  { %v424_v49 = vmax.f32 %v408_v48, 0.0 }
  0xfa   :  { %432 = vst [vmem:[%s766_s5 + $0x28] sm:$0xff] %v416_v18 }
  0xfb   :  { %440 = vst [vmem:[%s766_s5 + $0x68] sm:$0xff] %v424_v49 }

// kernel: modified_resnet_forward.48
= control target key start
LH: loop header
LB: loop body
LE: loop exit
PB: predicated region body
PF: predicated region fallthrough
CT: control target
= control target key end

     0   :  { %s329_s1 = inlined_call_operand.vmem [shape: bf16[128,128], index: 1, kind: input, shape index: {}]   ;;  %s330_s0 = inlined_call_operand.vmem [shape: bf16[32,128], index: 0, kind: input, shape index: {}]   ;;  %s331_s2 = inlined_call_operand.vmem [shape: f32[1,128], index: 2, kind: input, shape index: {}]   ;;  %s332_s3 = inlined_call_operand.vmem [shape: f32[1,128], index: 3, kind: input, shape index: {}]   ;;  %s333_s4 = inlined_call_operand.vmem [shape: f32[32,128], index: 4, kind: output, shape index: {}]  }
   0x1   :  { %v246_v0 = vld [vmem:[%s329_s1 + $0x38] sm:$0xff]   ;;  %v247_v1 = vld [vmem:[%s329_s1 + $0x30] sm:$0xff]   ;;  %v248_v2 = vld [vmem:[%s329_s1 + $0x28] sm:$0xff]  }
   0x2   :  { %226 = vmatprep.subr.bf16.mxu0 %v246_v0  ;;  %v249_v3 = vld [vmem:[%s329_s1 + $0x20] sm:$0xff]   ;;  %v250_v5 = vld [vmem:[%s329_s1 + $0x18] sm:$0xff]   ;;  %v251_v6 = vld [vmem:[%s329_s1 + $0x10] sm:$0xff]  }
   0x3   :  { %227 = vmatpush3.bf16.msra.mxu0 %v246_v0  ;;  %v254_v4 = vld [vmem:[%s330_s0] sm:$0xff]   ;;  %v252_v7 = vld [vmem:[%s329_s1 + $0x8] sm:$0xff]  }
   0x4   :  { %228 = vmatprep.subr.bf16.mxu0 %v247_v1  ;;  %242 = vmatprep.mubr.bf16.mxu0 %v254_v4  ;;  %v253_v8 = vld [vmem:[%s329_s1] sm:$0xff]   ;;  %v255_v9 = vld [vmem:[%s330_s0 + $0x8] sm:$0xff]  }
   0x5   :  { %v214_v10 = vld [vmem:[%s331_s2] ss:$0 sm:$0xff] }
   0x6   :  { %v215_v12 = vld [vmem:[%s332_s3] ss:$0 sm:$0xff] }
   0x7   :  { %229 = vmatpush3.bf16.msra.mxu0 %v247_v1 }
   0x8   :  { %230 = vmatprep.subr.bf16.mxu0 %v248_v2 }
   0xb   :  { %231 = vmatpush3.bf16.msra.mxu0 %v248_v2 }
   0xc   :  { %232 = vmatprep.subr.bf16.mxu0 %v249_v3 }
   0xf   :  { %233 = vmatpush3.bf16.msra.mxu0 %v249_v3 }
  0x10   :  { %234 = vmatprep.subr.bf16.mxu0 %v250_v5 }
  0x13   :  { %235 = vmatpush3.bf16.msra.mxu0 %v250_v5 }
  0x14   :  { %236 = vmatprep.subr.bf16.mxu0 %v251_v6 }
  0x17   :  { %237 = vmatpush3.bf16.msra.mxu0 %v251_v6 }
  0x18   :  { %238 = vmatprep.subr.bf16.mxu0 %v252_v7 }
  0x1b   :  { %239 = vmatpush3.bf16.msra.mxu0 %v252_v7 }
  0x1c   :  { %240 = vmatprep.subr.bf16.mxu0 %v253_v8 }
  0x1f   :  { %241 = vmatpush3.bf16.msra.mxu0 %v253_v8 }
  0x22   :  { %243 = vmatmul.mubr.bf16.vlgmr.msra.gmra.mxu0 %v255_v9 }
  0xe2   :  { %v244_v11 = vpop.f32.mrf.mxu0 }
  0xe3   :  { %v183_v13 = vmul.f32 %v244_v11, %v214_v10 }
  0xe4   :  { %v144_v14 = vpop.f32.mrf.mxu0 }
  0xe5   :  { %v194_v15 = vadd.f32 %v215_v12, %v183_v13  ;;  %v181_v16 = vmul.f32 %v214_v10, %v144_v14 }
  0xe6   :  { %v245_v17 = vpop.f32.mrf.mxu0 }
  0xe7   :  { %198 = vst [vmem:[%s333_s4 + $0x10] sm:$0xff] %v194_v15  ;;  %v192_v18 = vadd.f32 %v215_v12, %v181_v16  ;;  %v184_v19 = vmul.f32 %v245_v17, %v214_v10 }
  0xe8   :  { %v147_v20 = vpop.f32.mrf.mxu0 }
  0xe9   :  { %196 = vst [vmem:[%s333_s4] sm:$0xff] %v192_v18  ;;  %v195_v21 = vadd.f32 %v215_v12, %v184_v19  ;;  %v182_v22 = vmul.f32 %v214_v10, %v147_v20 }
  0xeb   :  { %199 = vst [vmem:[%s333_s4 + $0x18] sm:$0xff] %v195_v21  ;;  %v193_v23 = vadd.f32 %v215_v12, %v182_v22 }
  0xed   :  { %197 = vst [vmem:[%s333_s4 + $0x8] sm:$0xff] %v193_v23 }

// kernel: modified_resnet_forward.47
= control target key start
LH: loop header
LB: loop body
LE: loop exit
PB: predicated region body
PF: predicated region fallthrough
CT: control target
= control target key end

     0   :  { %s873_s1 = inlined_call_operand.vmem [shape: bf16[256,128], index: 1, kind: input, shape index: {}]   ;;  %s874_s0 = inlined_call_operand.vmem [shape: bf16[128,256], index: 0, kind: input, shape index: {}]   ;;  %s875_s2 = inlined_call_operand.vmem [shape: f32[1,128], index: 2, kind: input, shape index: {}]   ;;  %s876_s3 = inlined_call_operand.vmem [shape: f32[1,128], index: 3, kind: input, shape index: {}]   ;;  %s877_s4 = inlined_call_operand.vmem [shape: f32[128,128], index: 4, kind: output, shape index: {}]  }
   0x1   :  { %v622_v0 = vld [vmem:[%s873_s1 + $0x78] sm:$0xff]   ;;  %v624_v2 = vld [vmem:[%s873_s1 + $0x70] sm:$0xff]   ;;  %v626_v4 = vld [vmem:[%s873_s1 + $0x68] sm:$0xff]  }
   0x2   :  { %v623_v1 = vld [vmem:[%s873_s1 + $0x38] sm:$0xff]   ;;  %542 = vmatprep.subr.bf16.mxu0 %v622_v0  ;;  %606 = vmatprep.subr.bf16.mxu1 %v622_v0  ;;  %v625_v3 = vld [vmem:[%s873_s1 + $0x30] sm:$0xff]   ;;  %v627_v5 = vld [vmem:[%s873_s1 + $0x28] sm:$0xff]  }
   0x3   :  { %543 = vmatpush3.bf16.msra.mxu0 %v623_v1  ;;  %614 = vmatpush3.bf16.msra.mxu1 %v623_v1  ;;  %v628_v6 = vld [vmem:[%s873_s1 + $0x60] sm:$0xff]   ;;  %v630_v8 = vld [vmem:[%s873_s1 + $0x58] sm:$0xff]   ;;  %v632_v10 = vld [vmem:[%s873_s1 + $0x50] sm:$0xff]  }
   0x4   :  { %544 = vmatprep.subr.bf16.mxu0 %v624_v2  ;;  %607 = vmatprep.subr.bf16.mxu1 %v624_v2  ;;  %v629_v7 = vld [vmem:[%s873_s1 + $0x20] sm:$0xff]   ;;  %v631_v9 = vld [vmem:[%s873_s1 + $0x18] sm:$0xff]   ;;  %v633_v13 = vld [vmem:[%s873_s1 + $0x10] sm:$0xff]  }
   0x5   :  { %v640_v11 = vld [vmem:[%s874_s0 + $0x4] ss:$8 sps:$4 sm:$0xff]   ;;  %v638_v18 = vld [vmem:[%s874_s0] ss:$8 sps:$4 sm:$0xff]   ;;  %v644_v20 = vld [vmem:[%s874_s0 + $0x14] ss:$8 sps:$4 sm:$0xff]  }
   0x6   :  { %v643_v12 = vld [vmem:[%s874_s0 + $0x44] ss:$8 sps:$4 sm:$0xff]   ;;  %310 = vmatprep.mubr.bf16.mxu0 %v640_v11  ;;  %v641_v19 = vld [vmem:[%s874_s0 + $0x40] ss:$8 sps:$4 sm:$0xff]   ;;  %v646_v21 = vld [vmem:[%s874_s0 + $0x54] ss:$8 sps:$4 sm:$0xff]  }
   0x7   :  { %545 = vmatpush3.bf16.msra.mxu0 %v625_v3  ;;  %615 = vmatpush3.bf16.msra.mxu1 %v625_v3  ;;  %v634_v14 = vld [vmem:[%s873_s1 + $0x48] sm:$0xff]   ;;  %v636_v16 = vld [vmem:[%s873_s1 + $0x40] sm:$0xff]   ;;  %v648_v22 = vld [vmem:[%s874_s0 + $0x10] ss:$8 sps:$4 sm:$0xff]  }
   0x8   :  { %546 = vmatprep.subr.bf16.mxu0 %v626_v4  ;;  %608 = vmatprep.subr.bf16.mxu1 %v626_v4  ;;  %v635_v15 = vld [vmem:[%s873_s1 + $0x8] sm:$0xff]   ;;  %v637_v17 = vld [vmem:[%s873_s1] sm:$0xff]   ;;  %v649_v23 = vld [vmem:[%s874_s0 + $0x50] ss:$8 sps:$4 sm:$0xff]  }
   0x9   :  { %342 = vmatprep.mubr.bf16.mxu1 %v643_v12  ;;  %v650_v24 = vld [vmem:[%s874_s0 + $0x24] ss:$8 sps:$4 sm:$0xff]   ;;  %v654_v26 = vld [vmem:[%s874_s0 + $0x20] ss:$8 sps:$4 sm:$0xff]   ;;  %v656_v28 = vld [vmem:[%s874_s0 + $0x34] ss:$8 sps:$4 sm:$0xff]  }
   0xa   :  { %v652_v25 = vld [vmem:[%s874_s0 + $0x64] ss:$8 sps:$4 sm:$0xff]   ;;  %v655_v27 = vld [vmem:[%s874_s0 + $0x60] ss:$8 sps:$4 sm:$0xff]   ;;  %v658_v29 = vld [vmem:[%s874_s0 + $0x74] ss:$8 sps:$4 sm:$0xff]  }
   0xb   :  { %547 = vmatpush3.bf16.msra.mxu0 %v627_v5  ;;  %616 = vmatpush3.bf16.msra.mxu1 %v627_v5  ;;  %v660_v30 = vld [vmem:[%s874_s0 + $0x30] ss:$8 sps:$4 sm:$0xff]   ;;  %v786_v35 = vld [vmem:[%s875_s2] ss:$0 sm:$0xff] }
   0xc   :  { %548 = vmatprep.subr.bf16.mxu0 %v628_v6  ;;  %609 = vmatprep.subr.bf16.mxu1 %v628_v6  ;;  %v661_v31 = vld [vmem:[%s874_s0 + $0x70] ss:$8 sps:$4 sm:$0xff]   ;;  %v791_v39 = vld [vmem:[%s876_s3] ss:$0 sm:$0xff] }
   0xf   :  { %549 = vmatpush3.bf16.msra.mxu0 %v629_v7  ;;  %617 = vmatpush3.bf16.msra.mxu1 %v629_v7 }
  0x10   :  { %550 = vmatprep.subr.bf16.mxu0 %v630_v8  ;;  %610 = vmatprep.subr.bf16.mxu1 %v630_v8 }
  0x13   :  { %551 = vmatpush3.bf16.msra.mxu0 %v631_v9  ;;  %618 = vmatpush3.bf16.msra.mxu1 %v631_v9 }
  0x14   :  { %552 = vmatprep.subr.bf16.mxu0 %v632_v10  ;;  %611 = vmatprep.subr.bf16.mxu1 %v632_v10 }
  0x17   :  { %553 = vmatpush3.bf16.msra.mxu0 %v633_v13  ;;  %619 = vmatpush3.bf16.msra.mxu1 %v633_v13 }
  0x18   :  { %554 = vmatprep.subr.bf16.mxu0 %v634_v14  ;;  %612 = vmatprep.subr.bf16.mxu1 %v634_v14 }
  0x1b   :  { %555 = vmatpush3.bf16.msra.mxu0 %v635_v15  ;;  %620 = vmatpush3.bf16.msra.mxu1 %v635_v15 }
  0x1c   :  { %556 = vmatprep.subr.bf16.mxu0 %v636_v16  ;;  %613 = vmatprep.subr.bf16.mxu1 %v636_v16 }
  0x1f   :  { %557 = vmatpush3.bf16.msra.mxu0 %v637_v17  ;;  %621 = vmatpush3.bf16.msra.mxu1 %v637_v17 }
  0x22   :  { %311 = vmatmul.mubr.bf16.vlgmr.msra.gmra.mxu0 %v638_v18  ;;  %343 = vmatmul.mubr.bf16.vlgmr.msra.gmra.mxu1 %v641_v19 }
  0x23   :  { %318 = vmatprep.mubr.bf16.mxu0 %v644_v20  ;;  %350 = vmatprep.mubr.bf16.mxu1 %v646_v21 }
  0x2a   :  { %319 = vmatmul.mubr.bf16.gmra.mxu0 %v648_v22  ;;  %351 = vmatmul.mubr.bf16.gmra.mxu1 %v649_v23 }
  0x2b   :  { %326 = vmatprep.mubr.bf16.mxu0 %v650_v24  ;;  %358 = vmatprep.mubr.bf16.mxu1 %v652_v25 }
  0x32   :  { %327 = vmatmul.mubr.bf16.gmra.mxu0 %v654_v26  ;;  %359 = vmatmul.mubr.bf16.gmra.mxu1 %v655_v27 }
  0x33   :  { %334 = vmatprep.mubr.bf16.mxu0 %v656_v28  ;;  %366 = vmatprep.mubr.bf16.mxu1 %v658_v29 }
  0x3a   :  { %335 = vmatmul.mubr.bf16.gmra.mxu0 %v660_v30  ;;  %367 = vmatmul.mubr.bf16.gmra.mxu1 %v661_v31 }
  0xe2   :  { %v558_v32 = vpop.f32.mrf.mxu0  ;;  %v582_v33 = vpop.f32.mrf.mxu1 }
  0xe4   :  { %v559_v34 = vpop.f32.mrf.mxu0  ;;  %v583_v36 = vpop.f32.mrf.mxu1 }
  0xe5   :  { %v560_v37 = vadd.f32 %v559_v34, %v558_v32  ;;  %v584_v38 = vadd.f32 %v583_v36, %v582_v33 }
  0xe6   :  { %v561_v40 = vpop.f32.mrf.mxu0  ;;  %v585_v41 = vpop.f32.mrf.mxu1 }
  0xe7   :  { %v433_v42 = vmul.f32 %v560_v37, %v786_v35  ;;  %v441_v43 = vmul.f32 %v584_v38, %v786_v35 }
  0xe8   :  { %v562_v44 = vpop.f32.mrf.mxu0  ;;  %v586_v45 = vpop.f32.mrf.mxu1 }
  0xe9   :  { %v456_v46 = vadd.f32 %v791_v39, %v433_v42  ;;  %v464_v47 = vadd.f32 %v791_v39, %v441_v43  ;;  %v563_v48 = vadd.f32 %v562_v44, %v561_v40  ;;  %v587_v49 = vadd.f32 %v586_v45, %v585_v41 }
  0xea   :  { %v564_v50 = vpop.f32.mrf.mxu0  ;;  %v588_v51 = vpop.f32.mrf.mxu1 }
  0xeb   :  { %v472_v52 = vmax.f32 %v456_v46, 0.0  ;;  %v480_v53 = vmax.f32 %v464_v47, 0.0  ;;  %v434_v54 = vmul.f32 %v563_v48, %v786_v35  ;;  %v442_v55 = vmul.f32 %v587_v49, %v786_v35 }
  0xec   :  { %v565_v56 = vpop.f32.mrf.mxu0  ;;  %v589_v57 = vpop.f32.mrf.mxu1 }
  0xed   :  { %488 = vst [vmem:[%s877_s4] sm:$0xff] %v472_v52  ;;  %496 = vst [vmem:[%s877_s4 + $0x40] sm:$0xff] %v480_v53  ;;  %v457_v58 = vadd.f32 %v791_v39, %v434_v54  ;;  %v465_v59 = vadd.f32 %v791_v39, %v442_v55  ;;  %v566_v60 = vadd.f32 %v565_v56, %v564_v50 }
  0xee   :  { %v590_v61 = vadd.f32 %v589_v57, %v588_v51  ;;  %v567_v62 = vpop.f32.mrf.mxu0  ;;  %v591_v63 = vpop.f32.mrf.mxu1 }
  0xef   :  { %v473_v0 = vmax.f32 %v457_v58, 0.0  ;;  %v481_v1 = vmax.f32 %v465_v59, 0.0  ;;  %v435_v2 = vmul.f32 %v566_v60, %v786_v35 }
  0xf0   :  { %v443_v3 = vmul.f32 %v590_v61, %v786_v35  ;;  %v568_v4 = vpop.f32.mrf.mxu0  ;;  %v592_v5 = vpop.f32.mrf.mxu1 }
  0xf1   :  { %489 = vst [vmem:[%s877_s4 + $0x8] sm:$0xff] %v473_v0  ;;  %497 = vst [vmem:[%s877_s4 + $0x48] sm:$0xff] %v481_v1  ;;  %v458_v6 = vadd.f32 %v791_v39, %v435_v2  ;;  %v569_v8 = vadd.f32 %v568_v4, %v567_v62  ;;  %v593_v9 = vadd.f32 %v592_v5, %v591_v63 }
  0xf2   :  { %v466_v7 = vadd.f32 %v791_v39, %v443_v3  ;;  %v570_v10 = vpop.f32.mrf.mxu0  ;;  %v594_v11 = vpop.f32.mrf.mxu1 }
  0xf3   :  { %v474_v12 = vmax.f32 %v458_v6, 0.0  ;;  %v436_v14 = vmul.f32 %v569_v8, %v786_v35  ;;  %v444_v15 = vmul.f32 %v593_v9, %v786_v35 }
  0xf4   :  { %v482_v13 = vmax.f32 %v466_v7, 0.0  ;;  %v571_v16 = vpop.f32.mrf.mxu0  ;;  %v595_v17 = vpop.f32.mrf.mxu1 }
  0xf5   :  { %490 = vst [vmem:[%s877_s4 + $0x10] sm:$0xff] %v474_v12  ;;  %v459_v18 = vadd.f32 %v791_v39, %v436_v14  ;;  %v467_v19 = vadd.f32 %v791_v39, %v444_v15  ;;  %v572_v20 = vadd.f32 %v571_v16, %v570_v10  ;;  %v596_v21 = vadd.f32 %v595_v17, %v594_v11 }
  0xf6   :  { %498 = vst [vmem:[%s877_s4 + $0x50] sm:$0xff] %v482_v13  ;;  %v573_v22 = vpop.f32.mrf.mxu0  ;;  %v597_v23 = vpop.f32.mrf.mxu1 }
  0xf7   :  { %v475_v24 = vmax.f32 %v459_v18, 0.0  ;;  %v483_v25 = vmax.f32 %v467_v19, 0.0  ;;  %v437_v26 = vmul.f32 %v572_v20, %v786_v35  ;;  %v445_v27 = vmul.f32 %v596_v21, %v786_v35 }
  0xf8   :  { %v574_v28 = vpop.f32.mrf.mxu0  ;;  %v598_v29 = vpop.f32.mrf.mxu1 }
  0xf9   :  { %491 = vst [vmem:[%s877_s4 + $0x18] sm:$0xff] %v475_v24  ;;  %499 = vst [vmem:[%s877_s4 + $0x58] sm:$0xff] %v483_v25  ;;  %v460_v30 = vadd.f32 %v791_v39, %v437_v26  ;;  %v468_v31 = vadd.f32 %v791_v39, %v445_v27  ;;  %v575_v32 = vadd.f32 %v574_v28, %v573_v22 }
  0xfa   :  { %v599_v33 = vadd.f32 %v598_v29, %v597_v23  ;;  %v576_v34 = vpop.f32.mrf.mxu0  ;;  %v600_v36 = vpop.f32.mrf.mxu1 }
  0xfb   :  { %v476_v37 = vmax.f32 %v460_v30, 0.0  ;;  %v484_v38 = vmax.f32 %v468_v31, 0.0  ;;  %v438_v40 = vmul.f32 %v575_v32, %v786_v35 }
  0xfc   :  { %v446_v41 = vmul.f32 %v599_v33, %v786_v35  ;;  %v577_v42 = vpop.f32.mrf.mxu0  ;;  %v601_v43 = vpop.f32.mrf.mxu1 }
  0xfd   :  { %492 = vst [vmem:[%s877_s4 + $0x20] sm:$0xff] %v476_v37  ;;  %500 = vst [vmem:[%s877_s4 + $0x60] sm:$0xff] %v484_v38  ;;  %v461_v44 = vadd.f32 %v791_v39, %v438_v40  ;;  %v578_v46 = vadd.f32 %v577_v42, %v576_v34  ;;  %v602_v47 = vadd.f32 %v601_v43, %v600_v36 }
  0xfe   :  { %v469_v45 = vadd.f32 %v791_v39, %v446_v41  ;;  %v579_v48 = vpop.f32.mrf.mxu0  ;;  %v603_v49 = vpop.f32.mrf.mxu1 }
  0xff   :  { %v477_v50 = vmax.f32 %v461_v44, 0.0  ;;  %v439_v52 = vmul.f32 %v578_v46, %v786_v35  ;;  %v447_v53 = vmul.f32 %v602_v47, %v786_v35 }
 0x100   :  { %v485_v51 = vmax.f32 %v469_v45, 0.0  ;;  %v580_v54 = vpop.f32.mrf.mxu0  ;;  %v604_v55 = vpop.f32.mrf.mxu1 }
 0x101   :  { %493 = vst [vmem:[%s877_s4 + $0x28] sm:$0xff] %v477_v50  ;;  %v462_v56 = vadd.f32 %v791_v39, %v439_v52  ;;  %v470_v57 = vadd.f32 %v791_v39, %v447_v53  ;;  %v581_v58 = vadd.f32 %v580_v54, %v579_v48  ;;  %v605_v59 = vadd.f32 %v604_v55, %v603_v49 }
 0x102   :  { %501 = vst [vmem:[%s877_s4 + $0x68] sm:$0xff] %v485_v51 }
 0x103   :  { %v478_v60 = vmax.f32 %v462_v56, 0.0  ;;  %v486_v61 = vmax.f32 %v470_v57, 0.0  ;;  %v440_v62 = vmul.f32 %v581_v58, %v786_v35  ;;  %v448_v63 = vmul.f32 %v605_v59, %v786_v35 }
 0x105   :  { %494 = vst [vmem:[%s877_s4 + $0x30] sm:$0xff] %v478_v60  ;;  %502 = vst [vmem:[%s877_s4 + $0x70] sm:$0xff] %v486_v61  ;;  %v463_v0 = vadd.f32 %v791_v39, %v440_v62  ;;  %v471_v1 = vadd.f32 %v791_v39, %v448_v63 }
 0x107   :  { %v479_v2 = vmax.f32 %v463_v0, 0.0  ;;  %v487_v3 = vmax.f32 %v471_v1, 0.0 }
 0x109   :  { %495 = vst [vmem:[%s877_s4 + $0x38] sm:$0xff] %v479_v2  ;;  %503 = vst [vmem:[%s877_s4 + $0x78] sm:$0xff] %v487_v3 }

// kernel: modified_resnet_forward.50
= control target key start
LH: loop header
LB: loop body
LE: loop exit
PB: predicated region body
PF: predicated region fallthrough
CT: control target
= control target key end

     0   :  { %s333_s1 = inlined_call_operand.vmem [shape: bf16[128,128], index: 1, kind: input, shape index: {}]   ;;  %s334_s0 = inlined_call_operand.vmem [shape: bf16[32,128], index: 0, kind: input, shape index: {}]   ;;  %s335_s2 = inlined_call_operand.vmem [shape: f32[1,128], index: 2, kind: input, shape index: {}]   ;;  %s336_s3 = inlined_call_operand.vmem [shape: f32[1,128], index: 3, kind: input, shape index: {}]   ;;  %s337_s4 = inlined_call_operand.vmem [shape: f32[32,128], index: 4, kind: output, shape index: {}]  }
   0x1   :  { %v250_v0 = vld [vmem:[%s333_s1 + $0x38] sm:$0xff]   ;;  %v251_v1 = vld [vmem:[%s333_s1 + $0x30] sm:$0xff]   ;;  %v252_v2 = vld [vmem:[%s333_s1 + $0x28] sm:$0xff]  }
   0x2   :  { %230 = vmatprep.subr.bf16.mxu0 %v250_v0  ;;  %v253_v3 = vld [vmem:[%s333_s1 + $0x20] sm:$0xff]   ;;  %v254_v5 = vld [vmem:[%s333_s1 + $0x18] sm:$0xff]   ;;  %v255_v6 = vld [vmem:[%s333_s1 + $0x10] sm:$0xff]  }
   0x3   :  { %231 = vmatpush3.bf16.msra.mxu0 %v250_v0  ;;  %v258_v4 = vld [vmem:[%s334_s0] sm:$0xff]   ;;  %v256_v7 = vld [vmem:[%s333_s1 + $0x8] sm:$0xff]  }
   0x4   :  { %232 = vmatprep.subr.bf16.mxu0 %v251_v1  ;;  %246 = vmatprep.mubr.bf16.mxu0 %v258_v4  ;;  %v257_v8 = vld [vmem:[%s333_s1] sm:$0xff]   ;;  %v259_v9 = vld [vmem:[%s334_s0 + $0x8] sm:$0xff]  }
   0x5   :  { %v218_v10 = vld [vmem:[%s335_s2] ss:$0 sm:$0xff] }
   0x6   :  { %v219_v12 = vld [vmem:[%s336_s3] ss:$0 sm:$0xff] }
   0x7   :  { %233 = vmatpush3.bf16.msra.mxu0 %v251_v1 }
   0x8   :  { %234 = vmatprep.subr.bf16.mxu0 %v252_v2 }
   0xb   :  { %235 = vmatpush3.bf16.msra.mxu0 %v252_v2 }
   0xc   :  { %236 = vmatprep.subr.bf16.mxu0 %v253_v3 }
   0xf   :  { %237 = vmatpush3.bf16.msra.mxu0 %v253_v3 }
  0x10   :  { %238 = vmatprep.subr.bf16.mxu0 %v254_v5 }
  0x13   :  { %239 = vmatpush3.bf16.msra.mxu0 %v254_v5 }
  0x14   :  { %240 = vmatprep.subr.bf16.mxu0 %v255_v6 }
  0x17   :  { %241 = vmatpush3.bf16.msra.mxu0 %v255_v6 }
  0x18   :  { %242 = vmatprep.subr.bf16.mxu0 %v256_v7 }
  0x1b   :  { %243 = vmatpush3.bf16.msra.mxu0 %v256_v7 }
  0x1c   :  { %244 = vmatprep.subr.bf16.mxu0 %v257_v8 }
  0x1f   :  { %245 = vmatpush3.bf16.msra.mxu0 %v257_v8 }
  0x22   :  { %247 = vmatmul.mubr.bf16.vlgmr.msra.gmra.mxu0 %v259_v9 }
  0xe2   :  { %v248_v11 = vpop.f32.mrf.mxu0 }
  0xe3   :  { %v183_v13 = vmul.f32 %v248_v11, %v218_v10 }
  0xe4   :  { %v144_v14 = vpop.f32.mrf.mxu0 }
  0xe5   :  { %v194_v15 = vadd.f32 %v219_v12, %v183_v13  ;;  %v181_v16 = vmul.f32 %v218_v10, %v144_v14 }
  0xe6   :  { %v249_v17 = vpop.f32.mrf.mxu0 }
  0xe7   :  { %v198_v18 = vmax.f32 %v194_v15, 0.0  ;;  %v192_v19 = vadd.f32 %v219_v12, %v181_v16  ;;  %v184_v20 = vmul.f32 %v249_v17, %v218_v10 }
  0xe8   :  { %v147_v21 = vpop.f32.mrf.mxu0 }
  0xe9   :  { %202 = vst [vmem:[%s337_s4 + $0x10] sm:$0xff] %v198_v18  ;;  %v196_v22 = vmax.f32 %v192_v19, 0.0  ;;  %v195_v23 = vadd.f32 %v219_v12, %v184_v20  ;;  %v182_v24 = vmul.f32 %v218_v10, %v147_v21 }
  0xeb   :  { %200 = vst [vmem:[%s337_s4] sm:$0xff] %v196_v22  ;;  %v199_v25 = vmax.f32 %v195_v23, 0.0  ;;  %v193_v26 = vadd.f32 %v219_v12, %v182_v24 }
  0xed   :  { %203 = vst [vmem:[%s337_s4 + $0x18] sm:$0xff] %v199_v25  ;;  %v197_v27 = vmax.f32 %v193_v26, 0.0 }
  0xef   :  { %201 = vst [vmem:[%s337_s4 + $0x8] sm:$0xff] %v197_v27 }

// kernel: modified_resnet_forward.49
= control target key start
LH: loop header
LB: loop body
LE: loop exit
PB: predicated region body
PF: predicated region fallthrough
CT: control target
= control target key end

     0   :  { %s361_s1 = inlined_call_operand.vmem [shape: bf16[128,128], index: 1, kind: input, shape index: {}]   ;;  %s362_s0 = inlined_call_operand.vmem [shape: bf16[32,128], index: 0, kind: input, shape index: {}]   ;;  %s363_s2 = inlined_call_operand.vmem [shape: f32[1,128], index: 2, kind: input, shape index: {}]   ;;  %s364_s3 = inlined_call_operand.vmem [shape: f32[1,128], index: 3, kind: input, shape index: {}]   ;;  %s365_s4 = inlined_call_operand.vmem [shape: f32[32,128], index: 4, kind: input, shape index: {}]   ;;  %s366_s5 = inlined_call_operand.vmem [shape: f32[32,128], index: 5, kind: output, shape index: {}]  }
   0x1   :  { %v261_v0 = vld [vmem:[%s361_s1 + $0x38] sm:$0xff]   ;;  %v262_v1 = vld [vmem:[%s361_s1 + $0x30] sm:$0xff]   ;;  %v263_v2 = vld [vmem:[%s361_s1 + $0x28] sm:$0xff]  }
   0x2   :  { %241 = vmatprep.subr.bf16.mxu0 %v261_v0  ;;  %v264_v3 = vld [vmem:[%s361_s1 + $0x20] sm:$0xff]   ;;  %v265_v5 = vld [vmem:[%s361_s1 + $0x18] sm:$0xff]   ;;  %v266_v6 = vld [vmem:[%s361_s1 + $0x10] sm:$0xff]  }
   0x3   :  { %242 = vmatpush3.bf16.msra.mxu0 %v261_v0  ;;  %v269_v4 = vld [vmem:[%s362_s0] sm:$0xff]   ;;  %v267_v7 = vld [vmem:[%s361_s1 + $0x8] sm:$0xff]   ;;  %v201_v14 = vld [vmem:[%s365_s4 + $0x10] sm:$0xff] }
   0x4   :  { %243 = vmatprep.subr.bf16.mxu0 %v262_v1  ;;  %257 = vmatprep.mubr.bf16.mxu0 %v269_v4  ;;  %v268_v8 = vld [vmem:[%s361_s1] sm:$0xff]   ;;  %v270_v9 = vld [vmem:[%s362_s0 + $0x8] sm:$0xff]   ;;  %v202_v23 = vld [vmem:[%s365_s4 + $0x18] sm:$0xff] }
   0x5   :  { %v229_v10 = vld [vmem:[%s363_s2] ss:$0 sm:$0xff]  ;;  %v200_v29 = vld [vmem:[%s365_s4 + $0x8] sm:$0xff] }
   0x6   :  { %v230_v12 = vld [vmem:[%s364_s3] ss:$0 sm:$0xff] }
   0x7   :  { %244 = vmatpush3.bf16.msra.mxu0 %v262_v1  ;;  %v199_v18 = vld [vmem:[%s365_s4] sm:$0xff] }
   0x8   :  { %245 = vmatprep.subr.bf16.mxu0 %v263_v2 }
   0xb   :  { %246 = vmatpush3.bf16.msra.mxu0 %v263_v2 }
   0xc   :  { %247 = vmatprep.subr.bf16.mxu0 %v264_v3 }
   0xf   :  { %248 = vmatpush3.bf16.msra.mxu0 %v264_v3 }
  0x10   :  { %249 = vmatprep.subr.bf16.mxu0 %v265_v5 }
  0x13   :  { %250 = vmatpush3.bf16.msra.mxu0 %v265_v5 }
  0x14   :  { %251 = vmatprep.subr.bf16.mxu0 %v266_v6 }
  0x17   :  { %252 = vmatpush3.bf16.msra.mxu0 %v266_v6 }
  0x18   :  { %253 = vmatprep.subr.bf16.mxu0 %v267_v7 }
  0x1b   :  { %254 = vmatpush3.bf16.msra.mxu0 %v267_v7 }
  0x1c   :  { %255 = vmatprep.subr.bf16.mxu0 %v268_v8 }
  0x1f   :  { %256 = vmatpush3.bf16.msra.mxu0 %v268_v8 }
  0x22   :  { %258 = vmatmul.mubr.bf16.vlgmr.msra.gmra.mxu0 %v270_v9 }
  0xe2   :  { %v259_v11 = vpop.f32.mrf.mxu0 }
  0xe3   :  { %v186_v13 = vmul.f32 %v259_v11, %v229_v10 }
  0xe4   :  { %v147_v15 = vpop.f32.mrf.mxu0 }
  0xe5   :  { %v197_v16 = vadd.f32 %v230_v12, %v186_v13  ;;  %v184_v17 = vmul.f32 %v229_v10, %v147_v15 }
  0xe6   :  { %v260_v19 = vpop.f32.mrf.mxu0 }
  0xe7   :  { %v205_v20 = vadd.f32 %v201_v14, %v197_v16  ;;  %v195_v21 = vadd.f32 %v230_v12, %v184_v17  ;;  %v187_v22 = vmul.f32 %v260_v19, %v229_v10 }
  0xe8   :  { %v150_v24 = vpop.f32.mrf.mxu0 }
  0xe9   :  { %v209_v25 = vmax.f32 %v205_v20, 0.0  ;;  %v203_v26 = vadd.f32 %v199_v18, %v195_v21  ;;  %v198_v27 = vadd.f32 %v230_v12, %v187_v22  ;;  %v185_v28 = vmul.f32 %v229_v10, %v150_v24 }
  0xeb   :  { %213 = vst [vmem:[%s366_s5 + $0x10] sm:$0xff] %v209_v25  ;;  %v207_v30 = vmax.f32 %v203_v26, 0.0  ;;  %v206_v31 = vadd.f32 %v202_v23, %v198_v27  ;;  %v196_v32 = vadd.f32 %v230_v12, %v185_v28 }
  0xed   :  { %211 = vst [vmem:[%s366_s5] sm:$0xff] %v207_v30  ;;  %v210_v33 = vmax.f32 %v206_v31, 0.0  ;;  %v204_v34 = vadd.f32 %v200_v29, %v196_v32 }
  0xef   :  { %214 = vst [vmem:[%s366_s5 + $0x18] sm:$0xff] %v210_v33  ;;  %v208_v35 = vmax.f32 %v204_v34, 0.0 }
  0xf1   :  { %212 = vst [vmem:[%s366_s5 + $0x8] sm:$0xff] %v208_v35 }

// kernel: modified_resnet_forward.51
= control target key start
LH: loop header
LB: loop body
LE: loop exit
PB: predicated region body
PF: predicated region fallthrough
CT: control target
= control target key end

     0   :  { %s471_s1 = inlined_call_operand.vmem [shape: bf16[256,128], index: 1, kind: input, shape index: {}]   ;;  %s472_s0 = inlined_call_operand.vmem [shape: bf16[32,256], index: 0, kind: input, shape index: {}]   ;;  %s473_s2 = inlined_call_operand.vmem [shape: f32[1,128], index: 2, kind: input, shape index: {}]   ;;  %s474_s3 = inlined_call_operand.vmem [shape: f32[1,128], index: 3, kind: input, shape index: {}]   ;;  %s475_s4 = inlined_call_operand.vmem [shape: f32[32,128], index: 4, kind: output, shape index: {}]  }
   0x1   :  { %v346_v0 = vld [vmem:[%s471_s1 + $0x78] sm:$0xff]   ;;  %v348_v2 = vld [vmem:[%s471_s1 + $0x70] sm:$0xff]   ;;  %v350_v4 = vld [vmem:[%s471_s1 + $0x68] sm:$0xff]  }
   0x2   :  { %v347_v1 = vld [vmem:[%s471_s1 + $0x38] sm:$0xff]   ;;  %302 = vmatprep.subr.bf16.mxu0 %v346_v0  ;;  %330 = vmatprep.subr.bf16.mxu1 %v346_v0  ;;  %v349_v3 = vld [vmem:[%s471_s1 + $0x30] sm:$0xff]   ;;  %v351_v5 = vld [vmem:[%s471_s1 + $0x28] sm:$0xff]  }
   0x3   :  { %303 = vmatpush3.bf16.msra.mxu0 %v347_v1  ;;  %338 = vmatpush3.bf16.msra.mxu1 %v347_v1  ;;  %v352_v6 = vld [vmem:[%s471_s1 + $0x60] sm:$0xff]   ;;  %v354_v8 = vld [vmem:[%s471_s1 + $0x58] sm:$0xff]   ;;  %v356_v10 = vld [vmem:[%s471_s1 + $0x50] sm:$0xff]  }
   0x4   :  { %304 = vmatprep.subr.bf16.mxu0 %v348_v2  ;;  %331 = vmatprep.subr.bf16.mxu1 %v348_v2  ;;  %v353_v7 = vld [vmem:[%s471_s1 + $0x20] sm:$0xff]   ;;  %v355_v9 = vld [vmem:[%s471_s1 + $0x18] sm:$0xff]   ;;  %v357_v13 = vld [vmem:[%s471_s1 + $0x10] sm:$0xff]  }
   0x5   :  { %v364_v11 = vld [vmem:[%s472_s0 + $0x4] ss:$8 sps:$4 sm:$0xff]   ;;  %v367_v12 = vld [vmem:[%s472_s0 + $0x14] ss:$8 sps:$4 sm:$0xff]   ;;  %v362_v18 = vld [vmem:[%s472_s0] ss:$8 sps:$4 sm:$0xff]  }
   0x6   :  { %v358_v14 = vld [vmem:[%s471_s1 + $0x48] sm:$0xff]   ;;  %214 = vmatprep.mubr.bf16.mxu0 %v364_v11  ;;  %222 = vmatprep.mubr.bf16.mxu1 %v367_v12  ;;  %v360_v16 = vld [vmem:[%s471_s1 + $0x40] sm:$0xff]   ;;  %v365_v19 = vld [vmem:[%s472_s0 + $0x10] ss:$8 sps:$4 sm:$0xff]  }
   0x7   :  { %305 = vmatpush3.bf16.msra.mxu0 %v349_v3  ;;  %339 = vmatpush3.bf16.msra.mxu1 %v349_v3  ;;  %v359_v15 = vld [vmem:[%s471_s1 + $0x8] sm:$0xff]   ;;  %v361_v17 = vld [vmem:[%s471_s1] sm:$0xff]  }
   0x8   :  { %306 = vmatprep.subr.bf16.mxu0 %v350_v4  ;;  %332 = vmatprep.subr.bf16.mxu1 %v350_v4  ;;  %v300_v23 = vld [vmem:[%s473_s2] ss:$0 sm:$0xff] }
   0x9   :  { %v301_v27 = vld [vmem:[%s474_s3] ss:$0 sm:$0xff] }
   0xb   :  { %307 = vmatpush3.bf16.msra.mxu0 %v351_v5  ;;  %340 = vmatpush3.bf16.msra.mxu1 %v351_v5 }
   0xc   :  { %308 = vmatprep.subr.bf16.mxu0 %v352_v6  ;;  %333 = vmatprep.subr.bf16.mxu1 %v352_v6 }
   0xf   :  { %309 = vmatpush3.bf16.msra.mxu0 %v353_v7  ;;  %341 = vmatpush3.bf16.msra.mxu1 %v353_v7 }
  0x10   :  { %310 = vmatprep.subr.bf16.mxu0 %v354_v8  ;;  %334 = vmatprep.subr.bf16.mxu1 %v354_v8 }
  0x13   :  { %311 = vmatpush3.bf16.msra.mxu0 %v355_v9  ;;  %342 = vmatpush3.bf16.msra.mxu1 %v355_v9 }
  0x14   :  { %312 = vmatprep.subr.bf16.mxu0 %v356_v10  ;;  %335 = vmatprep.subr.bf16.mxu1 %v356_v10 }
  0x17   :  { %313 = vmatpush3.bf16.msra.mxu0 %v357_v13  ;;  %343 = vmatpush3.bf16.msra.mxu1 %v357_v13 }
  0x18   :  { %314 = vmatprep.subr.bf16.mxu0 %v358_v14  ;;  %336 = vmatprep.subr.bf16.mxu1 %v358_v14 }
  0x1b   :  { %315 = vmatpush3.bf16.msra.mxu0 %v359_v15  ;;  %344 = vmatpush3.bf16.msra.mxu1 %v359_v15 }
  0x1c   :  { %316 = vmatprep.subr.bf16.mxu0 %v360_v16  ;;  %337 = vmatprep.subr.bf16.mxu1 %v360_v16 }
  0x1f   :  { %317 = vmatpush3.bf16.msra.mxu0 %v361_v17  ;;  %345 = vmatpush3.bf16.msra.mxu1 %v361_v17 }
  0x22   :  { %215 = vmatmul.mubr.bf16.vlgmr.msra.gmra.mxu0 %v362_v18  ;;  %223 = vmatmul.mubr.bf16.vlgmr.msra.gmra.mxu1 %v365_v19 }
  0xe2   :  { %v318_v20 = vpop.f32.mrf.mxu0  ;;  %v324_v21 = vpop.f32.mrf.mxu1 }
  0xe4   :  { %v319_v22 = vpop.f32.mrf.mxu0  ;;  %v325_v24 = vpop.f32.mrf.mxu1 }
  0xe5   :  { %v320_v25 = vadd.f32 %v319_v22, %v318_v20  ;;  %v326_v26 = vadd.f32 %v325_v24, %v324_v21 }
  0xe6   :  { %v321_v28 = vpop.f32.mrf.mxu0  ;;  %v327_v29 = vpop.f32.mrf.mxu1 }
  0xe7   :  { %v253_v30 = vmul.f32 %v320_v25, %v300_v23  ;;  %v255_v31 = vmul.f32 %v326_v26, %v300_v23 }
  0xe8   :  { %v322_v32 = vpop.f32.mrf.mxu0  ;;  %v328_v33 = vpop.f32.mrf.mxu1 }
  0xe9   :  { %v264_v34 = vadd.f32 %v301_v27, %v253_v30  ;;  %v266_v35 = vadd.f32 %v301_v27, %v255_v31  ;;  %v323_v36 = vadd.f32 %v322_v32, %v321_v28  ;;  %v329_v37 = vadd.f32 %v328_v33, %v327_v29 }
  0xeb   :  { %v268_v38 = vmax.f32 %v264_v34, 0.0  ;;  %v270_v39 = vmax.f32 %v266_v35, 0.0  ;;  %v254_v40 = vmul.f32 %v323_v36, %v300_v23  ;;  %v256_v41 = vmul.f32 %v329_v37, %v300_v23 }
  0xed   :  { %272 = vst [vmem:[%s475_s4] sm:$0xff] %v268_v38  ;;  %274 = vst [vmem:[%s475_s4 + $0x10] sm:$0xff] %v270_v39  ;;  %v265_v42 = vadd.f32 %v301_v27, %v254_v40  ;;  %v267_v43 = vadd.f32 %v301_v27, %v256_v41 }
  0xef   :  { %v269_v44 = vmax.f32 %v265_v42, 0.0  ;;  %v271_v45 = vmax.f32 %v267_v43, 0.0 }
  0xf1   :  { %273 = vst [vmem:[%s475_s4 + $0x8] sm:$0xff] %v269_v44  ;;  %275 = vst [vmem:[%s475_s4 + $0x18] sm:$0xff] %v271_v45 }

// kernel: modified_resnet_forward.55
= control target key start
LH: loop header
LB: loop body
LE: loop exit
PB: predicated region body
PF: predicated region fallthrough
CT: control target
= control target key end

     0   :  { %s392_s1 = inlined_call_operand.vmem [shape: bf16[256,128], index: 1, kind: input, shape index: {}]   ;;  %s393_s0 = inlined_call_operand.vmem [shape: bf16[16,256], index: 0, kind: input, shape index: {}]   ;;  %s394_s2 = inlined_call_operand.vmem [shape: f32[1,128], index: 2, kind: input, shape index: {}]   ;;  %s395_s3 = inlined_call_operand.vmem [shape: f32[1,128], index: 3, kind: input, shape index: {}]   ;;  %s396_s4 = inlined_call_operand.vmem [shape: f32[16,128], index: 4, kind: output, shape index: {}]  }
   0x1   :  { %v282_v0 = vld [vmem:[%s392_s1 + $0x78] sm:$0xff]   ;;  %v284_v2 = vld [vmem:[%s392_s1 + $0x70] sm:$0xff]   ;;  %v286_v4 = vld [vmem:[%s392_s1 + $0x68] sm:$0xff]  }
   0x2   :  { %v283_v1 = vld [vmem:[%s392_s1 + $0x38] sm:$0xff]   ;;  %260 = vmatprep.subr.bf16.mxu0 %v282_v0  ;;  %v285_v3 = vld [vmem:[%s392_s1 + $0x30] sm:$0xff]   ;;  %v287_v5 = vld [vmem:[%s392_s1 + $0x28] sm:$0xff]  }
   0x3   :  { %261 = vmatpush3.bf16.msra.mxu0 %v283_v1  ;;  %v288_v6 = vld [vmem:[%s392_s1 + $0x60] sm:$0xff]   ;;  %v290_v8 = vld [vmem:[%s392_s1 + $0x58] sm:$0xff]   ;;  %v292_v10 = vld [vmem:[%s392_s1 + $0x50] sm:$0xff]  }
   0x4   :  { %262 = vmatprep.subr.bf16.mxu0 %v284_v2  ;;  %v289_v7 = vld [vmem:[%s392_s1 + $0x20] sm:$0xff]   ;;  %v291_v9 = vld [vmem:[%s392_s1 + $0x18] sm:$0xff]   ;;  %v293_v12 = vld [vmem:[%s392_s1 + $0x10] sm:$0xff]  }
   0x5   :  { %v300_v11 = vld [vmem:[%s393_s0 + $0x4] ss:$8 sps:$4 sm:$0xff]   ;;  %v298_v17 = vld [vmem:[%s393_s0] ss:$8 sps:$4 sm:$0xff]  }
   0x6   :  { %198 = vmatprep.mubr.bf16.mxu0 %v300_v11  ;;  %v294_v13 = vld [vmem:[%s392_s1 + $0x48] sm:$0xff]   ;;  %v296_v15 = vld [vmem:[%s392_s1 + $0x40] sm:$0xff]  }
   0x7   :  { %263 = vmatpush3.bf16.msra.mxu0 %v285_v3  ;;  %v295_v14 = vld [vmem:[%s392_s1 + $0x8] sm:$0xff]   ;;  %v297_v16 = vld [vmem:[%s392_s1] sm:$0xff]  }
   0x8   :  { %264 = vmatprep.subr.bf16.mxu0 %v286_v4  ;;  %v258_v20 = vld [vmem:[%s394_s2] ss:$0 sm:$0xff] }
   0x9   :  { %v259_v22 = vld [vmem:[%s395_s3] ss:$0 sm:$0xff] }
   0xb   :  { %265 = vmatpush3.bf16.msra.mxu0 %v287_v5 }
   0xc   :  { %266 = vmatprep.subr.bf16.mxu0 %v288_v6 }
   0xf   :  { %267 = vmatpush3.bf16.msra.mxu0 %v289_v7 }
  0x10   :  { %268 = vmatprep.subr.bf16.mxu0 %v290_v8 }
  0x13   :  { %269 = vmatpush3.bf16.msra.mxu0 %v291_v9 }
  0x14   :  { %270 = vmatprep.subr.bf16.mxu0 %v292_v10 }
  0x17   :  { %271 = vmatpush3.bf16.msra.mxu0 %v293_v12 }
  0x18   :  { %272 = vmatprep.subr.bf16.mxu0 %v294_v13 }
  0x1b   :  { %273 = vmatpush3.bf16.msra.mxu0 %v295_v14 }
  0x1c   :  { %274 = vmatprep.subr.bf16.mxu0 %v296_v15 }
  0x1f   :  { %275 = vmatpush3.bf16.msra.mxu0 %v297_v16 }
  0x22   :  { %199 = vmatmul.mubr.bf16.vlgmr.msra.gmra.mxu0 %v298_v17 }
  0xe2   :  { %v276_v18 = vpop.f32.mrf.mxu0 }
  0xe4   :  { %v277_v19 = vpop.f32.mrf.mxu0 }
  0xe5   :  { %v278_v21 = vadd.f32 %v277_v19, %v276_v18 }
  0xe6   :  { %v279_v23 = vpop.f32.mrf.mxu0 }
  0xe7   :  { %v223_v24 = vmul.f32 %v278_v21, %v258_v20 }
  0xe8   :  { %v280_v25 = vpop.f32.mrf.mxu0 }
  0xe9   :  { %v232_v26 = vadd.f32 %v259_v22, %v223_v24  ;;  %v281_v27 = vadd.f32 %v280_v25, %v279_v23 }
  0xeb   :  { %234 = vst [vmem:[%s396_s4] sm:$0xff] %v232_v26  ;;  %v224_v28 = vmul.f32 %v281_v27, %v258_v20 }
  0xed   :  { %v233_v29 = vadd.f32 %v259_v22, %v224_v28 }
  0xef   :  { %235 = vst [vmem:[%s396_s4 + $0x8] sm:$0xff] %v233_v29 }

// kernel: modified_resnet_forward.54
= control target key start
LH: loop header
LB: loop body
LE: loop exit
PB: predicated region body
PF: predicated region fallthrough
CT: control target
= control target key end

     0   :  { %s664_s1 = inlined_call_operand.vmem [shape: bf16[384,128], index: 1, kind: input, shape index: {}]   ;;  %s665_s0 = inlined_call_operand.vmem [shape: bf16[32,384], index: 0, kind: input, shape index: {}]   ;;  %s666_s2 = inlined_call_operand.vmem [shape: f32[1,128], index: 2, kind: input, shape index: {}]   ;;  %s667_s3 = inlined_call_operand.vmem [shape: f32[1,128], index: 3, kind: input, shape index: {}]   ;;  %s668_s4 = inlined_call_operand.vmem [shape: f32[32,128], index: 4, kind: output, shape index: {}]  }
   0x1   :  { %v499_v0 = vld [vmem:[%s664_s1 + $0x78] sm:$0xff]   ;;  %v502_v3 = vld [vmem:[%s664_s1 + $0x70] sm:$0xff]   ;;  %v505_v6 = vld [vmem:[%s664_s1 + $0x68] sm:$0xff]  }
   0x2   :  { %v500_v1 = vld [vmem:[%s664_s1 + $0x38] sm:$0xff]   ;;  %441 = vmatprep.subr.bf16.mxu0 %v499_v0  ;;  %v503_v4 = vld [vmem:[%s664_s1 + $0x30] sm:$0xff]   ;;  %v506_v7 = vld [vmem:[%s664_s1 + $0x28] sm:$0xff]  }
   0x3   :  { %v501_v2 = vld [vmem:[%s664_s1 + $0xb8] sm:$0xff]   ;;  %442 = vmatpush3.bf16.msra.mxu0 %v500_v1  ;;  %v504_v5 = vld [vmem:[%s664_s1 + $0xb0] sm:$0xff]   ;;  %v507_v8 = vld [vmem:[%s664_s1 + $0xa8] sm:$0xff]  }
   0x4   :  { %479 = vmatprep.subr.bf16.mxu1 %v501_v2  ;;  %443 = vmatprep.subr.bf16.mxu0 %v502_v3  ;;  %v508_v9 = vld [vmem:[%s664_s1 + $0x60] sm:$0xff]   ;;  %v511_v12 = vld [vmem:[%s664_s1 + $0x58] sm:$0xff]   ;;  %v514_v15 = vld [vmem:[%s664_s1 + $0x50] sm:$0xff]  }
   0x5   :  { %480 = vmatpush3.bf16.msra.mxu1 %v501_v2  ;;  %v509_v10 = vld [vmem:[%s664_s1 + $0x20] sm:$0xff]   ;;  %v513_v13 = vld [vmem:[%s664_s1 + $0x98] sm:$0xff]   ;;  %v516_v16 = vld [vmem:[%s664_s1 + $0x90] sm:$0xff]  }
   0x6   :  { %481 = vmatprep.subr.bf16.mxu1 %v504_v5  ;;  %v510_v11 = vld [vmem:[%s664_s1 + $0xa0] sm:$0xff]   ;;  %v512_v14 = vld [vmem:[%s664_s1 + $0x18] sm:$0xff]   ;;  %v515_v17 = vld [vmem:[%s664_s1 + $0x10] sm:$0xff]  }
   0x7   :  { %444 = vmatpush3.bf16.msra.mxu0 %v503_v4  ;;  %v517_v18 = vld [vmem:[%s664_s1 + $0x48] sm:$0xff]   ;;  %v520_v21 = vld [vmem:[%s664_s1 + $0x40] sm:$0xff]  }
   0x8   :  { %445 = vmatprep.subr.bf16.mxu0 %v505_v6  ;;  %v518_v19 = vld [vmem:[%s664_s1 + $0x8] sm:$0xff]   ;;  %v522_v22 = vld [vmem:[%s664_s1 + $0x80] sm:$0xff]  }
   0x9   :  { %482 = vmatpush3.bf16.msra.mxu1 %v504_v5  ;;  %v519_v20 = vld [vmem:[%s664_s1 + $0x88] sm:$0xff]   ;;  %v525_v23 = vld [vmem:[%s665_s0 + $0x4] ss:$12 sps:$4 sm:$0xff]   ;;  %v439_v36 = vld [vmem:[%s666_s2] ss:$0 sm:$0xff] }
   0xa   :  { %483 = vmatprep.subr.bf16.mxu1 %v507_v8  ;;  %v526_v24 = vld [vmem:[%s665_s0 + $0x8] ss:$12 sps:$4 sm:$0xff]   ;;  %v521_v25 = vld [vmem:[%s664_s1] sm:$0xff]   ;;  %294 = vmatprep.mubr.bf16.mxu0 %v525_v23 }
   0xb   :  { %446 = vmatpush3.bf16.msra.mxu0 %v506_v7  ;;  %495 = vmatprep.mubr.bf16.mxu1 %v526_v24  ;;  %v523_v26 = vld [vmem:[%s665_s0] ss:$12 sps:$4 sm:$0xff]   ;;  %v528_v27 = vld [vmem:[%s665_s0 + $0x1c] ss:$12 sps:$4 sm:$0xff]   ;;  %v530_v29 = vld [vmem:[%s665_s0 + $0x18] ss:$12 sps:$4 sm:$0xff]  }
   0xc   :  { %447 = vmatprep.subr.bf16.mxu0 %v508_v9  ;;  %v527_v28 = vld [vmem:[%s665_s0 + $0x20] ss:$12 sps:$4 sm:$0xff]  }
   0xd   :  { %484 = vmatpush3.bf16.msra.mxu1 %v507_v8  ;;  %v440_v38 = vld [vmem:[%s667_s3] ss:$0 sm:$0xff] }
   0xe   :  { %485 = vmatprep.subr.bf16.mxu1 %v510_v11 }
   0xf   :  { %448 = vmatpush3.bf16.msra.mxu0 %v509_v10 }
  0x10   :  { %449 = vmatprep.subr.bf16.mxu0 %v511_v12 }
  0x11   :  { %486 = vmatpush3.bf16.msra.mxu1 %v510_v11 }
  0x12   :  { %487 = vmatprep.subr.bf16.mxu1 %v513_v13 }
  0x13   :  { %450 = vmatpush3.bf16.msra.mxu0 %v512_v14 }
  0x14   :  { %451 = vmatprep.subr.bf16.mxu0 %v514_v15 }
  0x15   :  { %488 = vmatpush3.bf16.msra.mxu1 %v513_v13 }
  0x16   :  { %489 = vmatprep.subr.bf16.mxu1 %v516_v16 }
  0x17   :  { %452 = vmatpush3.bf16.msra.mxu0 %v515_v17 }
  0x18   :  { %453 = vmatprep.subr.bf16.mxu0 %v517_v18 }
  0x19   :  { %490 = vmatpush3.bf16.msra.mxu1 %v516_v16 }
  0x1a   :  { %491 = vmatprep.subr.bf16.mxu1 %v519_v20 }
  0x1b   :  { %454 = vmatpush3.bf16.msra.mxu0 %v518_v19 }
  0x1c   :  { %455 = vmatprep.subr.bf16.mxu0 %v520_v21 }
  0x1d   :  { %492 = vmatpush3.bf16.msra.mxu1 %v519_v20 }
  0x1e   :  { %493 = vmatprep.subr.bf16.mxu1 %v522_v22 }
  0x1f   :  { %456 = vmatpush3.bf16.msra.mxu0 %v521_v25 }
  0x21   :  { %494 = vmatpush3.bf16.msra.mxu1 %v522_v22 }
  0x22   :  { %295 = vmatmul.mubr.bf16.vlgmr.msra.gmra.mxu0 %v523_v26 }
  0x23   :  { %302 = vmatprep.mubr.bf16.mxu0 %v528_v27 }
  0x24   :  { %496 = vmatmul.mubr.bf16.vlgmr.msra.gmra.mxu1 %v527_v28 }
  0x2a   :  { %303 = vmatmul.mubr.bf16.gmra.mxu0 %v530_v29 }
  0xe2   :  { %v457_v30 = vpop.f32.mrf.mxu0 }
  0xe4   :  { %v458_v31 = vpop.f32.mrf.mxu0  ;;  %v497_v32 = vpop.f32.mrf.mxu1 }
  0xe5   :  { %v459_v33 = vadd.f32 %v458_v31, %v457_v30 }
  0xe6   :  { %v460_v34 = vpop.f32.mrf.mxu0  ;;  %v345_v35 = vpop.f32.mrf.mxu1 }
  0xe7   :  { %v346_v37 = vadd.f32 %v459_v33, %v345_v35 }
  0xe8   :  { %v461_v39 = vpop.f32.mrf.mxu0  ;;  %v498_v40 = vpop.f32.mrf.mxu1 }
  0xe9   :  { %v382_v41 = vmul.f32 %v439_v36, %v346_v37  ;;  %v462_v42 = vadd.f32 %v461_v39, %v460_v34 }
  0xea   :  { %v463_v43 = vpop.f32.mrf.mxu0  ;;  %v348_v44 = vpop.f32.mrf.mxu1 }
  0xeb   :  { %v393_v45 = vadd.f32 %v440_v38, %v382_v41  ;;  %v349_v46 = vadd.f32 %v462_v42, %v348_v44 }
  0xec   :  { %v464_v47 = vpop.f32.mrf.mxu0 }
  0xed   :  { %v397_v48 = vmax.f32 %v393_v45, 0.0  ;;  %v383_v49 = vmul.f32 %v439_v36, %v349_v46  ;;  %v465_v50 = vadd.f32 %v464_v47, %v463_v43 }
  0xee   :  { %v466_v51 = vpop.f32.mrf.mxu0 }
  0xef   :  { %401 = vst [vmem:[%s668_s4] sm:$0xff] %v397_v48  ;;  %v394_v52 = vadd.f32 %v440_v38, %v383_v49  ;;  %v354_v53 = vadd.f32 %v497_v32, %v465_v50 }
  0xf0   :  { %v467_v54 = vpop.f32.mrf.mxu0 }
  0xf1   :  { %v398_v55 = vmax.f32 %v394_v52, 0.0  ;;  %v384_v56 = vmul.f32 %v439_v36, %v354_v53  ;;  %v468_v57 = vadd.f32 %v467_v54, %v466_v51 }
  0xf3   :  { %402 = vst [vmem:[%s668_s4 + $0x8] sm:$0xff] %v398_v55  ;;  %v395_v58 = vadd.f32 %v440_v38, %v384_v56  ;;  %v357_v59 = vadd.f32 %v498_v40, %v468_v57 }
  0xf5   :  { %v399_v60 = vmax.f32 %v395_v58, 0.0  ;;  %v385_v61 = vmul.f32 %v439_v36, %v357_v59 }
  0xf7   :  { %403 = vst [vmem:[%s668_s4 + $0x10] sm:$0xff] %v399_v60  ;;  %v396_v62 = vadd.f32 %v440_v38, %v385_v61 }
  0xf9   :  { %v400_v63 = vmax.f32 %v396_v62, 0.0 }
  0xfb   :  { %404 = vst [vmem:[%s668_s4 + $0x18] sm:$0xff] %v400_v63 }

// kernel: modified_resnet_forward.56
= control target key start
LH: loop header
LB: loop body
LE: loop exit
PB: predicated region body
PF: predicated region fallthrough
CT: control target
= control target key end

     0   :  { %v232_v0 = vmov 0.0   ;;  %vm233_vm0 = vmmov 0   ;;  %s309_s1 = inlined_call_operand.vmem [shape: bf16[128,128], index: 1, kind: input, shape index: {}]   ;;  %s310_s0 = inlined_call_operand.vmem [shape: bf16[16,128], index: 0, kind: input, shape index: {}]   ;;  %s311_s2 = inlined_call_operand.vmem [shape: f32[1,128], index: 2, kind: input, shape index: {}]   ;;  %s312_s3 = inlined_call_operand.vmem [shape: f32[1,128], index: 3, kind: input, shape index: {}]   ;;  %s313_s4 = inlined_call_operand.vmem [shape: f32[16,128], index: 4, kind: input, shape index: {}]   ;;  %s314_s5 = inlined_call_operand.vmem [shape: f32[16,128], index: 5, kind: output, shape index: {}]  }
   0x1   :  { %201 = vmatprep.subr.bf16.mxu0 %v232_v0  ;;  %v223_v1 = vld [vmem:[%s309_s1 + $0x38] sm:$0xff]   ;;  %217 = vmatprep.mubr.msk.bf16.mxu0 %vm233_vm0, %v232_v0  ;;  %v224_v2 = vld [vmem:[%s309_s1 + $0x30] sm:$0xff]   ;;  %v225_v3 = vld [vmem:[%s309_s1 + $0x28] sm:$0xff]  }
   0x2   :  { %202 = vmatpush3.bf16.msra.mxu0 %v223_v1  ;;  %v226_v4 = vld [vmem:[%s309_s1 + $0x20] sm:$0xff]   ;;  %v227_v5 = vld [vmem:[%s309_s1 + $0x18] sm:$0xff]   ;;  %v228_v6 = vld [vmem:[%s309_s1 + $0x10] sm:$0xff]  }
   0x3   :  { %203 = vmatprep.subr.bf16.mxu0 %v232_v0  ;;  %v229_v7 = vld [vmem:[%s309_s1 + $0x8] sm:$0xff]   ;;  %v230_v8 = vld [vmem:[%s309_s1] sm:$0xff]  }
   0x4   :  { %v231_v9 = vld [vmem:[%s310_s0] sm:$0xff]   ;;  %v170_v20 = vld [vmem:[%s313_s4 + $0x8] sm:$0xff] }
   0x5   :  { %v190_v10 = vld [vmem:[%s311_s2] ss:$0 sm:$0xff] }
   0x6   :  { %204 = vmatpush3.bf16.msra.mxu0 %v224_v2  ;;  %v191_v12 = vld [vmem:[%s312_s3] ss:$0 sm:$0xff] }
   0x7   :  { %205 = vmatprep.subr.bf16.mxu0 %v232_v0  ;;  %v169_v14 = vld [vmem:[%s313_s4] sm:$0xff] }
   0xa   :  { %206 = vmatpush3.bf16.msra.mxu0 %v225_v3 }
   0xb   :  { %207 = vmatprep.subr.bf16.mxu0 %v232_v0 }
   0xe   :  { %208 = vmatpush3.bf16.msra.mxu0 %v226_v4 }
   0xf   :  { %209 = vmatprep.subr.bf16.mxu0 %v232_v0 }
  0x12   :  { %210 = vmatpush3.bf16.msra.mxu0 %v227_v5 }
  0x13   :  { %211 = vmatprep.subr.bf16.mxu0 %v232_v0 }
  0x16   :  { %212 = vmatpush3.bf16.msra.mxu0 %v228_v6 }
  0x17   :  { %213 = vmatprep.subr.bf16.mxu0 %v232_v0 }
  0x1a   :  { %214 = vmatpush3.bf16.msra.mxu0 %v229_v7 }
  0x1b   :  { %215 = vmatprep.subr.bf16.mxu0 %v232_v0 }
  0x1e   :  { %216 = vmatpush3.bf16.msra.mxu0 %v230_v8 }
  0x21   :  { %218 = vmatmul.mubr.bf16.vlgmr.msra.gmra.mxu0 %v231_v9 }
  0xe1   :  { %v135_v11 = vpop.f32.mrf.mxu0 }
  0xe2   :  { %v158_v13 = vmul.f32 %v190_v10, %v135_v11 }
  0xe3   :  { %v219_v15 = vpop.f32.mrf.mxu0 }
  0xe4   :  { %v167_v16 = vadd.f32 %v191_v12, %v158_v13 }
  0xe5   :  { %v138_v17 = vpop.f32.mrf.mxu0 }
  0xe6   :  { %v171_v18 = vadd.f32 %v169_v14, %v167_v16  ;;  %v159_v19 = vmul.f32 %v190_v10, %v138_v17 }
  0xe7   :  { %v220_v21 = vpop.f32.mrf.mxu0 }
  0xe8   :  { %v173_v22 = vmax.f32 %v171_v18, 0.0  ;;  %v168_v23 = vadd.f32 %v191_v12, %v159_v19 }
  0xea   :  { %175 = vst [vmem:[%s314_s5] sm:$0xff] %v173_v22  ;;  %v172_v24 = vadd.f32 %v170_v20, %v168_v23 }
  0xec   :  { %v174_v25 = vmax.f32 %v172_v24, 0.0 }
  0xee   :  { %176 = vst [vmem:[%s314_s5 + $0x8] sm:$0xff] %v174_v25 }

// kernel: modified_resnet_forward.57
= control target key start
LH: loop header
LB: loop body
LE: loop exit
PB: predicated region body
PF: predicated region fallthrough
CT: control target
= control target key end

     0   :  { %v225_v0 = vmov 0.0   ;;  %vm226_vm0 = vmmov 0   ;;  %s291_s1 = inlined_call_operand.vmem [shape: bf16[128,128], index: 1, kind: input, shape index: {}]   ;;  %s292_s0 = inlined_call_operand.vmem [shape: bf16[16,128], index: 0, kind: input, shape index: {}]   ;;  %s293_s2 = inlined_call_operand.vmem [shape: f32[1,128], index: 2, kind: input, shape index: {}]   ;;  %s294_s3 = inlined_call_operand.vmem [shape: f32[1,128], index: 3, kind: input, shape index: {}]   ;;  %s295_s4 = inlined_call_operand.vmem [shape: f32[16,128], index: 4, kind: output, shape index: {}]  }
   0x1   :  { %194 = vmatprep.subr.bf16.mxu0 %v225_v0  ;;  %v216_v1 = vld [vmem:[%s291_s1 + $0x38] sm:$0xff]   ;;  %210 = vmatprep.mubr.msk.bf16.mxu0 %vm226_vm0, %v225_v0  ;;  %v217_v2 = vld [vmem:[%s291_s1 + $0x30] sm:$0xff]   ;;  %v218_v3 = vld [vmem:[%s291_s1 + $0x28] sm:$0xff]  }
   0x2   :  { %195 = vmatpush3.bf16.msra.mxu0 %v216_v1  ;;  %v219_v4 = vld [vmem:[%s291_s1 + $0x20] sm:$0xff]   ;;  %v220_v5 = vld [vmem:[%s291_s1 + $0x18] sm:$0xff]   ;;  %v221_v6 = vld [vmem:[%s291_s1 + $0x10] sm:$0xff]  }
   0x3   :  { %196 = vmatprep.subr.bf16.mxu0 %v225_v0  ;;  %v222_v7 = vld [vmem:[%s291_s1 + $0x8] sm:$0xff]   ;;  %v223_v8 = vld [vmem:[%s291_s1] sm:$0xff]  }
   0x4   :  { %v224_v9 = vld [vmem:[%s292_s0] sm:$0xff]  }
   0x5   :  { %v183_v10 = vld [vmem:[%s293_s2] ss:$0 sm:$0xff] }
   0x6   :  { %197 = vmatpush3.bf16.msra.mxu0 %v217_v2  ;;  %v184_v12 = vld [vmem:[%s294_s3] ss:$0 sm:$0xff] }
   0x7   :  { %198 = vmatprep.subr.bf16.mxu0 %v225_v0 }
   0xa   :  { %199 = vmatpush3.bf16.msra.mxu0 %v218_v3 }
   0xb   :  { %200 = vmatprep.subr.bf16.mxu0 %v225_v0 }
   0xe   :  { %201 = vmatpush3.bf16.msra.mxu0 %v219_v4 }
   0xf   :  { %202 = vmatprep.subr.bf16.mxu0 %v225_v0 }
  0x12   :  { %203 = vmatpush3.bf16.msra.mxu0 %v220_v5 }
  0x13   :  { %204 = vmatprep.subr.bf16.mxu0 %v225_v0 }
  0x16   :  { %205 = vmatpush3.bf16.msra.mxu0 %v221_v6 }
  0x17   :  { %206 = vmatprep.subr.bf16.mxu0 %v225_v0 }
  0x1a   :  { %207 = vmatpush3.bf16.msra.mxu0 %v222_v7 }
  0x1b   :  { %208 = vmatprep.subr.bf16.mxu0 %v225_v0 }
  0x1e   :  { %209 = vmatpush3.bf16.msra.mxu0 %v223_v8 }
  0x21   :  { %211 = vmatmul.mubr.bf16.vlgmr.msra.gmra.mxu0 %v224_v9 }
  0xe1   :  { %v132_v11 = vpop.f32.mrf.mxu0 }
  0xe2   :  { %v155_v13 = vmul.f32 %v183_v10, %v132_v11 }
  0xe3   :  { %v212_v14 = vpop.f32.mrf.mxu0 }
  0xe4   :  { %v164_v15 = vadd.f32 %v184_v12, %v155_v13 }
  0xe5   :  { %v135_v16 = vpop.f32.mrf.mxu0 }
  0xe6   :  { %v166_v17 = vmax.f32 %v164_v15, 0.0  ;;  %v156_v18 = vmul.f32 %v183_v10, %v135_v16 }
  0xe7   :  { %v213_v19 = vpop.f32.mrf.mxu0 }
  0xe8   :  { %168 = vst [vmem:[%s295_s4] sm:$0xff] %v166_v17  ;;  %v165_v20 = vadd.f32 %v184_v12, %v156_v18 }
  0xea   :  { %v167_v21 = vmax.f32 %v165_v20, 0.0 }
  0xec   :  { %169 = vst [vmem:[%s295_s4 + $0x8] sm:$0xff] %v167_v21 }

// kernel: modified_resnet_forward.58
= control target key start
LH: loop header
LB: loop body
LE: loop exit
PB: predicated region body
PF: predicated region fallthrough
CT: control target
= control target key end

     0   :  { %v465_v0 = vmov 0.0   ;;  %vm466_vm0 = vmmov 0   ;;  %s585_s1 = inlined_call_operand.vmem [shape: bf16[384,128], index: 1, kind: input, shape index: {}]   ;;  %s586_s0 = inlined_call_operand.vmem [shape: bf16[16,384], index: 0, kind: input, shape index: {}]   ;;  %s587_s2 = inlined_call_operand.vmem [shape: f32[1,128], index: 2, kind: input, shape index: {}]   ;;  %s588_s3 = inlined_call_operand.vmem [shape: f32[1,128], index: 3, kind: input, shape index: {}]   ;;  %s589_s4 = inlined_call_operand.vmem [shape: f32[16,128], index: 4, kind: output, shape index: {}]  }
   0x1   :  { %415 = vmatprep.subr.bf16.mxu1 %v465_v0  ;;  %v437_v1 = vld [vmem:[%s585_s1 + $0x78] sm:$0xff]   ;;  %431 = vmatprep.mubr.msk.bf16.mxu1 %vm466_vm0, %v465_v0  ;;  %v440_v4 = vld [vmem:[%s585_s1 + $0x70] sm:$0xff]   ;;  %v443_v7 = vld [vmem:[%s585_s1 + $0x68] sm:$0xff]  }
   0x2   :  { %v438_v2 = vld [vmem:[%s585_s1 + $0xb8] sm:$0xff]   ;;  %384 = vmatprep.subr.bf16.mxu0 %v437_v1  ;;  %v441_v5 = vld [vmem:[%s585_s1 + $0xb0] sm:$0xff]   ;;  %v444_v8 = vld [vmem:[%s585_s1 + $0xa8] sm:$0xff]  }
   0x3   :  { %v439_v3 = vld [vmem:[%s585_s1 + $0x38] sm:$0xff]   ;;  %416 = vmatpush3.bf16.msra.mxu1 %v438_v2  ;;  %v442_v6 = vld [vmem:[%s585_s1 + $0x30] sm:$0xff]   ;;  %v445_v9 = vld [vmem:[%s585_s1 + $0x28] sm:$0xff]  }
   0x4   :  { %385 = vmatpush3.bf16.msra.mxu0 %v439_v3  ;;  %417 = vmatprep.subr.bf16.mxu1 %v465_v0  ;;  %v446_v10 = vld [vmem:[%s585_s1 + $0x60] sm:$0xff]   ;;  %v449_v13 = vld [vmem:[%s585_s1 + $0x58] sm:$0xff]   ;;  %v452_v16 = vld [vmem:[%s585_s1 + $0x50] sm:$0xff]  }
   0x5   :  { %386 = vmatprep.subr.bf16.mxu0 %v440_v4  ;;  %v447_v11 = vld [vmem:[%s585_s1 + $0xa0] sm:$0xff]   ;;  %v450_v14 = vld [vmem:[%s585_s1 + $0x98] sm:$0xff]   ;;  %v453_v17 = vld [vmem:[%s585_s1 + $0x90] sm:$0xff]  }
   0x6   :  { %v448_v12 = vld [vmem:[%s585_s1 + $0x20] sm:$0xff]   ;;  %v451_v15 = vld [vmem:[%s585_s1 + $0x18] sm:$0xff]   ;;  %v454_v18 = vld [vmem:[%s585_s1 + $0x10] sm:$0xff]  }
   0x7   :  { %418 = vmatpush3.bf16.msra.mxu1 %v441_v5  ;;  %v455_v19 = vld [vmem:[%s585_s1 + $0x48] sm:$0xff]   ;;  %v458_v22 = vld [vmem:[%s585_s1 + $0x40] sm:$0xff]  }
   0x8   :  { %387 = vmatpush3.bf16.msra.mxu0 %v442_v6  ;;  %419 = vmatprep.subr.bf16.mxu1 %v465_v0  ;;  %v456_v20 = vld [vmem:[%s585_s1 + $0x88] sm:$0xff]   ;;  %v463_v23 = vld [vmem:[%s586_s0 + $0x4] ss:$12 sps:$4 sm:$0xff]   ;;  %v382_v34 = vld [vmem:[%s587_s2] ss:$0 sm:$0xff] }
   0x9   :  { %388 = vmatprep.subr.bf16.mxu0 %v443_v7  ;;  %v457_v21 = vld [vmem:[%s585_s1 + $0x8] sm:$0xff]   ;;  %v459_v24 = vld [vmem:[%s585_s1 + $0x80] sm:$0xff]   ;;  %270 = vmatprep.mubr.bf16.mxu0 %v463_v23 }
   0xa   :  { %v460_v25 = vld [vmem:[%s585_s1] sm:$0xff]   ;;  %v464_v26 = vld [vmem:[%s586_s0 + $0x8] ss:$12 sps:$4 sm:$0xff]  }
   0xb   :  { %420 = vmatpush3.bf16.msra.mxu1 %v444_v8  ;;  %v461_v27 = vld [vmem:[%s586_s0] ss:$12 sps:$4 sm:$0xff]  }
   0xc   :  { %389 = vmatpush3.bf16.msra.mxu0 %v445_v9  ;;  %421 = vmatprep.subr.bf16.mxu1 %v465_v0  ;;  %v383_v38 = vld [vmem:[%s588_s3] ss:$0 sm:$0xff] }
   0xd   :  { %390 = vmatprep.subr.bf16.mxu0 %v446_v10 }
   0xf   :  { %422 = vmatpush3.bf16.msra.mxu1 %v447_v11 }
  0x10   :  { %391 = vmatpush3.bf16.msra.mxu0 %v448_v12  ;;  %423 = vmatprep.subr.bf16.mxu1 %v465_v0 }
  0x11   :  { %392 = vmatprep.subr.bf16.mxu0 %v449_v13 }
  0x13   :  { %424 = vmatpush3.bf16.msra.mxu1 %v450_v14 }
  0x14   :  { %393 = vmatpush3.bf16.msra.mxu0 %v451_v15  ;;  %425 = vmatprep.subr.bf16.mxu1 %v465_v0 }
  0x15   :  { %394 = vmatprep.subr.bf16.mxu0 %v452_v16 }
  0x17   :  { %426 = vmatpush3.bf16.msra.mxu1 %v453_v17 }
  0x18   :  { %395 = vmatpush3.bf16.msra.mxu0 %v454_v18  ;;  %427 = vmatprep.subr.bf16.mxu1 %v465_v0 }
  0x19   :  { %396 = vmatprep.subr.bf16.mxu0 %v455_v19 }
  0x1b   :  { %428 = vmatpush3.bf16.msra.mxu1 %v456_v20 }
  0x1c   :  { %397 = vmatpush3.bf16.msra.mxu0 %v457_v21  ;;  %429 = vmatprep.subr.bf16.mxu1 %v465_v0 }
  0x1d   :  { %398 = vmatprep.subr.bf16.mxu0 %v458_v22 }
  0x1f   :  { %430 = vmatpush3.bf16.msra.mxu1 %v459_v24 }
  0x20   :  { %399 = vmatpush3.bf16.msra.mxu0 %v460_v25 }
  0x22   :  { %432 = vmatmul.mubr.bf16.vlgmr.msra.gmra.mxu1 %v464_v26 }
  0x23   :  { %271 = vmatmul.mubr.bf16.vlgmr.msra.gmra.mxu0 %v461_v27 }
  0xe2   :  { %v313_v28 = vpop.f32.mrf.mxu1 }
  0xe3   :  { %v400_v29 = vpop.f32.mrf.mxu0 }
  0xe4   :  { %v433_v30 = vpop.f32.mrf.mxu1 }
  0xe5   :  { %v401_v31 = vpop.f32.mrf.mxu0 }
  0xe6   :  { %v402_v32 = vadd.f32 %v401_v31, %v400_v29  ;;  %v316_v33 = vpop.f32.mrf.mxu1 }
  0xe7   :  { %v403_v35 = vpop.f32.mrf.mxu0 }
  0xe8   :  { %v314_v36 = vadd.f32 %v402_v32, %v313_v28  ;;  %v434_v37 = vpop.f32.mrf.mxu1 }
  0xe9   :  { %v404_v39 = vpop.f32.mrf.mxu0 }
  0xea   :  { %v336_v40 = vmul.f32 %v382_v34, %v314_v36  ;;  %v405_v41 = vadd.f32 %v404_v39, %v403_v35 }
  0xec   :  { %v345_v42 = vadd.f32 %v383_v38, %v336_v40  ;;  %v317_v43 = vadd.f32 %v405_v41, %v316_v33 }
  0xee   :  { %v347_v44 = vmax.f32 %v345_v42, 0.0  ;;  %v337_v45 = vmul.f32 %v382_v34, %v317_v43 }
  0xf0   :  { %349 = vst [vmem:[%s589_s4] sm:$0xff] %v347_v44  ;;  %v346_v46 = vadd.f32 %v383_v38, %v337_v45 }
  0xf2   :  { %v348_v47 = vmax.f32 %v346_v46, 0.0 }
  0xf4   :  { %350 = vst [vmem:[%s589_s4 + $0x8] sm:$0xff] %v348_v47 }

// kernel: modified_resnet_forward.65
= control target key start
LH: loop header
LB: loop body
LE: loop exit
PB: predicated region body
PF: predicated region fallthrough
CT: control target
= control target key end

     0   :  { %s995_s1 = inlined_call_operand.vmem [shape: bf16[512,256], index: 1, kind: input, shape index: {}]   ;;  %s996_s0 = inlined_call_operand.vmem [shape: bf16[16,512], index: 0, kind: input, shape index: {}]   ;;  %s997_s2 = inlined_call_operand.vmem [shape: f32[1,256], index: 2, kind: input, shape index: {}]   ;;  %s998_s3 = inlined_call_operand.vmem [shape: f32[1,256], index: 3, kind: input, shape index: {}]   ;;  %s999_s4 = inlined_call_operand.vmem [shape: f32[16,256], index: 4, kind: output, shape index: {}]  }
   0x1   :  { %v646_v0 = vld [vmem:[%s995_s1 + $0x74] ss:$8 sps:$4 sm:$0xff]   ;;  %v650_v2 = vld [vmem:[%s995_s1 + $0x70] ss:$8 sps:$4 sm:$0xff]   ;;  %v652_v4 = vld [vmem:[%s995_s1 + $0x64] ss:$8 sps:$4 sm:$0xff]  }
   0x2   :  { %v648_v1 = vld [vmem:[%s995_s1 + $0x174] ss:$8 sps:$4 sm:$0xff]   ;;  %437 = vmatprep.subr.bf16.mxu0 %v646_v0  ;;  %v651_v3 = vld [vmem:[%s995_s1 + $0x170] ss:$8 sps:$4 sm:$0xff]   ;;  %v654_v5 = vld [vmem:[%s995_s1 + $0x164] ss:$8 sps:$4 sm:$0xff]  }
   0x3   :  { %480 = vmatprep.subr.bf16.mxu1 %v648_v1  ;;  %438 = vmatpush1.bf16.msra.mxu0 %v650_v2  ;;  %v656_v6 = vld [vmem:[%s995_s1 + $0x60] ss:$8 sps:$4 sm:$0xff]   ;;  %v658_v8 = vld [vmem:[%s995_s1 + $0x54] ss:$8 sps:$4 sm:$0xff]   ;;  %v662_v10 = vld [vmem:[%s995_s1 + $0x50] ss:$8 sps:$4 sm:$0xff]  }
   0x4   :  { %481 = vmatpush1.bf16.msra.mxu1 %v651_v3  ;;  %439 = vmatprep.subr.bf16.mxu0 %v652_v4  ;;  %v657_v7 = vld [vmem:[%s995_s1 + $0x160] ss:$8 sps:$4 sm:$0xff]   ;;  %v660_v9 = vld [vmem:[%s995_s1 + $0x154] ss:$8 sps:$4 sm:$0xff]   ;;  %v663_v11 = vld [vmem:[%s995_s1 + $0x150] ss:$8 sps:$4 sm:$0xff]   ;;  %v540_v4 = vlaneseq }
   0x5   :  { %482 = vmatprep.subr.bf16.mxu1 %v654_v5  ;;  %v664_v12 = vld [vmem:[%s995_s1 + $0x44] ss:$8 sps:$4 sm:$0xff]   ;;  %v668_v14 = vld [vmem:[%s995_s1 + $0x40] ss:$8 sps:$4 sm:$0xff]   ;;  %v670_v16 = vld [vmem:[%s995_s1 + $0x34] ss:$8 sps:$4 sm:$0xff]  }
   0x6   :  { %v666_v13 = vld [vmem:[%s995_s1 + $0x144] ss:$8 sps:$4 sm:$0xff]   ;;  %v669_v15 = vld [vmem:[%s995_s1 + $0x140] ss:$8 sps:$4 sm:$0xff]   ;;  %v672_v17 = vld [vmem:[%s995_s1 + $0x134] ss:$8 sps:$4 sm:$0xff]  }
   0x7   :  { %440 = vmatpush1.bf16.msra.mxu0 %v656_v6  ;;  %v674_v18 = vld [vmem:[%s995_s1 + $0x30] ss:$8 sps:$4 sm:$0xff]   ;;  %v676_v20 = vld [vmem:[%s995_s1 + $0x24] ss:$8 sps:$4 sm:$0xff]   ;;  %v680_v22 = vld [vmem:[%s995_s1 + $0x20] ss:$8 sps:$4 sm:$0xff]  }
   0x8   :  { %483 = vmatpush1.bf16.msra.mxu1 %v657_v7  ;;  %441 = vmatprep.subr.bf16.mxu0 %v658_v8  ;;  %v675_v19 = vld [vmem:[%s995_s1 + $0x130] ss:$8 sps:$4 sm:$0xff]   ;;  %v678_v21 = vld [vmem:[%s995_s1 + $0x124] ss:$8 sps:$4 sm:$0xff]   ;;  %v681_v23 = vld [vmem:[%s995_s1 + $0x120] ss:$8 sps:$4 sm:$0xff]  }
   0x9   :  { %484 = vmatprep.subr.bf16.mxu1 %v660_v9  ;;  %v682_v24 = vld [vmem:[%s995_s1 + $0x14] ss:$8 sps:$4 sm:$0xff]   ;;  %v686_v26 = vld [vmem:[%s995_s1 + $0x10] ss:$8 sps:$4 sm:$0xff]   ;;  %v688_v28 = vld [vmem:[%s995_s1 + $0x4] ss:$8 sps:$4 sm:$0xff]  }
   0xa   :  { %v684_v25 = vld [vmem:[%s995_s1 + $0x114] ss:$8 sps:$4 sm:$0xff]   ;;  %v687_v27 = vld [vmem:[%s995_s1 + $0x110] ss:$8 sps:$4 sm:$0xff]   ;;  %v690_v29 = vld [vmem:[%s995_s1 + $0x104] ss:$8 sps:$4 sm:$0xff]  }
   0xb   :  { %442 = vmatpush1.bf16.msra.mxu0 %v662_v10  ;;  %v692_v30 = vld [vmem:[%s995_s1] ss:$8 sps:$4 sm:$0xff]   ;;  %v694_v32 = vld [vmem:[%s995_s1 + $0xf4] ss:$8 sps:$4 sm:$0xff]   ;;  %v698_v34 = vld [vmem:[%s995_s1 + $0xf0] ss:$8 sps:$4 sm:$0xff]  }
   0xc   :  { %485 = vmatpush1.bf16.msra.mxu1 %v663_v11  ;;  %443 = vmatprep.subr.bf16.mxu0 %v664_v12  ;;  %v693_v31 = vld [vmem:[%s995_s1 + $0x100] ss:$8 sps:$4 sm:$0xff]   ;;  %v696_v33 = vld [vmem:[%s995_s1 + $0x1f4] ss:$8 sps:$4 sm:$0xff]   ;;  %v699_v35 = vld [vmem:[%s995_s1 + $0x1f0] ss:$8 sps:$4 sm:$0xff]  }
   0xd   :  { %486 = vmatprep.subr.bf16.mxu1 %v666_v13  ;;  %v700_v36 = vld [vmem:[%s995_s1 + $0xe4] ss:$8 sps:$4 sm:$0xff]   ;;  %v704_v38 = vld [vmem:[%s995_s1 + $0xe0] ss:$8 sps:$4 sm:$0xff]   ;;  %v706_v40 = vld [vmem:[%s995_s1 + $0xd4] ss:$8 sps:$4 sm:$0xff]  }
   0xe   :  { %v702_v37 = vld [vmem:[%s995_s1 + $0x1e4] ss:$8 sps:$4 sm:$0xff]   ;;  %v705_v39 = vld [vmem:[%s995_s1 + $0x1e0] ss:$8 sps:$4 sm:$0xff]   ;;  %v708_v41 = vld [vmem:[%s995_s1 + $0x1d4] ss:$8 sps:$4 sm:$0xff]  }
   0xf   :  { %444 = vmatpush1.bf16.msra.mxu0 %v668_v14  ;;  %v710_v42 = vld [vmem:[%s995_s1 + $0xd0] ss:$8 sps:$4 sm:$0xff]   ;;  %v712_v44 = vld [vmem:[%s995_s1 + $0xc4] ss:$8 sps:$4 sm:$0xff]   ;;  %v716_v46 = vld [vmem:[%s995_s1 + $0xc0] ss:$8 sps:$4 sm:$0xff]  }
  0x10   :  { %487 = vmatpush1.bf16.msra.mxu1 %v669_v15  ;;  %445 = vmatprep.subr.bf16.mxu0 %v670_v16  ;;  %v711_v43 = vld [vmem:[%s995_s1 + $0x1d0] ss:$8 sps:$4 sm:$0xff]   ;;  %v714_v45 = vld [vmem:[%s995_s1 + $0x1c4] ss:$8 sps:$4 sm:$0xff]   ;;  %v717_v48 = vld [vmem:[%s995_s1 + $0x1c0] ss:$8 sps:$4 sm:$0xff]  }
  0x11   :  { %488 = vmatprep.subr.bf16.mxu1 %v672_v17  ;;  %v744_v47 = vld [vmem:[%s996_s0 + $0x4] ss:$16 sps:$4 sm:$0xff]   ;;  %v747_v51 = vld [vmem:[%s996_s0 + $0xc] ss:$16 sps:$4 sm:$0xff]   ;;  %v722_v52 = vld [vmem:[%s995_s1 + $0xb0] ss:$8 sps:$4 sm:$0xff]  }
  0x12   :  { %v718_v49 = vld [vmem:[%s995_s1 + $0xb4] ss:$8 sps:$4 sm:$0xff]   ;;  %469 = vmatprep.mubr.bf16.mxu0 %v744_v47  ;;  %512 = vmatprep.mubr.bf16.mxu1 %v747_v51  ;;  %v723_v53 = vld [vmem:[%s995_s1 + $0x1b0] ss:$8 sps:$4 sm:$0xff]   ;;  %v724_v54 = vld [vmem:[%s995_s1 + $0xa4] ss:$8 sps:$4 sm:$0xff]  }
  0x13   :  { %446 = vmatpush1.bf16.msra.mxu0 %v674_v18  ;;  %v720_v50 = vld [vmem:[%s995_s1 + $0x1b4] ss:$8 sps:$4 sm:$0xff]   ;;  %v726_v55 = vld [vmem:[%s995_s1 + $0x1a4] ss:$8 sps:$4 sm:$0xff]   ;;  %v728_v56 = vld [vmem:[%s995_s1 + $0xa0] ss:$8 sps:$4 sm:$0xff]  }
  0x14   :  { %489 = vmatpush1.bf16.msra.mxu1 %v675_v19  ;;  %447 = vmatprep.subr.bf16.mxu0 %v676_v20  ;;  %v729_v57 = vld [vmem:[%s995_s1 + $0x1a0] ss:$8 sps:$4 sm:$0xff]   ;;  %v730_v58 = vld [vmem:[%s995_s1 + $0x94] ss:$8 sps:$4 sm:$0xff]   ;;  %v734_v60 = vld [vmem:[%s995_s1 + $0x90] ss:$8 sps:$4 sm:$0xff]  }
  0x15   :  { %490 = vmatprep.subr.bf16.mxu1 %v678_v21  ;;  %v732_v59 = vld [vmem:[%s995_s1 + $0x194] ss:$8 sps:$4 sm:$0xff]   ;;  %v735_v61 = vld [vmem:[%s995_s1 + $0x190] ss:$8 sps:$4 sm:$0xff]   ;;  %v736_v62 = vld [vmem:[%s995_s1 + $0x84] ss:$8 sps:$4 sm:$0xff]  }
  0x16   :  { %v738_v63 = vld [vmem:[%s995_s1 + $0x184] ss:$8 sps:$4 sm:$0xff]   ;;  %v740_v0 = vld [vmem:[%s995_s1 + $0x80] ss:$8 sps:$4 sm:$0xff]   ;;  %v541_v5 = vshrl.u32 %v540_v4, 7 }
  0x17   :  { %448 = vmatpush1.bf16.msra.mxu0 %v680_v22  ;;  %v741_v1 = vld [vmem:[%s995_s1 + $0x180] ss:$8 sps:$4 sm:$0xff]  }
  0x18   :  { %491 = vmatpush1.bf16.msra.mxu1 %v681_v23  ;;  %449 = vmatprep.subr.bf16.mxu0 %v682_v24  ;;  %v742_v2 = vld [vmem:[%s996_s0] ss:$16 sps:$4 sm:$0xff]   ;;  %v745_v3 = vld [vmem:[%s996_s0 + $0x8] ss:$16 sps:$4 sm:$0xff]   ;;  %v542_v6 = vsub.s32 0, %v541_v5  ;;  %v546_v8 = vsub.s32 1, %v541_v5 }
  0x19   :  { %492 = vmatprep.subr.bf16.mxu1 %v684_v25  ;;  %v538_v7 = vld [vmem:[%s997_s2] sm:$0x3] }
  0x1a   :  { %v554_v9 = vld [vmem:[%s998_s3] sm:$0x3]  ;;  %v543_v10 = vrot.slane %v538_v7, %v542_v6  ;;  %v547_v15 = vrot.slane %v538_v7, %v546_v8 }
  0x1b   :  { %450 = vmatpush1.bf16.msra.mxu0 %v686_v26  ;;  %v559_v14 = vrot.slane %v554_v9, %v542_v6  ;;  %v563_v20 = vrot.slane %v554_v9, %v546_v8 }
  0x1c   :  { %493 = vmatpush1.bf16.msra.mxu1 %v687_v27  ;;  %451 = vmatprep.subr.bf16.mxu0 %v688_v28 }
  0x1d   :  { %494 = vmatprep.subr.bf16.mxu1 %v690_v29 }
  0x1f   :  { %452 = vmatpush1.bf16.msra.mxu0 %v692_v30 }
  0x20   :  { %495 = vmatpush1.bf16.msra.mxu1 %v693_v31  ;;  %453 = vmatprep.subr.bf16.mxu0 %v694_v32 }
  0x21   :  { %496 = vmatprep.subr.bf16.mxu1 %v696_v33 }
  0x23   :  { %454 = vmatpush2.bf16.msra.mxu0 %v698_v34 }
  0x24   :  { %497 = vmatpush2.bf16.msra.mxu1 %v699_v35  ;;  %455 = vmatprep.subr.bf16.mxu0 %v700_v36 }
  0x25   :  { %498 = vmatprep.subr.bf16.mxu1 %v702_v37 }
  0x27   :  { %456 = vmatpush2.bf16.msra.mxu0 %v704_v38 }
  0x28   :  { %499 = vmatpush2.bf16.msra.mxu1 %v705_v39  ;;  %457 = vmatprep.subr.bf16.mxu0 %v706_v40 }
  0x29   :  { %500 = vmatprep.subr.bf16.mxu1 %v708_v41 }
  0x2b   :  { %458 = vmatpush2.bf16.msra.mxu0 %v710_v42 }
  0x2c   :  { %501 = vmatpush2.bf16.msra.mxu1 %v711_v43  ;;  %459 = vmatprep.subr.bf16.mxu0 %v712_v44 }
  0x2d   :  { %502 = vmatprep.subr.bf16.mxu1 %v714_v45 }
  0x2f   :  { %460 = vmatpush2.bf16.msra.mxu0 %v716_v46 }
  0x30   :  { %503 = vmatpush2.bf16.msra.mxu1 %v717_v48  ;;  %461 = vmatprep.subr.bf16.mxu0 %v718_v49 }
  0x31   :  { %504 = vmatprep.subr.bf16.mxu1 %v720_v50 }
  0x33   :  { %462 = vmatpush2.bf16.msra.mxu0 %v722_v52 }
  0x34   :  { %505 = vmatpush2.bf16.msra.mxu1 %v723_v53  ;;  %463 = vmatprep.subr.bf16.mxu0 %v724_v54 }
  0x35   :  { %506 = vmatprep.subr.bf16.mxu1 %v726_v55 }
  0x37   :  { %464 = vmatpush2.bf16.msra.mxu0 %v728_v56 }
  0x38   :  { %507 = vmatpush2.bf16.msra.mxu1 %v729_v57  ;;  %465 = vmatprep.subr.bf16.mxu0 %v730_v58 }
  0x39   :  { %508 = vmatprep.subr.bf16.mxu1 %v732_v59 }
  0x3b   :  { %466 = vmatpush2.bf16.msra.mxu0 %v734_v60 }
  0x3c   :  { %509 = vmatpush2.bf16.msra.mxu1 %v735_v61  ;;  %467 = vmatprep.subr.bf16.mxu0 %v736_v62 }
  0x3d   :  { %510 = vmatprep.subr.bf16.mxu1 %v738_v63 }
  0x3f   :  { %468 = vmatpush2.bf16.msra.mxu0 %v740_v0 }
  0x40   :  { %511 = vmatpush2.bf16.msra.mxu1 %v741_v1 }
  0x42   :  { %470 = vmatmul.mubr.bf16.vlgmr.msra.gmra.mxu0 %v742_v2 }
  0x43   :  { %513 = vmatmul.mubr.bf16.vlgmr.msra.gmra.mxu1 %v745_v3 }
 0x102   :  { %v471_v11 = vpop.f32.mrf.mxu0 }
 0x103   :  { %v514_v12 = vpop.f32.mrf.mxu1 }
 0x104   :  { %v515_v13 = vadd.f32 %v514_v12, %v471_v11  ;;  %v473_v16 = vpop.f32.mrf.mxu0 }
 0x105   :  { %v516_v17 = vpop.f32.mrf.mxu1 }
 0x106   :  { %v550_v18 = vmul.f32 %v543_v10, %v515_v13  ;;  %v517_v19 = vadd.f32 %v516_v17, %v473_v16  ;;  %v475_v21 = vpop.f32.mrf.mxu0 }
 0x107   :  { %v518_v22 = vpop.f32.mrf.mxu1 }
 0x108   :  { %v566_v23 = vadd.f32 %v559_v14, %v550_v18  ;;  %v551_v24 = vmul.f32 %v547_v15, %v517_v19  ;;  %v519_v25 = vadd.f32 %v518_v22, %v475_v21  ;;  %v477_v26 = vpop.f32.mrf.mxu0 }
 0x109   :  { %v520_v27 = vpop.f32.mrf.mxu1 }
 0x10a   :  { %570 = vst [vmem:[%s999_s4] sm:$0xff] %v566_v23  ;;  %v567_v28 = vadd.f32 %v563_v20, %v551_v24  ;;  %v552_v29 = vmul.f32 %v543_v10, %v519_v25  ;;  %v521_v30 = vadd.f32 %v520_v27, %v477_v26 }
 0x10c   :  { %571 = vst [vmem:[%s999_s4 + $0x8] sm:$0xff] %v567_v28  ;;  %v568_v31 = vadd.f32 %v559_v14, %v552_v29  ;;  %v553_v32 = vmul.f32 %v547_v15, %v521_v30 }
 0x10e   :  { %572 = vst [vmem:[%s999_s4 + $0x10] sm:$0xff] %v568_v31  ;;  %v569_v33 = vadd.f32 %v563_v20, %v553_v32 }
 0x110   :  { %573 = vst [vmem:[%s999_s4 + $0x18] sm:$0xff] %v569_v33 }

// kernel: modified_resnet_forward.64
= control target key start
LH: loop header
LB: loop body
LE: loop exit
PB: predicated region body
PF: predicated region fallthrough
CT: control target
= control target key end

     0   :  { %s793_s15 = smov 0   ;;  %s795_s16 = smov 0   ;;  %s887_s0 = inlined_call_operand.vmem [shape: bf16[16,640], index: 0, kind: input, shape index: {}]   ;;  %s888_s1 = inlined_call_operand.vmem [shape: bf16[640,128], index: 1, kind: input, shape index: {}]   ;;  %s889_s2 = inlined_call_operand.vmem [shape: f32[1,128], index: 2, kind: input, shape index: {}]   ;;  %s890_s3 = inlined_call_operand.vmem [shape: f32[1,128], index: 3, kind: input, shape index: {}]   ;;  %s891_s4 = inlined_call_operand.vmem [shape: f32[16,128], index: 4, kind: output, shape index: {}]  }
   0x1   :  { %s797_s17 = smov 0   ;;  %s799_s18 = smov 0  }
   0x2   :  { %s801_s19 = smov 0  }
   0x3 LB: > { %s26_s20 = sadd.s32 1, %s759_s18  ;;  %p49_p1 = scmp.ne.s32.totalorder %s751_s16, %s747_s15  ;;  %s763_s19 = sphi %s801_s19, %s14_s19   ;;  %s759_s18 = sphi %s799_s18, %s895_s18   ;;  %s755_s17 = sphi %s797_s17, %s894_s17   ;;  %s751_s16 = sphi %s795_s16, %s893_s16   ;;  %s747_s15 = sphi %s793_s15, %s892_s15  }
   0x4   : > { %p27_p0 = scmp.ge.s32.totalorder %s26_s20, 5  ;;  %p50_p2 = scmp.eq.s32.totalorder %s763_s19, 0 }
   0x5   : > { %s42_s22 = sadd.s32 1, %s751_s16  ;;  %p620_p5 = scmp.ge.s32.totalorder %s763_s19, 5 }
   0x6   : > { %s897_s20 = smov (%p27_p0, %s26_s20), 0  ;;  %p51_p3 = por %p50_p2, %p49_p1 }
   0x7   : > { %s38_s21 = ssub.s32 %s759_s18, %s897_s20  ;;  %195 = sbr.rel (%p620_p5) target bundleno = 17 (0x11), region = 24 }
   0x8   : > { %p40_p4 = scmp.eq.s32.totalorder %s38_s21, 0 }
   0xa   : > { %s828_s23 = scalar_select %p40_p4, %s751_s16, %s42_s22  }
   0xc   : > { %198 = sbr.rel (!%p51_p3) target bundleno = 17 (0x11), region = 28  ;;  %s200_s24 = sand.u32 (%p51_p3), 1, %s751_s16  }
   0xd   : > { %s622_s25 = sshll.u32 (%p51_p3), %s759_s18, 2  ;;  %s621_s26 = sshll.u32 (%p51_p3), %s200_s24, 3 }
   0xe   : > { %s207_s29 = scalar_lea.vmem (%p51_p3), %s887_s0, %s622_s25  ;;  %s202_s30 = scalar_lea.vmem (%p51_p3), [#allocation3], %s621_s26 }
   0xf   : > { %v224_v0 = vld [vmem:[%s207_s29] sm:$0xf] (%p51_p3)  ;;  %v226_v1 = vld [vmem:[%s207_s29 + $0x14] sm:$0xf] (%p51_p3) }
  0x10   : > { %225 = vst [vmem:[%s202_s30] sm:$0xf] (%p51_p3), %v224_v0  ;;  %227 = vst [vmem:[%s202_s30 + $0x4] sm:$0xf] (%p51_p3), %v226_v1 }
  0x11 PF: > { %p623_p6 = scmp.ge.s32.totalorder %s763_s19, 1  ;;  %p266_p7 = scmp.lt.s32.totalorder %s763_s19, 6 }
  0x13   : > { %p267_p8 = pnand %p623_p6, %p266_p7 }
  0x14   : > { %s273_s5 = sand.u32 (!%p267_p8), 1, %s747_s15   ;;  %s625_s6 = sshll.u32 (!%p267_p8), %s755_s17, 4 }
  0x15   : > { %270 = sbr.rel (%p267_p8) target bundleno = 280 (0x118), region = 73  ;;  %s840_s7 = sshll.u32 (!%p267_p8), %s273_s5, 3 }
  0x16   : > { %p317_p9 = scmp.lt.s32.totalorder (!%p267_p8), %s625_s6, 79  ;;  %s275_s12 = scalar_lea.vmem (!%p267_p8), [#allocation3], %s840_s7 }
  0x17   : > { %p627_p10 = scmp.ne.s32.totalorder (!%p267_p8), %s755_s17, 0 }
  0x1a   : > { %s899_s6 = smov (!%p317_p9, %s625_s6), 79  ;;  %344 = sbr.rel (%p627_p10) target bundleno = 33 (0x21), region = 81 }
  0x1b   : > { %s626_s8 = sshll.u32 %s899_s6, 2 }
  0x1c   : > { %s845_s11 = scalar_lea.vmem %s888_s1, %s626_s8 }
  0x1f   : > { %v765_v2 = vmov 0.0  }
  0x20   : > { %345 = vst [vmem:[#allocation2] sm:$0xff] %v765_v2  ;;  %346 = vst [vmem:[#allocation2 + $0x8] sm:$0xff] %v765_v2 }
  0x21 PF: > { %v716_v3 = vld [vmem:[%s845_s11 + $0x38] sm:$0xff]   ;;  %v766_v4 = vmov 0.0   ;;  %v717_v5 = vld [vmem:[%s845_s11 + $0x30] sm:$0xff]   ;;  %vm767_vm0 = vmmov 0   ;;  %v718_v6 = vld [vmem:[%s845_s11 + $0x28] sm:$0xff]   ;;  %p637_p11 = scmp.ne.s32.totalorder %s755_s17, 4 }
  0x22   : > { %653 = vmatprep.subr.bf16.mxu0 %v766_v4  ;;  %669 = vmatprep.mubr.msk.bf16.mxu0 %vm767_vm0, %v766_v4  ;;  %v719_v7 = vld [vmem:[%s845_s11 + $0x20] sm:$0xff]   ;;  %v720_v8 = vld [vmem:[%s845_s11 + $0x18] sm:$0xff]   ;;  %v721_v9 = vld [vmem:[%s845_s11 + $0x10] sm:$0xff]  }
  0x23   : > { %654 = vmatpush3.bf16.msra.mxu0 %v716_v3  ;;  %v722_v10 = vld [vmem:[%s845_s11 + $0x8] sm:$0xff]   ;;  %v723_v11 = vld [vmem:[%s845_s11] sm:$0xff]   ;;  %v724_v12 = vld [vmem:[%s275_s12] sm:$0xff]  }
  0x24   : > { %655 = vmatprep.subr.bf16.mxu0 %v766_v4 }
  0x27   : > { %656 = vmatpush3.bf16.msra.mxu0 %v717_v5  ;;  %v347_v13 = vld [vmem:[#allocation2] sm:$0xff]  ;;  %v348_v17 = vld [vmem:[#allocation2 + $0x8] sm:$0xff] }
  0x28   : > { %657 = vmatprep.subr.bf16.mxu0 %v766_v4 }
  0x2b   : > { %658 = vmatpush3.bf16.msra.mxu0 %v718_v6 }
  0x2c   : > { %659 = vmatprep.subr.bf16.mxu0 %v766_v4 }
  0x2f   : > { %660 = vmatpush3.bf16.msra.mxu0 %v719_v7 }
  0x30   : > { %661 = vmatprep.subr.bf16.mxu0 %v766_v4 }
  0x33   : > { %662 = vmatpush3.bf16.msra.mxu0 %v720_v8 }
  0x34   : > { %663 = vmatprep.subr.bf16.mxu0 %v766_v4 }
  0x37   : > { %664 = vmatpush3.bf16.msra.mxu0 %v721_v9 }
  0x38   : > { %665 = vmatprep.subr.bf16.mxu0 %v766_v4 }
  0x3b   : > { %666 = vmatpush3.bf16.msra.mxu0 %v722_v10 }
  0x3c   : > { %667 = vmatprep.subr.bf16.mxu0 %v766_v4 }
  0x3f   : > { %668 = vmatpush3.bf16.msra.mxu0 %v723_v11 }
  0x42   : > { %670 = vmatmul.mubr.bf16.vlgmr.msra.gmra.mxu0 %v724_v12 }
 0x102   : > { %v455_v14 = vpop.f32.mrf.mxu0 }
 0x103   : > { %v462_v15 = vadd.f32 %v455_v14, %v347_v13 }
 0x104   : > { %v671_v16 = vpop.f32.mrf.mxu0 }
 0x105   : > { %464 = vst [vmem:[#allocation2] sm:$0xff] %v462_v15  ;;  %469 = sbr.rel (%p637_p11) target bundleno = 280 (0x118), region = 85 }
 0x106   : > { %v458_v18 = vpop.f32.mrf.mxu0 }
 0x107   : > { %v463_v19 = vadd.f32 %v458_v18, %v348_v17 }
 0x108   : > { %v672_v20 = vpop.f32.mrf.mxu0 }
 0x109   : > { %465 = vst [vmem:[#allocation2 + $0x8] sm:$0xff] %v463_v19 }
 0x10a   : > { %v638_v22 = vld [vmem:[%s889_s2] ss:$0 sm:$0xff] }
 0x10b   : > { %v639_v23 = vld [vmem:[%s890_s3] ss:$0 sm:$0xff] }
 0x10c   : > { %v470_v21 = vld [vmem:[#allocation2] sm:$0xff] }
 0x10d   : > { %v479_v24 = vmul.f32 %v638_v22, %v470_v21 }
 0x10f   : > { %v488_v27 = vadd.f32 %v639_v23, %v479_v24 }
 0x110   : > { %v471_v25 = vld [vmem:[#allocation2 + $0x8] sm:$0xff] }
 0x111   : > { %v480_v26 = vmul.f32 %v638_v22, %v471_v25  ;;  %v490_v29 = vmax.f32 %v488_v27, 0.0 }
 0x113   : > { %v489_v28 = vadd.f32 %v639_v23, %v480_v26  ;;  %492 = vst [vmem:[%s891_s4] sm:$0xff] %v490_v29 }
 0x115   : > { %v491_v30 = vmax.f32 %v489_v28, 0.0 }
 0x117   : > { %493 = vst [vmem:[%s891_s4 + $0x8] sm:$0xff] %v491_v30 }
 0x118 PF: > { %s14_s19 = sadd.s32 1, %s763_s19   ;;  %s892_s15 = smov %s751_s16 }
 0x119   : > { %p11_p12 = scmp.ge.s32.totalorder %s14_s19, 7   ;;  %s893_s16 = smov %s828_s23 }
 0x11a   : > { %s894_s17 = smov %s759_s18  ;;  %s895_s18 = smov %s897_s20 }
 0x11b   :  { %13 = sbr.rel (!%p11_p12) target bundleno = 3 (0x3), region = 129 }

// kernel: modified_resnet_forward.66
= control target key start
LH: loop header
LB: loop body
LE: loop exit
PB: predicated region body
PF: predicated region fallthrough
CT: control target
= control target key end

     0   :  { %v296_v34 = vlaneseq  ;;  %s593_s1 = inlined_call_operand.vmem [shape: bf16[256,256], index: 1, kind: input, shape index: {}]   ;;  %s594_s0 = inlined_call_operand.vmem [shape: bf16[16,256], index: 0, kind: input, shape index: {}]   ;;  %s595_s2 = inlined_call_operand.vmem [shape: f32[1,256], index: 2, kind: input, shape index: {}]   ;;  %s596_s3 = inlined_call_operand.vmem [shape: f32[1,256], index: 3, kind: input, shape index: {}]   ;;  %s597_s4 = inlined_call_operand.vmem [shape: f32[16,256], index: 4, kind: input, shape index: {}]   ;;  %s598_s5 = inlined_call_operand.vmem [shape: f32[16,256], index: 5, kind: output, shape index: {}]  }
   0x1   :  { %v380_v0 = vld [vmem:[%s593_s1 + $0x74] ss:$8 sps:$4 sm:$0xff]   ;;  %v382_v1 = vld [vmem:[%s593_s1 + $0x70] ss:$8 sps:$4 sm:$0xff]   ;;  %v383_v2 = vld [vmem:[%s593_s1 + $0x64] ss:$8 sps:$4 sm:$0xff]  }
   0x2   :  { %236 = vmatprep.subr.bf16.mxu0 %v380_v0  ;;  %v385_v3 = vld [vmem:[%s593_s1 + $0x60] ss:$8 sps:$4 sm:$0xff]   ;;  %v386_v4 = vld [vmem:[%s593_s1 + $0x54] ss:$8 sps:$4 sm:$0xff]   ;;  %v388_v5 = vld [vmem:[%s593_s1 + $0x50] ss:$8 sps:$4 sm:$0xff]  }
   0x3   :  { %237 = vmatpush1.bf16.msra.mxu0 %v382_v1  ;;  %v389_v6 = vld [vmem:[%s593_s1 + $0x44] ss:$8 sps:$4 sm:$0xff]   ;;  %v391_v7 = vld [vmem:[%s593_s1 + $0x40] ss:$8 sps:$4 sm:$0xff]   ;;  %v392_v8 = vld [vmem:[%s593_s1 + $0x34] ss:$8 sps:$4 sm:$0xff]  }
   0x4   :  { %238 = vmatprep.subr.bf16.mxu0 %v383_v2  ;;  %v394_v9 = vld [vmem:[%s593_s1 + $0x30] ss:$8 sps:$4 sm:$0xff]   ;;  %v395_v10 = vld [vmem:[%s593_s1 + $0x24] ss:$8 sps:$4 sm:$0xff]   ;;  %v397_v11 = vld [vmem:[%s593_s1 + $0x20] ss:$8 sps:$4 sm:$0xff]  }
   0x5   :  { %v398_v12 = vld [vmem:[%s593_s1 + $0x14] ss:$8 sps:$4 sm:$0xff]   ;;  %v430_v13 = vld [vmem:[%s594_s0 + $0x4] ss:$8 sps:$4 sm:$0xff]   ;;  %v400_v14 = vld [vmem:[%s593_s1 + $0x10] ss:$8 sps:$4 sm:$0xff]  }
   0x6   :  { %v401_v15 = vld [vmem:[%s593_s1 + $0x4] ss:$8 sps:$4 sm:$0xff]   ;;  %268 = vmatprep.mubr.bf16.mxu0 %v430_v13  ;;  %v403_v16 = vld [vmem:[%s593_s1] ss:$8 sps:$4 sm:$0xff]   ;;  %v404_v17 = vld [vmem:[%s593_s1 + $0xf4] ss:$8 sps:$4 sm:$0xff]  }
   0x7   :  { %239 = vmatpush1.bf16.msra.mxu0 %v385_v3  ;;  %v406_v18 = vld [vmem:[%s593_s1 + $0xf0] ss:$8 sps:$4 sm:$0xff]   ;;  %v407_v19 = vld [vmem:[%s593_s1 + $0xe4] ss:$8 sps:$4 sm:$0xff]   ;;  %v409_v20 = vld [vmem:[%s593_s1 + $0xe0] ss:$8 sps:$4 sm:$0xff]  }
   0x8   :  { %240 = vmatprep.subr.bf16.mxu0 %v386_v4  ;;  %v410_v21 = vld [vmem:[%s593_s1 + $0xd4] ss:$8 sps:$4 sm:$0xff]   ;;  %v412_v22 = vld [vmem:[%s593_s1 + $0xd0] ss:$8 sps:$4 sm:$0xff]   ;;  %v413_v23 = vld [vmem:[%s593_s1 + $0xc4] ss:$8 sps:$4 sm:$0xff]  }
   0x9   :  { %v415_v24 = vld [vmem:[%s593_s1 + $0xc0] ss:$8 sps:$4 sm:$0xff]   ;;  %v416_v25 = vld [vmem:[%s593_s1 + $0xb4] ss:$8 sps:$4 sm:$0xff]   ;;  %v418_v26 = vld [vmem:[%s593_s1 + $0xb0] ss:$8 sps:$4 sm:$0xff]  }
   0xa   :  { %v419_v27 = vld [vmem:[%s593_s1 + $0xa4] ss:$8 sps:$4 sm:$0xff]   ;;  %v421_v28 = vld [vmem:[%s593_s1 + $0xa0] ss:$8 sps:$4 sm:$0xff]   ;;  %v422_v29 = vld [vmem:[%s593_s1 + $0x94] ss:$8 sps:$4 sm:$0xff]  }
   0xb   :  { %241 = vmatpush1.bf16.msra.mxu0 %v388_v5  ;;  %v424_v30 = vld [vmem:[%s593_s1 + $0x90] ss:$8 sps:$4 sm:$0xff]   ;;  %v425_v31 = vld [vmem:[%s593_s1 + $0x84] ss:$8 sps:$4 sm:$0xff]   ;;  %v427_v32 = vld [vmem:[%s593_s1 + $0x80] ss:$8 sps:$4 sm:$0xff]  }
   0xc   :  { %242 = vmatprep.subr.bf16.mxu0 %v389_v6  ;;  %v428_v33 = vld [vmem:[%s594_s0] ss:$8 sps:$4 sm:$0xff]   ;;  %v297_v35 = vshrl.u32 %v296_v34, 7  ;;  %v328_v55 = vld [vmem:[%s597_s4 + $0x10] sm:$0xff]  ;;  %v329_v61 = vld [vmem:[%s597_s4 + $0x18] sm:$0xff] }
   0xd   :  { %v294_v37 = vld [vmem:[%s595_s2] sm:$0x3]  ;;  %v327_v50 = vld [vmem:[%s597_s4 + $0x8] sm:$0xff] }
   0xe   :  { %v298_v36 = vsub.s32 0, %v297_v35  ;;  %v302_v38 = vsub.s32 1, %v297_v35  ;;  %v310_v39 = vld [vmem:[%s596_s3] sm:$0x3] }
   0xf   :  { %243 = vmatpush1.bf16.msra.mxu0 %v391_v7  ;;  %v326_v46 = vld [vmem:[%s597_s4] sm:$0xff] }
  0x10   :  { %244 = vmatprep.subr.bf16.mxu0 %v392_v8  ;;  %v299_v40 = vrot.slane %v294_v37, %v298_v36  ;;  %v315_v41 = vrot.slane %v310_v39, %v298_v36  ;;  %v303_v42 = vrot.slane %v294_v37, %v302_v38  ;;  %v319_v45 = vrot.slane %v310_v39, %v302_v38 }
  0x13   :  { %245 = vmatpush1.bf16.msra.mxu0 %v394_v9 }
  0x14   :  { %246 = vmatprep.subr.bf16.mxu0 %v395_v10 }
  0x17   :  { %247 = vmatpush1.bf16.msra.mxu0 %v397_v11 }
  0x18   :  { %248 = vmatprep.subr.bf16.mxu0 %v398_v12 }
  0x1b   :  { %249 = vmatpush1.bf16.msra.mxu0 %v400_v14 }
  0x1c   :  { %250 = vmatprep.subr.bf16.mxu0 %v401_v15 }
  0x1f   :  { %251 = vmatpush1.bf16.msra.mxu0 %v403_v16 }
  0x20   :  { %252 = vmatprep.subr.bf16.mxu0 %v404_v17 }
  0x23   :  { %253 = vmatpush2.bf16.msra.mxu0 %v406_v18 }
  0x24   :  { %254 = vmatprep.subr.bf16.mxu0 %v407_v19 }
  0x27   :  { %255 = vmatpush2.bf16.msra.mxu0 %v409_v20 }
  0x28   :  { %256 = vmatprep.subr.bf16.mxu0 %v410_v21 }
  0x2b   :  { %257 = vmatpush2.bf16.msra.mxu0 %v412_v22 }
  0x2c   :  { %258 = vmatprep.subr.bf16.mxu0 %v413_v23 }
  0x2f   :  { %259 = vmatpush2.bf16.msra.mxu0 %v415_v24 }
  0x30   :  { %260 = vmatprep.subr.bf16.mxu0 %v416_v25 }
  0x33   :  { %261 = vmatpush2.bf16.msra.mxu0 %v418_v26 }
  0x34   :  { %262 = vmatprep.subr.bf16.mxu0 %v419_v27 }
  0x37   :  { %263 = vmatpush2.bf16.msra.mxu0 %v421_v28 }
  0x38   :  { %264 = vmatprep.subr.bf16.mxu0 %v422_v29 }
  0x3b   :  { %265 = vmatpush2.bf16.msra.mxu0 %v424_v30 }
  0x3c   :  { %266 = vmatprep.subr.bf16.mxu0 %v425_v31 }
  0x3f   :  { %267 = vmatpush2.bf16.msra.mxu0 %v427_v32 }
  0x42   :  { %269 = vmatmul.mubr.bf16.vlgmr.msra.gmra.mxu0 %v428_v33 }
 0x102   :  { %v270_v43 = vpop.f32.mrf.mxu0 }
 0x103   :  { %v306_v44 = vmul.f32 %v299_v40, %v270_v43 }
 0x104   :  { %v272_v47 = vpop.f32.mrf.mxu0 }
 0x105   :  { %v322_v48 = vadd.f32 %v315_v41, %v306_v44  ;;  %v307_v49 = vmul.f32 %v303_v42, %v272_v47 }
 0x106   :  { %v274_v51 = vpop.f32.mrf.mxu0 }
 0x107   :  { %v330_v52 = vadd.f32 %v326_v46, %v322_v48  ;;  %v323_v53 = vadd.f32 %v319_v45, %v307_v49  ;;  %v308_v54 = vmul.f32 %v299_v40, %v274_v51 }
 0x108   :  { %v276_v56 = vpop.f32.mrf.mxu0 }
 0x109   :  { %v334_v57 = vmax.f32 %v330_v52, 0.0  ;;  %v331_v58 = vadd.f32 %v327_v50, %v323_v53  ;;  %v324_v59 = vadd.f32 %v315_v41, %v308_v54  ;;  %v309_v60 = vmul.f32 %v303_v42, %v276_v56 }
 0x10b   :  { %338 = vst [vmem:[%s598_s5] sm:$0xff] %v334_v57  ;;  %v335_v62 = vmax.f32 %v331_v58, 0.0  ;;  %v332_v63 = vadd.f32 %v328_v55, %v324_v59  ;;  %v325_v0 = vadd.f32 %v319_v45, %v309_v60 }
 0x10d   :  { %339 = vst [vmem:[%s598_s5 + $0x8] sm:$0xff] %v335_v62  ;;  %v336_v1 = vmax.f32 %v332_v63, 0.0  ;;  %v333_v2 = vadd.f32 %v329_v61, %v325_v0 }
 0x10f   :  { %340 = vst [vmem:[%s598_s5 + $0x10] sm:$0xff] %v336_v1  ;;  %v337_v3 = vmax.f32 %v333_v2, 0.0 }
 0x111   :  { %341 = vst [vmem:[%s598_s5 + $0x18] sm:$0xff] %v337_v3 }

// kernel: modified_resnet_forward.67
= control target key start
LH: loop header
LB: loop body
LE: loop exit
PB: predicated region body
PF: predicated region fallthrough
CT: control target
= control target key end

     0   :  { %s394_s1 = inlined_call_operand.vmem [shape: bf16[256,128], index: 1, kind: input, shape index: {}]   ;;  %s395_s0 = inlined_call_operand.vmem [shape: bf16[16,256], index: 0, kind: input, shape index: {}]   ;;  %s396_s2 = inlined_call_operand.vmem [shape: f32[1,128], index: 2, kind: input, shape index: {}]   ;;  %s397_s3 = inlined_call_operand.vmem [shape: f32[1,128], index: 3, kind: input, shape index: {}]   ;;  %s398_s4 = inlined_call_operand.vmem [shape: f32[16,128], index: 4, kind: output, shape index: {}]  }
   0x1   :  { %v284_v0 = vld [vmem:[%s394_s1 + $0x78] sm:$0xff]   ;;  %v286_v2 = vld [vmem:[%s394_s1 + $0x70] sm:$0xff]   ;;  %v288_v4 = vld [vmem:[%s394_s1 + $0x68] sm:$0xff]  }
   0x2   :  { %v285_v1 = vld [vmem:[%s394_s1 + $0x38] sm:$0xff]   ;;  %262 = vmatprep.subr.bf16.mxu0 %v284_v0  ;;  %v287_v3 = vld [vmem:[%s394_s1 + $0x30] sm:$0xff]   ;;  %v289_v5 = vld [vmem:[%s394_s1 + $0x28] sm:$0xff]  }
   0x3   :  { %263 = vmatpush3.bf16.msra.mxu0 %v285_v1  ;;  %v290_v6 = vld [vmem:[%s394_s1 + $0x60] sm:$0xff]   ;;  %v292_v8 = vld [vmem:[%s394_s1 + $0x58] sm:$0xff]   ;;  %v294_v10 = vld [vmem:[%s394_s1 + $0x50] sm:$0xff]  }
   0x4   :  { %264 = vmatprep.subr.bf16.mxu0 %v286_v2  ;;  %v291_v7 = vld [vmem:[%s394_s1 + $0x20] sm:$0xff]   ;;  %v293_v9 = vld [vmem:[%s394_s1 + $0x18] sm:$0xff]   ;;  %v295_v12 = vld [vmem:[%s394_s1 + $0x10] sm:$0xff]  }
   0x5   :  { %v302_v11 = vld [vmem:[%s395_s0 + $0x4] ss:$8 sps:$4 sm:$0xff]   ;;  %v300_v17 = vld [vmem:[%s395_s0] ss:$8 sps:$4 sm:$0xff]  }
   0x6   :  { %198 = vmatprep.mubr.bf16.mxu0 %v302_v11  ;;  %v296_v13 = vld [vmem:[%s394_s1 + $0x48] sm:$0xff]   ;;  %v298_v15 = vld [vmem:[%s394_s1 + $0x40] sm:$0xff]  }
   0x7   :  { %265 = vmatpush3.bf16.msra.mxu0 %v287_v3  ;;  %v297_v14 = vld [vmem:[%s394_s1 + $0x8] sm:$0xff]   ;;  %v299_v16 = vld [vmem:[%s394_s1] sm:$0xff]  }
   0x8   :  { %266 = vmatprep.subr.bf16.mxu0 %v288_v4  ;;  %v260_v20 = vld [vmem:[%s396_s2] ss:$0 sm:$0xff] }
   0x9   :  { %v261_v22 = vld [vmem:[%s397_s3] ss:$0 sm:$0xff] }
   0xb   :  { %267 = vmatpush3.bf16.msra.mxu0 %v289_v5 }
   0xc   :  { %268 = vmatprep.subr.bf16.mxu0 %v290_v6 }
   0xf   :  { %269 = vmatpush3.bf16.msra.mxu0 %v291_v7 }
  0x10   :  { %270 = vmatprep.subr.bf16.mxu0 %v292_v8 }
  0x13   :  { %271 = vmatpush3.bf16.msra.mxu0 %v293_v9 }
  0x14   :  { %272 = vmatprep.subr.bf16.mxu0 %v294_v10 }
  0x17   :  { %273 = vmatpush3.bf16.msra.mxu0 %v295_v12 }
  0x18   :  { %274 = vmatprep.subr.bf16.mxu0 %v296_v13 }
  0x1b   :  { %275 = vmatpush3.bf16.msra.mxu0 %v297_v14 }
  0x1c   :  { %276 = vmatprep.subr.bf16.mxu0 %v298_v15 }
  0x1f   :  { %277 = vmatpush3.bf16.msra.mxu0 %v299_v16 }
  0x22   :  { %199 = vmatmul.mubr.bf16.vlgmr.msra.gmra.mxu0 %v300_v17 }
  0xe2   :  { %v278_v18 = vpop.f32.mrf.mxu0 }
  0xe4   :  { %v279_v19 = vpop.f32.mrf.mxu0 }
  0xe5   :  { %v280_v21 = vadd.f32 %v279_v19, %v278_v18 }
  0xe6   :  { %v281_v23 = vpop.f32.mrf.mxu0 }
  0xe7   :  { %v223_v24 = vmul.f32 %v280_v21, %v260_v20 }
  0xe8   :  { %v282_v25 = vpop.f32.mrf.mxu0 }
  0xe9   :  { %v232_v26 = vadd.f32 %v261_v22, %v223_v24  ;;  %v283_v27 = vadd.f32 %v282_v25, %v281_v23 }
  0xeb   :  { %v234_v28 = vmax.f32 %v232_v26, 0.0  ;;  %v224_v29 = vmul.f32 %v283_v27, %v260_v20 }
  0xed   :  { %236 = vst [vmem:[%s398_s4] sm:$0xff] %v234_v28  ;;  %v233_v30 = vadd.f32 %v261_v22, %v224_v29 }
  0xef   :  { %v235_v31 = vmax.f32 %v233_v30, 0.0 }
  0xf1   :  { %237 = vst [vmem:[%s398_s4 + $0x8] sm:$0xff] %v235_v31 }

// kernel: modified_resnet_forward.69
= control target key start
LH: loop header
LB: loop body
LE: loop exit
PB: predicated region body
PF: predicated region fallthrough
CT: control target
= control target key end

     0   :  { %v290_v1 = vmov 0   ;;  %v197_v18 = vlaneseq  ;;  %s402_s1 = inlined_call_operand.vmem [shape: bf16[128,256], index: 1, kind: input, shape index: {}]   ;;  %s403_s0 = inlined_call_operand.vmem [shape: bf16[16,128], index: 0, kind: input, shape index: {}]   ;;  %s404_s2 = inlined_call_operand.vmem [shape: f32[1,256], index: 2, kind: input, shape index: {}]   ;;  %s405_s3 = inlined_call_operand.vmem [shape: f32[1,256], index: 3, kind: input, shape index: {}]   ;;  %s406_s4 = inlined_call_operand.vmem [shape: f32[16,256], index: 4, kind: input, shape index: {}]   ;;  %s407_s5 = inlined_call_operand.vmem [shape: f32[16,256], index: 5, kind: output, shape index: {}]  }
   0x1   :  { %v265_v0 = vld [vmem:[%s402_s1 + $0x74] ss:$8 sps:$4 sm:$0xff]   ;;  %169 = vmatprep.mubr.bf16.mxu0 %v290_v1  ;;  %v267_v2 = vld [vmem:[%s402_s1 + $0x70] ss:$8 sps:$4 sm:$0xff]   ;;  %v268_v3 = vld [vmem:[%s402_s1 + $0x64] ss:$8 sps:$4 sm:$0xff]  }
   0x2   :  { %137 = vmatprep.subr.bf16.mxu0 %v265_v0  ;;  %v270_v4 = vld [vmem:[%s402_s1 + $0x60] ss:$8 sps:$4 sm:$0xff]   ;;  %v271_v5 = vld [vmem:[%s402_s1 + $0x54] ss:$8 sps:$4 sm:$0xff]   ;;  %v273_v6 = vld [vmem:[%s402_s1 + $0x50] ss:$8 sps:$4 sm:$0xff]  }
   0x3   :  { %138 = vmatpush1.bf16.msra.mxu0 %v267_v2  ;;  %v274_v7 = vld [vmem:[%s402_s1 + $0x44] ss:$8 sps:$4 sm:$0xff]   ;;  %v276_v8 = vld [vmem:[%s402_s1 + $0x40] ss:$8 sps:$4 sm:$0xff]   ;;  %v277_v9 = vld [vmem:[%s402_s1 + $0x34] ss:$8 sps:$4 sm:$0xff]  }
   0x4   :  { %139 = vmatprep.subr.bf16.mxu0 %v268_v3  ;;  %v279_v10 = vld [vmem:[%s402_s1 + $0x30] ss:$8 sps:$4 sm:$0xff]   ;;  %v280_v11 = vld [vmem:[%s402_s1 + $0x24] ss:$8 sps:$4 sm:$0xff]   ;;  %v282_v12 = vld [vmem:[%s402_s1 + $0x20] ss:$8 sps:$4 sm:$0xff]  }
   0x5   :  { %v283_v13 = vld [vmem:[%s402_s1 + $0x14] ss:$8 sps:$4 sm:$0xff]   ;;  %v285_v14 = vld [vmem:[%s402_s1 + $0x10] ss:$8 sps:$4 sm:$0xff]   ;;  %v286_v15 = vld [vmem:[%s402_s1 + $0x4] ss:$8 sps:$4 sm:$0xff]  }
   0x6   :  { %v288_v16 = vld [vmem:[%s402_s1] ss:$8 sps:$4 sm:$0xff]   ;;  %v198_v19 = vshrl.u32 %v197_v18, 7  ;;  %v229_v39 = vld [vmem:[%s406_s4 + $0x10] sm:$0xff]  ;;  %v230_v45 = vld [vmem:[%s406_s4 + $0x18] sm:$0xff] }
   0x7   :  { %140 = vmatpush1.bf16.msra.mxu0 %v270_v4  ;;  %v289_v17 = vld [vmem:[%s403_s0] sm:$0xff]   ;;  %v228_v34 = vld [vmem:[%s406_s4 + $0x8] sm:$0xff] }
   0x8   :  { %141 = vmatprep.subr.bf16.mxu0 %v271_v5  ;;  %v199_v20 = vsub.s32 0, %v198_v19  ;;  %v195_v21 = vld [vmem:[%s404_s2] sm:$0x3]  ;;  %v203_v22 = vsub.s32 1, %v198_v19 }
   0x9   :  { %v211_v23 = vld [vmem:[%s405_s3] sm:$0x3] }
   0xa   :  { %v200_v24 = vrot.slane %v195_v21, %v199_v20  ;;  %v216_v25 = vrot.slane %v211_v23, %v199_v20  ;;  %v204_v26 = vrot.slane %v195_v21, %v203_v22  ;;  %v220_v29 = vrot.slane %v211_v23, %v203_v22  ;;  %v227_v30 = vld [vmem:[%s406_s4] sm:$0xff] }
   0xb   :  { %142 = vmatpush1.bf16.msra.mxu0 %v273_v6 }
   0xc   :  { %143 = vmatprep.subr.bf16.mxu0 %v274_v7 }
   0xf   :  { %144 = vmatpush1.bf16.msra.mxu0 %v276_v8 }
  0x10   :  { %145 = vmatprep.subr.bf16.mxu0 %v277_v9 }
  0x13   :  { %146 = vmatpush1.bf16.msra.mxu0 %v279_v10 }
  0x14   :  { %147 = vmatprep.subr.bf16.mxu0 %v280_v11 }
  0x17   :  { %148 = vmatpush1.bf16.msra.mxu0 %v282_v12 }
  0x18   :  { %149 = vmatprep.subr.bf16.mxu0 %v283_v13 }
  0x1b   :  { %150 = vmatpush1.bf16.msra.mxu0 %v285_v14 }
  0x1c   :  { %151 = vmatprep.subr.bf16.mxu0 %v286_v15 }
  0x1f   :  { %152 = vmatpush1.bf16.msra.mxu0 %v288_v16 }
  0x22   :  { %170 = vmatmul.mubr.bf16.vlgmr.msra.gmra.mxu0 %v289_v17 }
  0xe2   :  { %v171_v27 = vpop.f32.mrf.mxu0 }
  0xe3   :  { %v207_v28 = vmul.f32 %v200_v24, %v171_v27 }
  0xe4   :  { %v173_v31 = vpop.f32.mrf.mxu0 }
  0xe5   :  { %v223_v32 = vadd.f32 %v216_v25, %v207_v28  ;;  %v208_v33 = vmul.f32 %v204_v26, %v173_v31 }
  0xe6   :  { %v175_v35 = vpop.f32.mrf.mxu0 }
  0xe7   :  { %v231_v36 = vadd.f32 %v227_v30, %v223_v32  ;;  %v224_v37 = vadd.f32 %v220_v29, %v208_v33  ;;  %v209_v38 = vmul.f32 %v200_v24, %v175_v35 }
  0xe8   :  { %v177_v40 = vpop.f32.mrf.mxu0 }
  0xe9   :  { %v235_v41 = vmax.f32 %v231_v36, 0.0  ;;  %v232_v42 = vadd.f32 %v228_v34, %v224_v37  ;;  %v225_v43 = vadd.f32 %v216_v25, %v209_v38  ;;  %v210_v44 = vmul.f32 %v204_v26, %v177_v40 }
  0xeb   :  { %239 = vst [vmem:[%s407_s5] sm:$0xff] %v235_v41  ;;  %v236_v46 = vmax.f32 %v232_v42, 0.0  ;;  %v233_v47 = vadd.f32 %v229_v39, %v225_v43  ;;  %v226_v48 = vadd.f32 %v220_v29, %v210_v44 }
  0xed   :  { %240 = vst [vmem:[%s407_s5 + $0x8] sm:$0xff] %v236_v46  ;;  %v237_v49 = vmax.f32 %v233_v47, 0.0  ;;  %v234_v50 = vadd.f32 %v230_v45, %v226_v48 }
  0xef   :  { %241 = vst [vmem:[%s407_s5 + $0x10] sm:$0xff] %v237_v49  ;;  %v238_v51 = vmax.f32 %v234_v50, 0.0 }
  0xf1   :  { %242 = vst [vmem:[%s407_s5 + $0x18] sm:$0xff] %v238_v51 }

</bundles_post_ra>
